<compile_context>
chip_gen: v5e
topology: v5e:2x2
jax: 0.10.0
libtpu: 0.0.40
codegen_flags: <defaults>
</compile_context>

<pallas_src>
import jax
import jax.numpy as jnp
from jax.experimental import pallas as pl
from jax.experimental.pallas import tpu as pltpu

# Small, forward-consistent shapes.
B, CIN, H, W = 2, 4, 16, 16
COUT = 32                 # per-branch feature channels
FEAT = 2 * COUT           # concat of the two branch GAP vectors
NUM_CLASSES = 8
KH = KW = 3
K_IM2COL = KH * KW * CIN  # 36


# --------------------------- fused DModel kernel -----------------------------
def dmodel_kernel(xp_ref, wc_ref, bc_ref, wfc_ref, bfc_ref, o_ref):
    # xp_ref : [B, H+2, W+2, CIN]   f32 "same"-padded NHWC image (channels->lanes)
    # wc_ref : [KH*KW, CIN, FEAT]   f32 fused conv weights, FEAT = [branch1|branch2]
    # bc_ref : [1, FEAT]            f32 fused conv bias
    # wfc_ref: [FEAT, NUM_CLASSES]  f32 classifier (gmodel) weight
    # bfc_ref: [1, NUM_CLASSES]     f32 classifier bias
    # o_ref  : [B, NUM_CLASSES]     f32 logits
    xp = xp_ref[...]  # one VMEM load of the padded image (~430 KiB tiled)

    # 3x3 conv, BOTH branches fused along the output-channel axis, as 9
    # accumulating MXU dots.  im2col is pure static slicing of the resident
    # padded image — nothing ever touches HBM.  f32 in, f32 accumulate.
    acc = None
    for t in range(KH * KW):
        ky, kx = t // KW, t % KW
        xt = xp[:, ky:ky + H, kx:kx + W, :].reshape(B * H * W, CIN)   # [BHW, CIN]
        d = jnp.dot(xt, wc_ref[t], preferred_element_type=jnp.float32)  # [BHW, FEAT]
        acc = d if acc is None else acc + d

    # Bias + ReLU in f32 on the VPU (v5e has no bf16 VPU; VALU has plenty of
    # slack on v6e/v7x).  Channel layout = [branch1 | branch2], so the v1/v2
    # concat falls out of the layout for free.
    feat = jnp.maximum(acc + bc_ref[...], 0.0)                        # [BHW, FEAT]

    # Global average pool: cheap per-batch sublane reduce (replaces the former
    # M=2 / K=512 pooling matmul and its operand entirely).
    v = jnp.sum(feat.reshape(B, H * W, FEAT), axis=1) * (1.0 / (H * W))  # [B, FEAT]

    # gmodel: classifier head, logit = v @ Wfc + bfc.
    o_ref[...] = jnp.dot(v, wfc_ref[...],
                         preferred_element_type=jnp.float32) + bfc_ref[...]


# ------------------------------- wrapper -------------------------------------
def dmodel_forward(img_nchw, params):
    """DModel.forward: logit = gmodel(mmodel(img, True)[0]).

    The auxiliary attention map `att` is discarded by DModel.forward, so it is
    never computed (dead work removed).
    """
    wconv, bconv, wfc, bfc = params   # already fused once at init time

    # Irreducible layout plumbing from the PyTorch NCHW interface: channels-last
    # + "same" zero pad.  Two tiny HLOs on a ~4 KB tensor; the 72 KB im2col
    # patch tensor (and its bf16 copy) from the previous version are gone.
    x = jnp.transpose(img_nchw, (0, 2, 3, 1))                     # [B,H,W,CIN]
    xp = jnp.pad(x, ((0, 0), (1, 1), (1, 1), (0, 0)))             # [B,H+2,W+2,CIN]

    flops = (2 * (B * H * W) * K_IM2COL * FEAT        # conv (9 fused dots)
             + (B * H * W) * FEAT                     # global-average-pool reduce
             + 2 * B * FEAT * NUM_CLASSES)            # classifier head
    bytes_accessed = 4 * (xp.size + wconv.size + bconv.size
                          + wfc.size + bfc.size + B * NUM_CLASSES)

    # Single launch; no grid / no tiling — the whole resident set (<0.5 MiB) fits
    # comfortably in VMEM on v5e/v6e/v7x.  Every operand explicitly pinned to VMEM.
    logit = pl.pallas_call(
        dmodel_kernel,
        out_shape=jax.ShapeDtypeStruct((B, NUM_CLASSES), jnp.float32),
        in_specs=[pl.BlockSpec(memory_space=pltpu.MemorySpace.VMEM)
                  for _ in range(5)],
        out_specs=pl.BlockSpec(memory_space=pltpu.MemorySpace.VMEM),
        cost_estimate=pl.CostEstimate(flops=flops, transcendentals=0,
                                      bytes_accessed=bytes_accessed),
    )(xp, wconv, bconv, wfc, bfc)
    return logit


def init_params(key):
    k1, k2, k3, k4, k5 = jax.random.split(key, 5)
    # Two synthetic conv branches + linear head (mmodel/gmodel stand-ins).
    w1 = 0.1 * jax.random.normal(k1, (KH * KW, CIN, COUT), jnp.float32)
    b1 = 0.01 * jax.random.normal(k2, (1, COUT), jnp.float32)
    w2 = 0.1 * jax.random.normal(k3, (KH * KW, CIN, COUT), jnp.float32)
    b2 = 0.01 * jax.random.normal(k4, (1, COUT), jnp.float32)
    wfc = 0.1 * jax.random.normal(k5, (FEAT, NUM_CLASSES), jnp.float32)
    bfc = jnp.zeros((1, NUM_CLASSES), jnp.float32)
    # Fuse the two branches ONCE at init time (no per-call constant HLOs):
    # output channels = [branch1 | branch2], so the feature concat is free.
    wconv = jnp.concatenate([w1, w2], axis=2)         # [KH*KW, CIN, FEAT]
    bconv = jnp.concatenate([b1, b2], axis=1)         # [1, FEAT]
    return (wconv, bconv, wfc, bfc)


if __name__ == "__main__":
    key = jax.random.PRNGKey(0)
    k_img, k_par = jax.random.split(key)
    img = jax.random.normal(k_img, (B, CIN, H, W), jnp.float32)   # NCHW, like PyTorch
    params = init_params(k_par)

    logit = jax.jit(dmodel_forward)(img, params)
    jax.block_until_ready(logit)
    assert logit.shape == (B, NUM_CLASSES)
    assert bool(jnp.all(jnp.isfinite(logit)))
    print("KERNEL_OK")
</pallas_src>

<mosaic_0001>
module attributes {stable_mosaic.version = 11 : i64} {
  func.func @dmodel_kernel(%arg0: memref<2x18x18x4xf32, #tpu.memory_space<vmem>>, %arg1: memref<9x4x64xf32, #tpu.memory_space<vmem>>, %arg2: memref<1x64xf32, #tpu.memory_space<vmem>>, %arg3: memref<64x8xf32, #tpu.memory_space<vmem>>, %arg4: memref<1x8xf32, #tpu.memory_space<vmem>>, %arg5: memref<2x8xf32, #tpu.memory_space<vmem>>) attributes {dimension_semantics = [], scalar_prefetch = 0 : i64, scratch_operands = 0 : i64, tpu.core_type = #tpu.core_type<tc>} {
    %c0 = arith.constant 0 : index
    %c0_0 = arith.constant 0 : index
    %c0_1 = arith.constant 0 : index
    %c0_2 = arith.constant 0 : index
    %0 = vector.load %arg0[%c0, %c0_0, %c0_1, %c0_2] : memref<2x18x18x4xf32, #tpu.memory_space<vmem>>, vector<2x18x18x4xf32>
    %1 = vector.extract_strided_slice %0 {offsets = [0, 0, 0, 0], sizes = [2, 16, 16, 4], strides = [1, 1, 1, 1]} : vector<2x18x18x4xf32> to vector<2x16x16x4xf32>
    %2 = vector.shape_cast %1 : vector<2x16x16x4xf32> to vector<512x4xf32>
    %c0_3 = arith.constant 0 : index
    %c0_4 = arith.constant 0 : index
    %c0_5 = arith.constant 0 : index
    %3 = vector.load %arg1[%c0_3, %c0_4, %c0_5] : memref<9x4x64xf32, #tpu.memory_space<vmem>>, vector<1x4x64xf32>
    %4 = vector.shape_cast %3 : vector<1x4x64xf32> to vector<4x64xf32>
    %cst = arith.constant dense<0.000000e+00> : vector<512x64xf32>
    %5 = tpu.matmul %2, %4, %cst {dimension_numbers = #tpu.dot_dimension_numbers<[1], [0], [0], [1], [0, 0, 1, 1], [], []>} : vector<512x4xf32>, vector<4x64xf32>, vector<512x64xf32> -> vector<512x64xf32>
    %6 = vector.extract_strided_slice %0 {offsets = [0, 0, 1, 0], sizes = [2, 16, 16, 4], strides = [1, 1, 1, 1]} : vector<2x18x18x4xf32> to vector<2x16x16x4xf32>
    %7 = vector.shape_cast %6 : vector<2x16x16x4xf32> to vector<512x4xf32>
    %c1 = arith.constant 1 : index
    %c0_6 = arith.constant 0 : index
    %c0_7 = arith.constant 0 : index
    %8 = vector.load %arg1[%c1, %c0_6, %c0_7] : memref<9x4x64xf32, #tpu.memory_space<vmem>>, vector<1x4x64xf32>
    %9 = vector.shape_cast %8 : vector<1x4x64xf32> to vector<4x64xf32>
    %cst_8 = arith.constant dense<0.000000e+00> : vector<512x64xf32>
    %10 = tpu.matmul %7, %9, %cst_8 {dimension_numbers = #tpu.dot_dimension_numbers<[1], [0], [0], [1], [0, 0, 1, 1], [], []>} : vector<512x4xf32>, vector<4x64xf32>, vector<512x64xf32> -> vector<512x64xf32>
    %11 = arith.addf %5, %10 : vector<512x64xf32>
    %12 = vector.extract_strided_slice %0 {offsets = [0, 0, 2, 0], sizes = [2, 16, 16, 4], strides = [1, 1, 1, 1]} : vector<2x18x18x4xf32> to vector<2x16x16x4xf32>
    %13 = vector.shape_cast %12 : vector<2x16x16x4xf32> to vector<512x4xf32>
    %c2 = arith.constant 2 : index
    %c0_9 = arith.constant 0 : index
    %c0_10 = arith.constant 0 : index
    %14 = vector.load %arg1[%c2, %c0_9, %c0_10] : memref<9x4x64xf32, #tpu.memory_space<vmem>>, vector<1x4x64xf32>
    %15 = vector.shape_cast %14 : vector<1x4x64xf32> to vector<4x64xf32>
    %cst_11 = arith.constant dense<0.000000e+00> : vector<512x64xf32>
    %16 = tpu.matmul %13, %15, %cst_11 {dimension_numbers = #tpu.dot_dimension_numbers<[1], [0], [0], [1], [0, 0, 1, 1], [], []>} : vector<512x4xf32>, vector<4x64xf32>, vector<512x64xf32> -> vector<512x64xf32>
    %17 = arith.addf %11, %16 : vector<512x64xf32>
    %18 = vector.extract_strided_slice %0 {offsets = [0, 1, 0, 0], sizes = [2, 16, 16, 4], strides = [1, 1, 1, 1]} : vector<2x18x18x4xf32> to vector<2x16x16x4xf32>
    %19 = vector.shape_cast %18 : vector<2x16x16x4xf32> to vector<512x4xf32>
    %c3 = arith.constant 3 : index
    %c0_12 = arith.constant 0 : index
    %c0_13 = arith.constant 0 : index
    %20 = vector.load %arg1[%c3, %c0_12, %c0_13] : memref<9x4x64xf32, #tpu.memory_space<vmem>>, vector<1x4x64xf32>
    %21 = vector.shape_cast %20 : vector<1x4x64xf32> to vector<4x64xf32>
    %cst_14 = arith.constant dense<0.000000e+00> : vector<512x64xf32>
    %22 = tpu.matmul %19, %21, %cst_14 {dimension_numbers = #tpu.dot_dimension_numbers<[1], [0], [0], [1], [0, 0, 1, 1], [], []>} : vector<512x4xf32>, vector<4x64xf32>, vector<512x64xf32> -> vector<512x64xf32>
    %23 = arith.addf %17, %22 : vector<512x64xf32>
    %24 = vector.extract_strided_slice %0 {offsets = [0, 1, 1, 0], sizes = [2, 16, 16, 4], strides = [1, 1, 1, 1]} : vector<2x18x18x4xf32> to vector<2x16x16x4xf32>
    %25 = vector.shape_cast %24 : vector<2x16x16x4xf32> to vector<512x4xf32>
    %c4 = arith.constant 4 : index
    %c0_15 = arith.constant 0 : index
    %c0_16 = arith.constant 0 : index
    %26 = vector.load %arg1[%c4, %c0_15, %c0_16] : memref<9x4x64xf32, #tpu.memory_space<vmem>>, vector<1x4x64xf32>
    %27 = vector.shape_cast %26 : vector<1x4x64xf32> to vector<4x64xf32>
    %cst_17 = arith.constant dense<0.000000e+00> : vector<512x64xf32>
    %28 = tpu.matmul %25, %27, %cst_17 {dimension_numbers = #tpu.dot_dimension_numbers<[1], [0], [0], [1], [0, 0, 1, 1], [], []>} : vector<512x4xf32>, vector<4x64xf32>, vector<512x64xf32> -> vector<512x64xf32>
    %29 = arith.addf %23, %28 : vector<512x64xf32>
    %30 = vector.extract_strided_slice %0 {offsets = [0, 1, 2, 0], sizes = [2, 16, 16, 4], strides = [1, 1, 1, 1]} : vector<2x18x18x4xf32> to vector<2x16x16x4xf32>
    %31 = vector.shape_cast %30 : vector<2x16x16x4xf32> to vector<512x4xf32>
    %c5 = arith.constant 5 : index
    %c0_18 = arith.constant 0 : index
    %c0_19 = arith.constant 0 : index
    %32 = vector.load %arg1[%c5, %c0_18, %c0_19] : memref<9x4x64xf32, #tpu.memory_space<vmem>>, vector<1x4x64xf32>
    %33 = vector.shape_cast %32 : vector<1x4x64xf32> to vector<4x64xf32>
    %cst_20 = arith.constant dense<0.000000e+00> : vector<512x64xf32>
    %34 = tpu.matmul %31, %33, %cst_20 {dimension_numbers = #tpu.dot_dimension_numbers<[1], [0], [0], [1], [0, 0, 1, 1], [], []>} : vector<512x4xf32>, vector<4x64xf32>, vector<512x64xf32> -> vector<512x64xf32>
    %35 = arith.addf %29, %34 : vector<512x64xf32>
    %36 = vector.extract_strided_slice %0 {offsets = [0, 2, 0, 0], sizes = [2, 16, 16, 4], strides = [1, 1, 1, 1]} : vector<2x18x18x4xf32> to vector<2x16x16x4xf32>
    %37 = vector.shape_cast %36 : vector<2x16x16x4xf32> to vector<512x4xf32>
    %c6 = arith.constant 6 : index
    %c0_21 = arith.constant 0 : index
    %c0_22 = arith.constant 0 : index
    %38 = vector.load %arg1[%c6, %c0_21, %c0_22] : memref<9x4x64xf32, #tpu.memory_space<vmem>>, vector<1x4x64xf32>
    %39 = vector.shape_cast %38 : vector<1x4x64xf32> to vector<4x64xf32>
    %cst_23 = arith.constant dense<0.000000e+00> : vector<512x64xf32>
    %40 = tpu.matmul %37, %39, %cst_23 {dimension_numbers = #tpu.dot_dimension_numbers<[1], [0], [0], [1], [0, 0, 1, 1], [], []>} : vector<512x4xf32>, vector<4x64xf32>, vector<512x64xf32> -> vector<512x64xf32>
    %41 = arith.addf %35, %40 : vector<512x64xf32>
    %42 = vector.extract_strided_slice %0 {offsets = [0, 2, 1, 0], sizes = [2, 16, 16, 4], strides = [1, 1, 1, 1]} : vector<2x18x18x4xf32> to vector<2x16x16x4xf32>
    %43 = vector.shape_cast %42 : vector<2x16x16x4xf32> to vector<512x4xf32>
    %c7 = arith.constant 7 : index
    %c0_24 = arith.constant 0 : index
    %c0_25 = arith.constant 0 : index
    %44 = vector.load %arg1[%c7, %c0_24, %c0_25] : memref<9x4x64xf32, #tpu.memory_space<vmem>>, vector<1x4x64xf32>
    %45 = vector.shape_cast %44 : vector<1x4x64xf32> to vector<4x64xf32>
    %cst_26 = arith.constant dense<0.000000e+00> : vector<512x64xf32>
    %46 = tpu.matmul %43, %45, %cst_26 {dimension_numbers = #tpu.dot_dimension_numbers<[1], [0], [0], [1], [0, 0, 1, 1], [], []>} : vector<512x4xf32>, vector<4x64xf32>, vector<512x64xf32> -> vector<512x64xf32>
    %47 = arith.addf %41, %46 : vector<512x64xf32>
    %48 = vector.extract_strided_slice %0 {offsets = [0, 2, 2, 0], sizes = [2, 16, 16, 4], strides = [1, 1, 1, 1]} : vector<2x18x18x4xf32> to vector<2x16x16x4xf32>
    %49 = vector.shape_cast %48 : vector<2x16x16x4xf32> to vector<512x4xf32>
    %c8 = arith.constant 8 : index
    %c0_27 = arith.constant 0 : index
    %c0_28 = arith.constant 0 : index
    %50 = vector.load %arg1[%c8, %c0_27, %c0_28] : memref<9x4x64xf32, #tpu.memory_space<vmem>>, vector<1x4x64xf32>
    %51 = vector.shape_cast %50 : vector<1x4x64xf32> to vector<4x64xf32>
    %cst_29 = arith.constant dense<0.000000e+00> : vector<512x64xf32>
    %52 = tpu.matmul %49, %51, %cst_29 {dimension_numbers = #tpu.dot_dimension_numbers<[1], [0], [0], [1], [0, 0, 1, 1], [], []>} : vector<512x4xf32>, vector<4x64xf32>, vector<512x64xf32> -> vector<512x64xf32>
    %53 = arith.addf %47, %52 : vector<512x64xf32>
    %c0_30 = arith.constant 0 : index
    %c0_31 = arith.constant 0 : index
    %54 = vector.load %arg2[%c0_30, %c0_31] : memref<1x64xf32, #tpu.memory_space<vmem>>, vector<1x64xf32>
    %55 = vector.broadcast %54 : vector<1x64xf32> to vector<512x64xf32>
    %56 = arith.addf %53, %55 : vector<512x64xf32>
    %cst_32 = arith.constant 0.000000e+00 : f32
    %57 = vector.broadcast %cst_32 : f32 to vector<512x64xf32>
    %58 = arith.maximumf %56, %57 : vector<512x64xf32>
    %59 = vector.shape_cast %58 : vector<512x64xf32> to vector<2x256x64xf32>
    %cst_33 = arith.constant dense<0.000000e+00> : vector<2x64xf32>
    %60 = vector.multi_reduction <add>, %59, %cst_33 [1] : vector<2x256x64xf32> to vector<2x64xf32>
    %cst_34 = arith.constant 3.906250e-03 : f32
    %61 = vector.broadcast %cst_34 : f32 to vector<2x64xf32>
    %62 = arith.mulf %60, %61 : vector<2x64xf32>
    %c0_35 = arith.constant 0 : index
    %c0_36 = arith.constant 0 : index
    %63 = vector.load %arg3[%c0_35, %c0_36] : memref<64x8xf32, #tpu.memory_space<vmem>>, vector<64x8xf32>
    %cst_37 = arith.constant dense<0.000000e+00> : vector<2x8xf32>
    %64 = tpu.matmul %62, %63, %cst_37 {dimension_numbers = #tpu.dot_dimension_numbers<[1], [0], [0], [1], [0, 0, 1, 1], [], []>} : vector<2x64xf32>, vector<64x8xf32>, vector<2x8xf32> -> vector<2x8xf32>
    %c0_38 = arith.constant 0 : index
    %c0_39 = arith.constant 0 : index
    %65 = vector.load %arg4[%c0_38, %c0_39] : memref<1x8xf32, #tpu.memory_space<vmem>>, vector<1x8xf32>
    %66 = vector.broadcast %65 : vector<1x8xf32> to vector<2x8xf32>
    %67 = arith.addf %64, %66 : vector<2x8xf32>
    %c0_40 = arith.constant 0 : index
    %c0_41 = arith.constant 0 : index
    %68 = vector.load %arg5[%c0_40, %c0_41] : memref<2x8xf32, #tpu.memory_space<vmem>>, vector<2x8xf32>
    tpu.vector_store %arg5[%c0_40, %c0_41], %67 {strides = array<i32>} : memref<2x8xf32, #tpu.memory_space<vmem>>, vector<2x8xf32>,
    return
  }
}

</mosaic_0001>

<bundles_post_ra>
// kernel: dmodel_forward.1
= control target key start
LH: loop header
LB: loop body
LE: loop exit
PB: predicated region body
PF: predicated region fallthrough
CT: control target
= control target key end

     0   :  { %vm518_vm0 = vcmask 1043456   ;;  %vm226_vm1 = vcmask 1046528   ;;  %vm389_vm2 = vcmask 31744   ;;  %s7824_s0 = inlined_call_operand.vmem [shape: f32[2,18,18,4], index: 0, kind: input, shape index: {}]   ;;  %s7825_s1 = inlined_call_operand.vmem [shape: f32[9,4,64], index: 1, kind: input, shape index: {}]   ;;  %s7826_s2 = inlined_call_operand.vmem [shape: f32[1,64], index: 2, kind: input, shape index: {}]   ;;  %s7827_s3 = inlined_call_operand.vmem [shape: f32[64,8], index: 3, kind: input, shape index: {}]   ;;  %s7828_s4 = inlined_call_operand.vmem [shape: f32[1,8], index: 4, kind: input, shape index: {}]   ;;  %s7829_s5 = inlined_call_operand.hbm [shape: f32[2,8], index: 5, kind: output, shape index: {}]  }
   0x1   :  { %v3735_v0 = vld [vmem:[%s7825_s1 + $0x4] sm:$0xf]  ;;  %v4516_v1 = vld [vmem:[%s7824_s0 + $0xc8] sm:$0xff]  ;;  %v47_v2 = vld [vmem:[%s7824_s0 + $0xd0] sm:$0x3] }
   0x2   :  { %4329 = vmatpush.msk.msra.mxu1 %vm518_vm0, %v3735_v0  ;;  %4330 = vmatpush.msk.msra.mxu2 %vm518_vm0, %v3735_v0  ;;  %v7830_v3 = vrot.slane %v4516_v1, 1  ;;  %v270_v4 = vrot.slane %v47_v2, 1  ;;  %v66_v5 = vld [vmem:[%s7824_s0 + $0x168] sm:$0xff]  ;;  %v67_v6 = vld [vmem:[%s7824_s0 + $0x170] sm:$0xff]  ;;  %v4537_v10 = vld [vmem:[%s7824_s0 + $0x260] sm:$0xff] }
   0x3   :  { %v302_v7 = vrot.slane %v66_v5, 1  ;;  %v303_v8 = vrot.slane %v67_v6, 1  ;;  %v3866_v9 = vld [vmem:[%s7825_s1 + $0x8] sm:$0xf]  ;;  %4331 = vmatpush.msk.msra.mxu3 %vm518_vm0, %v3735_v0  ;;  %v4542_v11 = vld [vmem:[%s7824_s0 + $0xd8] sm:$0xff]  ;;  %3736 = vmatpush.msk.msra.mxu0 %vm518_vm0, %v3735_v0  ;;  %v7831_v14 = vrot.slane %v4537_v10, 1 }
   0x4   :  { %v4548_v12 = vsel %vm226_vm1, %v7830_v3, %v270_v4  ;;  %3867 = vmatpush.msk.msrb.mxu2 %vm518_vm0, %v3866_v9  ;;  %v98_v13 = vld [vmem:[%s7824_s0 + $0x268] sm:$0x3]  ;;  %v3932_v15 = vld [vmem:[%s7825_s1 + $0xc] sm:$0xf]  ;;  %v4561_v16 = vld [vmem:[%s7824_s0 + $0xe0] sm:$0xff]  ;;  %v272_v21 = vrot.slane %v4542_v11, 1 }
   0x5   :  { %8000 = vst [vmem:[#allocation5_spill] sm:$0xff] %v4548_v12  ;;  %3754 = vmatmul.msk.f32.vlgmr.msra.gmra.mxu1 %vm389_vm2, %v4548_v12  ;;  %v4566_v17 = vsel %vm226_vm1, %v302_v7, %v303_v8  ;;  %v345_v18 = vrot.slane %v98_v13, 1  ;;  %3933 = vmatpush.msk.msrb.mxu3 %vm518_vm0, %v3932_v15  ;;  %v68_v19 = vld [vmem:[%s7824_s0 + $0x178] sm:$0x3]  ;;  %v4575_v20 = vld [vmem:[%s7824_s0] sm:$0xff]  ;;  %v273_v22 = vrot.slane %v4561_v16, 1 }
   0x6   :  { %8001 = vst [vmem:[#allocation6_spill] sm:$0xff] %v4566_v17  ;;  %3767 = vmatmul.msk.f32.vlgmr.msra.gmra.mxu2 %vm389_vm2, %v4566_v17  ;;  %v4584_v23 = vld [vmem:[%s7824_s0 + $0x8] sm:$0xff]  ;;  %v227_v24 = vrot.slane %v4575_v20, 1  ;;  %v99_v25 = vld [vmem:[%s7824_s0 + $0x270] sm:$0xff]  ;;  %v100_v26 = vld [vmem:[%s7824_s0 + $0x278] sm:$0xff]  ;;  %v305_v28 = vrot.slane %v68_v19, 1 }
   0x7   :  { %v4596_v27 = vsel %vm226_vm1, %v7831_v14, %v345_v18  ;;  %v228_v29 = vrot.slane %v4584_v23, 1  ;;  %v3998_v30 = vld [vmem:[%s7825_s1 + $0x10] sm:$0xf]  ;;  %v347_v33 = vrot.slane %v99_v25, 1  ;;  %v348_v34 = vrot.slane %v100_v26, 1  ;;  %v76_v40 = vld [vmem:[%s7824_s0 + $0x1b8] sm:$0xff] }
   0x8   :  { %8002 = vst [vmem:[#allocation7_spill] sm:$0xff] %v4596_v27  ;;  %3784 = vmatmul.msk.f32.vlgmr.msra.gmra.mxu3 %vm389_vm2, %v4596_v27  ;;  %3999 = vmatpush.msk.msrb.mxu0 %vm518_vm0, %v3998_v30  ;;  %v4608_v31 = vld [vmem:[%s7824_s0 + $0x10] sm:$0x3]  ;;  %v4612_v35 = vsel %vm226_vm1, %v272_v21, %v273_v22  ;;  %v4616_v36 = vsel %vm226_vm1, %v303_v8, %v305_v28  ;;  %v4621_v37 = vld [vmem:[%s7824_s0 + $0xe8] sm:$0x3]  ;;  %v308_v45 = vrot.slane %v76_v40, 1 }
   0x9   :  { %v229_v32 = vsel %vm226_vm1, %v227_v24, %v228_v29  ;;  %8003 = vst [vmem:[#allocation8_spill] sm:$0xff] %v4612_v35  ;;  %v230_v38 = vrot.slane %v4608_v31, 1  ;;  %v75_v39 = vld [vmem:[%s7824_s0 + $0x1b0] sm:$0xff]  ;;  %v4633_v41 = vsel %vm226_vm1, %v347_v33, %v348_v34  ;;  %v275_v42 = vrot.slane %v4621_v37, 1  ;;  %v101_v43 = vld [vmem:[%s7824_s0 + $0x280] sm:$0x3] }
   0xa   :  { %3737 = vmatmul.msk.f32.vlgmr.msra.gmra.mxu0 %vm389_vm2, %v229_v32  ;;  %8004 = vst [vmem:[#allocation9_spill] sm:$0xff] %v4616_v36  ;;  %v307_v44 = vrot.slane %v75_v39, 1  ;;  %v129_v47 = vld [vmem:[%s7825_s1] sm:$0xf]  ;;  %v4650_v48 = vld [vmem:[%s7824_s0 + $0x18] sm:$0xff]  ;;  %v350_v50 = vrot.slane %v101_v43, 1 }
   0xb   :  { %8005 = vst [vmem:[#allocation10_spill] sm:$0xff] %v4633_v41  ;;  %v231_v46 = vsel %vm226_vm1, %v228_v29, %v230_v38  ;;  %v4655_v49 = vld [vmem:[%s7824_s0 + $0x20] sm:$0xff]  ;;  %3801 = vmatpush.msk.msrb.mxu1 %vm518_vm0, %v129_v47  ;;  %v4659_v51 = vsel %vm226_vm1, %v273_v22, %v275_v42  ;;  %v4665_v52 = vld [vmem:[%s7824_s0 + $0xf0] sm:$0xff]  ;;  %v4670_v53 = vld [vmem:[%s7824_s0 + $0xf8] sm:$0xff]  ;;  %v232_v55 = vrot.slane %v4650_v48, 1 }
   0xc   :  { %v309_v54 = vsel %vm226_vm1, %v307_v44, %v308_v45  ;;  %v233_v56 = vrot.slane %v4655_v49, 1 }
   0xd   :  { %3755 = vmatmul.msk.f32.gmra.mxu1 %vm389_vm2, %v4612_v35 }
   0xe   :  { %3768 = vmatmul.msk.f32.gmra.mxu2 %vm389_vm2, %v4616_v36 }
  0x10   :  { %3785 = vmatmul.msk.f32.gmra.mxu3 %vm389_vm2, %v4633_v41 }
  0x12   :  { %3738 = vmatmul.msk.f32.gmra.mxu0 %vm389_vm2, %v231_v46 }
  0x13   :  { %10 = vsyncpa [#allocation3], 0  ;;  %v77_v57 = vld [vmem:[%s7824_s0 + $0x1c0] sm:$0x3]  ;;  %v4681_v58 = vsel %vm226_vm1, %v348_v34, %v350_v50  ;;  %v277_v59 = vrot.slane %v4665_v52, 1  ;;  %v278_v60 = vrot.slane %v4670_v53, 1  ;;  %v4693_v0 = vsel %vm226_vm1, %v232_v55, %v233_v56 }
  0x14   :  { %8006 = vst [vmem:[#allocation11_spill] sm:$0xff] %v4681_v58  ;;  %v102_v61 = vld [vmem:[%s7824_s0 + $0x288] sm:$0xff]  ;;  %v103_v62 = vld [vmem:[%s7824_s0 + $0x290] sm:$0xff]  ;;  %v310_v63 = vrot.slane %v77_v57, 1  ;;  %v4711_v8 = vld [vmem:[%s7824_s0 + $0x100] sm:$0x3] }
  0x15   :  { %3756 = vmatmul.msk.f32.gmra.mxu1 %vm389_vm2, %v4659_v51  ;;  %v4700_v2 = vld [vmem:[%s7824_s0 + $0x28] sm:$0x3]  ;;  %v352_v4 = vrot.slane %v102_v61, 1  ;;  %v353_v5 = vrot.slane %v103_v62, 1  ;;  %v4703_v6 = vsel %vm226_vm1, %v277_v59, %v278_v60  ;;  %8007 = vst [vmem:[#allocation12_spill] sm:$0xff] %v4711_v8  ;;  %v79_v15 = vld [vmem:[%s7824_s0 + $0x1d0] sm:$0xff] }
  0x16   :  { %3769 = vmatmul.msk.f32.gmra.mxu2 %vm389_vm2, %v309_v54  ;;  %v311_v7 = vsel %vm226_vm1, %v308_v45, %v310_v63  ;;  %v235_v9 = vrot.slane %v4700_v2, 1  ;;  %v78_v13 = vld [vmem:[%s7824_s0 + $0x1c8] sm:$0xff]  ;;  %v280_v19 = vrot.slane %v4711_v8, 1  ;;  %v104_v21 = vld [vmem:[%s7824_s0 + $0x298] sm:$0x3]  ;;  %v313_v24 = vrot.slane %v79_v15, 1 }
  0x17   :  { %v4723_v18 = vsel %vm226_vm1, %v352_v4, %v353_v5  ;;  %v312_v22 = vrot.slane %v78_v13, 1  ;;  %v4738_v26 = vld [vmem:[%s7824_s0 + $0x30] sm:$0xff]  ;;  %v4743_v28 = vld [vmem:[%s7824_s0 + $0x38] sm:$0xff]  ;;  %v355_v29 = vrot.slane %v104_v21, 1  ;;  %v4756_v33 = vld [vmem:[%s7824_s0 + $0x108] sm:$0xff]  ;;  %vm1071_vm3 = vcmask 1045504  }
  0x18   :  { %3786 = vmatmul.msk.f32.gmra.mxu3 %vm389_vm2, %v4681_v58  ;;  %8008 = vst [vmem:[#allocation13_spill] sm:$0xff] %v4723_v18  ;;  %v4731_v25 = vsel %vm226_vm1, %v233_v56, %v235_v9  ;;  %v4746_v30 = vsel %vm226_vm1, %v278_v60, %v280_v19  ;;  %v4761_v34 = vld [vmem:[%s7824_s0 + $0x110] sm:$0xff]  ;;  %v237_v38 = vrot.slane %v4738_v26, 1  ;;  %v238_v39 = vrot.slane %v4743_v28, 1  ;;  %v80_v40 = vld [vmem:[%s7824_s0 + $0x1d8] sm:$0x3] }
  0x19   :  { %v4751_v32 = vsel %vm226_vm1, %v312_v22, %v313_v24  ;;  %v4771_v42 = vsel %vm226_vm1, %v353_v5, %v355_v29  ;;  %v282_v43 = vrot.slane %v4756_v33, 1  ;;  %v283_v44 = vrot.slane %v4761_v34, 1  ;;  %v105_v45 = vld [vmem:[%s7824_s0 + $0x2a0] sm:$0xff]  ;;  %v106_v46 = vld [vmem:[%s7824_s0 + $0x2a8] sm:$0xff]  ;;  %v4804_v60 = vld [vmem:[%s7824_s0 + $0x118] sm:$0x3] }
  0x1a   :  { %3739 = vmatmul.msk.f32.gmra.mxu0 %vm389_vm2, %v4693_v0  ;;  %8009 = vst [vmem:[#allocation14_spill] sm:$0xff] %v4751_v32  ;;  %v315_v47 = vrot.slane %v80_v40, 1  ;;  %v4784_v50 = vsel %vm226_vm1, %v237_v38, %v238_v39  ;;  %v4791_v54 = vld [vmem:[%s7824_s0 + $0x40] sm:$0x3]  ;;  %v357_v55 = vrot.slane %v105_v45, 1  ;;  %v358_v56 = vrot.slane %v106_v46, 1 }
  0x1b   :  { %8010 = vst [vmem:[#allocation15_spill] sm:$0xff] %v4771_v42  ;;  %v4794_v57 = vsel %vm226_vm1, %v282_v43, %v283_v44  ;;  %v240_v61 = vrot.slane %v4791_v54, 1  ;;  %v81_v62 = vld [vmem:[%s7824_s0 + $0x1e0] sm:$0xff]  ;;  %v82_v63 = vld [vmem:[%s7824_s0 + $0x1e8] sm:$0xff]  ;;  %v285_v5 = vrot.slane %v4804_v60, 1  ;;  %v4837_v21 = vld [vmem:[%s7824_s0 + $0x50] sm:$0xff] }
  0x1c   :  { %8011 = vst [vmem:[#allocation16_spill] sm:$0xff] %v4784_v50  ;;  %v4799_v59 = vsel %vm226_vm1, %v313_v24, %v315_v47  ;;  %v4816_v4 = vsel %vm226_vm1, %v357_v55, %v358_v56  ;;  %v317_v9 = vrot.slane %v81_v62, 1  ;;  %v318_v13 = vrot.slane %v82_v63, 1  ;;  %v4832_v19 = vld [vmem:[%s7824_s0 + $0x48] sm:$0xff]  ;;  %v4850_v38 = vld [vmem:[%s7824_s0 + $0x120] sm:$0xff]  ;;  %v108_v55 = vld [vmem:[%s7824_s0 + $0x2b8] sm:$0xff] }
  0x1d   :  { %3757 = vmatmul.msk.f32.gmra.mxu1 %vm389_vm2, %v4703_v6  ;;  %8012 = vst [vmem:[#allocation17_spill] sm:$0xff] %v4794_v57  ;;  %v4825_v15 = vsel %vm226_vm1, %v238_v39, %v240_v61  ;;  %v4840_v24 = vsel %vm226_vm1, %v283_v44, %v285_v5  ;;  %v4855_v39 = vld [vmem:[%s7824_s0 + $0x128] sm:$0xff]  ;;  %v242_v40 = vrot.slane %v4832_v19, 1  ;;  %v243_v43 = vrot.slane %v4837_v21, 1  ;;  %v83_v44 = vld [vmem:[%s7824_s0 + $0x1f0] sm:$0x3] }
  0x1e   :  { %3770 = vmatmul.msk.f32.gmra.mxu2 %vm389_vm2, %v311_v7  ;;  %8013 = vst [vmem:[#allocation18_spill] sm:$0xff] %v4799_v59  ;;  %v107_v7 = vld [vmem:[%s7824_s0 + $0x2b0] sm:$0x3]  ;;  %v4845_v29 = vsel %vm226_vm1, %v317_v9, %v318_v13  ;;  %v287_v46 = vrot.slane %v4850_v38, 1  ;;  %v288_v47 = vrot.slane %v4855_v39, 1  ;;  %v109_v61 = vld [vmem:[%s7824_s0 + $0x2c0] sm:$0xff] }
  0x1f   :  { %8014 = vst [vmem:[#allocation19_spill] sm:$0xff] %v4804_v60  ;;  %v360_v22 = vrot.slane %v107_v7, 1  ;;  %v320_v62 = vrot.slane %v83_v44, 1  ;;  %v4878_v63 = vsel %vm226_vm1, %v242_v40, %v243_v43  ;;  %v362_v5 = vrot.slane %v108_v55, 1  ;;  %v4898_v40 = vld [vmem:[%s7824_s0 + $0x130] sm:$0x3] }
  0x20   :  { %3787 = vmatmul.msk.f32.gmra.mxu3 %vm389_vm2, %v4723_v18  ;;  %8015 = vst [vmem:[#allocation20_spill] sm:$0xff] %v4816_v4  ;;  %v363_v7 = vrot.slane %v109_v61, 1  ;;  %v4888_v9 = vsel %vm226_vm1, %v287_v46, %v288_v47  ;;  %v84_v55 = vld [vmem:[%s7824_s0 + $0x1f8] sm:$0xff]  ;;  %v85_v46 = vld [vmem:[%s7824_s0 + $0x200] sm:$0xff]  ;;  %v290_v61 = vrot.slane %v4898_v40, 1  ;;  %v111_v58 = vld [vmem:[%s7824_s0 + $0x2d0] sm:$0xff] }
  0x21   :  { %8016 = vst [vmem:[#allocation21_spill] sm:$0xff] %v4825_v15  ;;  %v4865_v45 = vsel %vm226_vm1, %v358_v56, %v360_v22  ;;  %v4885_v56 = vld [vmem:[%s7824_s0 + $0x58] sm:$0x3]  ;;  %v4893_v22 = vsel %vm226_vm1, %v318_v13, %v320_v62  ;;  %v110_v62 = vld [vmem:[%s7824_s0 + $0x2c8] sm:$0x3]  ;;  %v322_v3 = vrot.slane %v84_v55, 1 }
  0x22   :  { %3740 = vmatmul.msk.f32.gmra.mxu0 %vm389_vm2, %v4731_v25  ;;  %8017 = vst [vmem:[#allocation22_spill] sm:$0xff] %v4840_v24  ;;  %v245_v44 = vrot.slane %v4885_v56, 1  ;;  %v4910_v13 = vsel %vm226_vm1, %v362_v5, %v363_v7  ;;  %v323_v14 = vrot.slane %v85_v46, 1  ;;  %v4926_v5 = vld [vmem:[%s7824_s0 + $0x60] sm:$0xff]  ;;  %v4934_v55 = vsel %vm226_vm1, %v288_v47, %v290_v61  ;;  %v86_v61 = vld [vmem:[%s7824_s0 + $0x208] sm:$0x3] }
  0x23   :  { %8018 = vst [vmem:[#allocation23_spill] sm:$0xff] %v4845_v29  ;;  %v4949_v46 = vld [vmem:[%s7824_s0 + $0x140] sm:$0xff]  ;;  %v112_v41 = vld [vmem:[%s7824_s0 + $0x2d8] sm:$0xff]  ;;  %v325_v27 = vrot.slane %v86_v61, 1  ;;  %vm3538_vm4 = vcmask 523264   ;;  %vm3693_vm5 = vcmask 1041409  }
  0x24   :  { %8019 = vst [vmem:[#allocation24_spill] sm:$0xff] %v4855_v39  ;;  %v293_v18 = vrot.slane %v4949_v46, 1  ;;  %s4479_s18 = smov [#allocation2]   ;;  %s3726_s22 = sshll.u32 %s7829_s5, 4  ;;  %vm3717_vm6 = vcmask 58368   ;;  %s3727_s22 = int_to_ptr.hbm [resolvable:$true] %s3726_s22 }
  0x25   :  { %3758 = vmatmul.msk.f32.gmra.mxu1 %vm389_vm2, %v4746_v30  ;;  %8020 = vst [vmem:[#allocation25_spill] sm:$0xff] %v4865_v45  ;;  %v4987_v61 = vsel %vm226_vm1, %v323_v14, %v325_v27  ;;  %s3724_s19 = sshll.u32 %s4479_s18, 4  ;;  %s3725_s19 = int_to_ptr.vmem [resolvable:$true] %s3724_s19 }
  0x26   :  { %3771 = vmatmul.msk.f32.gmra.mxu2 %vm389_vm2, %v4751_v32  ;;  %8021 = vst [vmem:[#allocation26_spill] sm:$0xff] %v4878_v63 }
  0x27   :  { %8022 = vst [vmem:[#allocation27_spill] sm:$0xff] %v4888_v9 }
  0x28   :  { %3788 = vmatmul.msk.f32.gmra.mxu3 %vm389_vm2, %v4771_v42  ;;  %8023 = vst [vmem:[#allocation28_spill] sm:$0xff] %v4893_v22  ;;  %v365_v42 = vrot.slane %v110_v62, 1  ;;  %v247_v62 = vrot.slane %v4926_v5, 1 }
  0x29   :  { %8024 = vst [vmem:[#allocation29_spill] sm:$0xff] %v4898_v40  ;;  %v115_v40 = vld [vmem:[%s7824_s0 + $0x2f0] sm:$0xff] }
  0x2a   :  { %3741 = vmatmul.msk.f32.gmra.mxu0 %vm389_vm2, %v4784_v50  ;;  %8025 = vst [vmem:[#allocation30_spill] sm:$0xff] %v4910_v13 }
  0x2b   :  { %8027 = vst [vmem:[#allocation32_spill] sm:$0xff] %v4934_v55 }
  0x2c   :  { %8030 = vst [vmem:[#allocation35_spill] sm:$0xff] %v4949_v46 }
  0x2d   :  { %3759 = vmatmul.msk.f32.gmra.mxu1 %vm389_vm2, %v4794_v57  ;;  %8034 = vst [vmem:[#allocation39_spill] sm:$0xff] %v4987_v61 }
  0x2e   :  { %3772 = vmatmul.msk.f32.gmra.mxu2 %vm389_vm2, %v4799_v59 }
  0x30   :  { %3789 = vmatmul.msk.f32.gmra.mxu3 %vm389_vm2, %v4816_v4  ;;  %v4931_v4 = vld [vmem:[%s7824_s0 + $0x68] sm:$0xff] }
  0x31   :  { %v248_v47 = vrot.slane %v4931_v4, 1 }
  0x32   :  { %3742 = vmatmul.msk.f32.gmra.mxu0 %vm389_vm2, %v4825_v15 }
  0x35   :  { %3760 = vmatmul.msk.f32.gmra.mxu1 %vm389_vm2, %v4840_v24 }
  0x36   :  { %3773 = vmatmul.msk.f32.gmra.mxu2 %vm389_vm2, %v4845_v29 }
  0x38   :  { %3790 = vmatmul.msk.f32.gmra.mxu3 %vm389_vm2, %v4865_v45  ;;  %v4919_v45 = vsel %vm226_vm1, %v243_v43, %v245_v44  ;;  %v4939_v43 = vsel %vm226_vm1, %v322_v3, %v323_v14  ;;  %v4944_v44 = vld [vmem:[%s7824_s0 + $0x138] sm:$0xff]  ;;  %v4959_v3 = vsel %vm226_vm1, %v363_v7, %v365_v42  ;;  %v4979_v42 = vld [vmem:[%s7824_s0 + $0x70] sm:$0x3]  ;;  %v367_v7 = vrot.slane %v111_v58, 1 }
  0x39   :  { %8026 = vst [vmem:[#allocation31_spill] sm:$0xff] %v4919_v45  ;;  %v88_v58 = vld [vmem:[%s7824_s0 + $0x218] sm:$0xff] }
  0x3a   :  { %3743 = vmatmul.msk.f32.gmra.mxu0 %vm389_vm2, %v4878_v63  ;;  %8028 = vst [vmem:[#allocation33_spill] sm:$0xff] %v4939_v43  ;;  %v328_v32 = vrot.slane %v88_v58, 1  ;;  %v5043_v58 = vld [vmem:[%s7824_s0 + $0x158] sm:$0xff] }
  0x3b   :  { %8029 = vst [vmem:[#allocation34_spill] sm:$0xff] %v4944_v44 }
  0x3c   :  { %8031 = vst [vmem:[#allocation36_spill] sm:$0xff] %v4959_v3 }
  0x3d   :  { %3761 = vmatmul.msk.f32.gmra.mxu1 %vm389_vm2, %v4888_v9  ;;  %8041 = vst [vmem:[#allocation46_spill] sm:$0xff] %v5043_v58 }
  0x3e   :  { %3774 = vmatmul.msk.f32.gmra.mxu2 %vm389_vm2, %v4893_v22  ;;  %v4972_v22 = vsel %vm226_vm1, %v247_v62, %v248_v47  ;;  %v4992_v62 = vld [vmem:[%s7824_s0 + $0x148] sm:$0x3] }
  0x3f   :  { %8032 = vst [vmem:[#allocation37_spill] sm:$0xff] %v4972_v22  ;;  %v295_v27 = vrot.slane %v4992_v62, 1 }
  0x40   :  { %3791 = vmatmul.msk.f32.gmra.mxu3 %vm389_vm2, %v4910_v13  ;;  %v292_v13 = vrot.slane %v4944_v44, 1  ;;  %8035 = vst [vmem:[#allocation40_spill] sm:$0xff] %v4992_v62  ;;  %v298_v62 = vrot.slane %v5043_v58, 1 }
  0x42   :  { %3744 = vmatmul.msk.f32.gmra.mxu0 %vm389_vm2, %v4919_v45  ;;  %v4982_v29 = vsel %vm226_vm1, %v292_v13, %v293_v18  ;;  %v113_v13 = vld [vmem:[%s7824_s0 + $0x2e0] sm:$0x3] }
  0x43   :  { %8033 = vst [vmem:[#allocation38_spill] sm:$0xff] %v4982_v29  ;;  %v370_v17 = vrot.slane %v113_v13, 1 }
  0x45   :  { %3762 = vmatmul.msk.f32.gmra.mxu1 %vm389_vm2, %v4934_v55 }
  0x46   :  { %3775 = vmatmul.msk.f32.gmra.mxu2 %vm389_vm2, %v4939_v43  ;;  %v368_v43 = vrot.slane %v112_v41, 1  ;;  %v87_v41 = vld [vmem:[%s7824_s0 + $0x210] sm:$0xff] }
  0x47   :  { %v327_v59 = vrot.slane %v87_v41, 1  ;;  %v5028_v41 = vsel %vm226_vm1, %v293_v18, %v295_v27  ;;  %v89_v27 = vld [vmem:[%s7824_s0 + $0x220] sm:$0x3] }
  0x48   :  { %3792 = vmatmul.msk.f32.gmra.mxu3 %vm389_vm2, %v4959_v3  ;;  %v250_v3 = vrot.slane %v4979_v42, 1  ;;  %v5004_v14 = vsel %vm226_vm1, %v367_v7, %v368_v43  ;;  %v5020_v7 = vld [vmem:[%s7824_s0 + $0x78] sm:$0xff]  ;;  %8038 = vst [vmem:[#allocation43_spill] sm:$0xff] %v5028_v41  ;;  %v330_v55 = vrot.slane %v89_v27, 1 }
  0x49   :  { %8036 = vst [vmem:[#allocation41_spill] sm:$0xff] %v5004_v14  ;;  %v252_v13 = vrot.slane %v5020_v7, 1 }
  0x4a   :  { %3745 = vmatmul.msk.f32.gmra.mxu0 %vm389_vm2, %v4972_v22  ;;  %v5013_v36 = vsel %vm226_vm1, %v248_v47, %v250_v3  ;;  %v5033_v47 = vsel %vm226_vm1, %v327_v59, %v328_v32  ;;  %v5038_v3 = vld [vmem:[%s7824_s0 + $0x150] sm:$0xff]  ;;  %v5053_v59 = vsel %vm226_vm1, %v368_v43, %v370_v17  ;;  %v5073_v17 = vld [vmem:[%s7824_s0 + $0x88] sm:$0x3]  ;;  %v5081_v27 = vsel %vm226_vm1, %v328_v32, %v330_v55 }
  0x4b   :  { %8037 = vst [vmem:[#allocation42_spill] sm:$0xff] %v5013_v36 }
  0x4c   :  { %8039 = vst [vmem:[#allocation44_spill] sm:$0xff] %v5033_v47 }
  0x4d   :  { %3763 = vmatmul.msk.f32.gmra.mxu1 %vm389_vm2, %v4982_v29  ;;  %8040 = vst [vmem:[#allocation45_spill] sm:$0xff] %v5038_v3  ;;  %v114_v29 = vld [vmem:[%s7824_s0 + $0x2e8] sm:$0xff] }
  0x4e   :  { %3776 = vmatmul.msk.f32.gmra.mxu2 %vm389_vm2, %v4987_v61  ;;  %v5025_v61 = vld [vmem:[%s7824_s0 + $0x80] sm:$0xff]  ;;  %8042 = vst [vmem:[#allocation47_spill] sm:$0xff] %v5053_v59  ;;  %v372_v43 = vrot.slane %v114_v29, 1  ;;  %v90_v29 = vld [vmem:[%s7824_s0 + $0x228] sm:$0xff] }
  0x4f   :  { %v253_v18 = vrot.slane %v5025_v61, 1  ;;  %8045 = vst [vmem:[#allocation50_spill] sm:$0xff] %v5081_v27 }
  0x50   :  { %3793 = vmatmul.msk.f32.gmra.mxu3 %vm389_vm2, %v5004_v14  ;;  %v297_v14 = vrot.slane %v5038_v3, 1  ;;  %v332_v3 = vrot.slane %v90_v29, 1 }
  0x52   :  { %3746 = vmatmul.msk.f32.gmra.mxu0 %vm389_vm2, %v5013_v36  ;;  %v5076_v58 = vsel %vm226_vm1, %v297_v14, %v298_v62  ;;  %v116_v14 = vld [vmem:[%s7824_s0 + $0x2f8] sm:$0x3] }
  0x53   :  { %8044 = vst [vmem:[#allocation49_spill] sm:$0xff] %v5076_v58 }
  0x55   :  { %3764 = vmatmul.msk.f32.gmra.mxu1 %vm389_vm2, %v5028_v41  ;;  %v5066_v41 = vsel %vm226_vm1, %v252_v13, %v253_v18  ;;  %v5086_v13 = vld [vmem:[%s7824_s0 + $0x160] sm:$0x3] }
  0x56   :  { %3777 = vmatmul.msk.f32.gmra.mxu2 %vm389_vm2, %v5033_v47  ;;  %8043 = vst [vmem:[#allocation48_spill] sm:$0xff] %v5066_v41  ;;  %v373_v47 = vrot.slane %v115_v40, 1  ;;  %v91_v40 = vld [vmem:[%s7824_s0 + $0x230] sm:$0xff]  ;;  %v300_v55 = vrot.slane %v5086_v13, 1 }
  0x57   :  { %8046 = vst [vmem:[#allocation51_spill] sm:$0xff] %v5086_v13  ;;  %v333_v46 = vrot.slane %v91_v40, 1  ;;  %v375_v13 = vrot.slane %v116_v14, 1 }
  0x58   :  { %3794 = vmatmul.msk.f32.gmra.mxu3 %vm389_vm2, %v5053_v59  ;;  %v255_v59 = vrot.slane %v5073_v17, 1  ;;  %v5098_v32 = vsel %vm226_vm1, %v372_v43, %v373_v47  ;;  %v5114_v43 = vld [vmem:[%s7824_s0 + $0x90] sm:$0xff]  ;;  %v5122_v29 = vsel %vm226_vm1, %v298_v62, %v300_v55  ;;  %v118_v55 = vld [vmem:[%s7824_s0 + $0x308] sm:$0xff] }
  0x59   :  { %8047 = vst [vmem:[#allocation52_spill] sm:$0xff] %v5098_v32  ;;  %v5137_v62 = vsel %vm226_vm1, %v373_v47, %v375_v13  ;;  %v5155_v47 = vld [vmem:[%s7824_s0 + $0xa0] sm:$0x3] }
  0x5a   :  { %3747 = vmatmul.msk.f32.gmra.mxu0 %vm389_vm2, %v5066_v41  ;;  %v5107_v9 = vsel %vm226_vm1, %v253_v18, %v255_v59  ;;  %8049 = vst [vmem:[#allocation54_spill] sm:$0xff] %v5122_v29  ;;  %v5127_v18 = vsel %vm226_vm1, %v332_v3, %v333_v46  ;;  %v257_v59 = vrot.slane %v5114_v43, 1  ;;  %v117_v3 = vld [vmem:[%s7824_s0 + $0x300] sm:$0xff] }
  0x5b   :  { %8048 = vst [vmem:[#allocation53_spill] sm:$0xff] %v5107_v9  ;;  %v377_v13 = vrot.slane %v117_v3, 1 }
  0x5c   :  { %8050 = vst [vmem:[#allocation55_spill] sm:$0xff] %v5127_v18 }
  0x5d   :  { %3765 = vmatmul.msk.f32.gmra.mxu1 %vm389_vm2, %v5076_v58  ;;  %8051 = vst [vmem:[#allocation56_spill] sm:$0xff] %v5137_v62 }
  0x5e   :  { %3778 = vmatmul.msk.f32.gmra.mxu2 %vm389_vm2, %v5081_v27  ;;  %v5119_v27 = vld [vmem:[%s7824_s0 + $0x98] sm:$0xff] }
  0x5f   :  { %v258_v40 = vrot.slane %v5119_v27, 1 }
  0x60   :  { %3795 = vmatmul.msk.f32.gmra.mxu3 %vm389_vm2, %v5098_v32  ;;  %v92_v32 = vld [vmem:[%s7824_s0 + $0x238] sm:$0x3] }
  0x61   :  { %v335_v14 = vrot.slane %v92_v32, 1  ;;  %v5148_v58 = vsel %vm226_vm1, %v257_v59, %v258_v40  ;;  %v260_v32 = vrot.slane %v5155_v47, 1  ;;  %v93_v59 = vld [vmem:[%s7824_s0 + $0x240] sm:$0xff] }
  0x62   :  { %3748 = vmatmul.msk.f32.gmra.mxu0 %vm389_vm2, %v5107_v9  ;;  %8052 = vst [vmem:[#allocation57_spill] sm:$0xff] %v5148_v58 }
  0x63   :  { %v5183_v44 = vsel %vm226_vm1, %v258_v40, %v260_v32  ;;  %v4196_v40 = vld [vmem:[%s7825_s1 + $0x1c] sm:$0xf]  ;;  %v4064_v32 = vld [vmem:[%s7825_s1 + $0x14] sm:$0xf] }
  0x64   :  { %8055 = vst [vmem:[#allocation60_spill] sm:$0xff] %v5183_v44  ;;  %4197 = vmatpush.msk.msra.mxu3 %vm518_vm0, %v4196_v40  ;;  %4065 = vmatpush.msk.msra.mxu1 %vm518_vm0, %v4064_v32  ;;  %v121_v32 = vld [vmem:[%s7824_s0 + $0x320] sm:$0xff] }
  0x65   :  { %3766 = vmatmul.msk.f32.gmra.mxu1 %vm389_vm2, %v5122_v29  ;;  %v5160_v29 = vsel %vm226_vm1, %v333_v46, %v335_v14  ;;  %v119_v46 = vld [vmem:[%s7824_s0 + $0x310] sm:$0x3]  ;;  %v337_v14 = vrot.slane %v93_v59, 1  ;;  %v383_v57 = vrot.slane %v121_v32, 1 }
  0x66   :  { %3779 = vmatmul.msk.f32.gmra.mxu2 %vm389_vm2, %v5127_v18  ;;  %v378_v18 = vrot.slane %v118_v55, 1  ;;  %8053 = vst [vmem:[#allocation58_spill] sm:$0xff] %v5160_v29  ;;  %v4130_v55 = vld [vmem:[%s7825_s1 + $0x18] sm:$0xf] }
  0x67   :  { %4131 = vmatpush.msk.msra.mxu2 %vm518_vm0, %v4130_v55 }
  0x68   :  { %3796 = vmatmul.msk.f32.gmra.mxu3 %vm389_vm2, %v5137_v62  ;;  %v94_v62 = vld [vmem:[%s7824_s0 + $0x248] sm:$0xff]  ;;  %v5172_v3 = vsel %vm226_vm1, %v377_v13, %v378_v18 }
  0x69   :  { %8054 = vst [vmem:[#allocation59_spill] sm:$0xff] %v5172_v3  ;;  %v338_v60 = vrot.slane %v94_v62, 1  ;;  %v5191_v13 = vld [vmem:[%s7824_s0 + $0xa8] sm:$0xff]  ;;  %v380_v62 = vrot.slane %v119_v46, 1  ;;  %v95_v46 = vld [vmem:[%s7824_s0 + $0x250] sm:$0x3] }
  0x6a   :  { %3749 = vmatmul.msk.f32.gmra.mxu0 %vm389_vm2, %v5148_v58  ;;  %v262_v55 = vrot.slane %v5191_v13, 1  ;;  %v340_v24 = vrot.slane %v95_v46, 1 }
  0x6b   :  { %v5209_v59 = vsel %vm226_vm1, %v337_v14, %v338_v60  ;;  %v5219_v40 = vsel %vm226_vm1, %v378_v18, %v380_v62  ;;  %v120_v14 = vld [vmem:[%s7824_s0 + $0x318] sm:$0xff]  ;;  %v4262_v62 = vld [vmem:[%s7825_s1 + $0x20] sm:$0xf] }
  0x6c   :  { %8056 = vst [vmem:[#allocation61_spill] sm:$0xff] %v5209_v59  ;;  %v5237_v18 = vld [vmem:[%s7824_s0 + $0xb8] sm:$0x3]  ;;  %4263 = vmatpush.msk.msra.mxu0 %vm518_vm0, %v4262_v62  ;;  %v5270_v62 = vld [vmem:[%s7824_s0 + $0xc0] sm:$0xff] }
  0x6d   :  { %3802 = vmatmul.msk.f32.vlgmr.msrb.gmra.mxu1 %vm389_vm2, %v4575_v20  ;;  %8057 = vst [vmem:[#allocation62_spill] sm:$0xff] %v5219_v40  ;;  %v265_v46 = vrot.slane %v5237_v18, 1 }
  0x6e   :  { %3780 = vmatmul.msk.f32.gmra.mxu2 %vm389_vm2, %v5160_v29  ;;  %v5196_v29 = vld [vmem:[%s7824_s0 + $0xb0] sm:$0xff] }
  0x70   :  { %3797 = vmatmul.msk.f32.gmra.mxu3 %vm389_vm2, %v5172_v3  ;;  %v263_v3 = vrot.slane %v5196_v29, 1 }
  0x72   :  { %3750 = vmatmul.msk.f32.gmra.mxu0 %vm389_vm2, %v5183_v44  ;;  %v5230_v39 = vsel %vm226_vm1, %v262_v55, %v263_v3  ;;  %v5246_v55 = vsel %vm226_vm1, %v338_v60, %v340_v24  ;;  %v122_v60 = vld [vmem:[%s7824_s0 + $0x328] sm:$0x3]  ;;  %v5263_v32 = vsel %vm226_vm1, %v263_v3, %v265_v46  ;;  %v267_v3 = vrot.slane %v5270_v62, 1 }
  0x73   :  { %8058 = vst [vmem:[#allocation63_spill] sm:$0xff] %v5230_v39 }
  0x74   :  { %8059 = vst [vmem:[#allocation64_spill] sm:$0xff] %v5246_v55 }
  0x75   :  { %3803 = vmatmul.msk.f32.gmra.mxu1 %vm389_vm2, %v4584_v23  ;;  %8061 = vst [vmem:[#allocation66_spill] sm:$0xff] %v5263_v32 }
  0x76   :  { %3781 = vmatmul.msk.f32.gmra.mxu2 %vm389_vm2, %v5209_v59  ;;  %v382_v59 = vrot.slane %v120_v14, 1 }
  0x78   :  { %3798 = vmatmul.msk.f32.gmra.mxu3 %vm389_vm2, %v5219_v40  ;;  %v96_v40 = vld [vmem:[%s7824_s0 + $0x258] sm:$0xff]  ;;  %v5255_v14 = vsel %vm226_vm1, %v382_v59, %v383_v57  ;;  %v385_v59 = vrot.slane %v122_v60, 1 }
  0x79   :  { %8060 = vst [vmem:[#allocation65_spill] sm:$0xff] %v5255_v14  ;;  %v342_v24 = vrot.slane %v96_v40, 1 }
  0x7a   :  { %3751 = vmatmul.msk.f32.gmra.mxu0 %vm389_vm2, %v5230_v39  ;;  %v5285_v46 = vsel %vm226_vm1, %v383_v57, %v385_v59 }
  0x7b   :  { %8064 = vst [vmem:[#allocation68_spill] sm:$0xff] %v5285_v46 }
  0x7d   :  { %3804 = vmatmul.msk.f32.gmra.mxu1 %vm389_vm2, %v4650_v48 }
  0x7e   :  { %3782 = vmatmul.msk.f32.gmra.mxu2 %vm389_vm2, %v5246_v55  ;;  %v8062_v55 = vrot.slane %v4537_v10, 1  ;;  %v1073_v10 = vrot.slane %v4584_v23, 2 }
  0x80   :  { %3799 = vmatmul.msk.f32.gmra.mxu3 %vm389_vm2, %v5255_v14  ;;  %v5279_v40 = vsel %vm226_vm1, %v342_v24, %v8062_v55  ;;  %v1072_v14 = vrot.slane %v4575_v20, 2  ;;  %v8065_v55 = vrot.slane %v4516_v1, 1 }
  0x81   :  { %8063 = vst [vmem:[#allocation67_spill] sm:$0xff] %v5279_v40 }
  0x82   :  { %v5272_v8 = vpop.f32.mrf.mxu1  ;;  %3752 = vmatmul.msk.f32.gmra.mxu0 %vm389_vm2, %v5263_v32  ;;  %v5296_v24 = vsel %vm226_vm1, %v267_v3, %v8065_v55  ;;  %v1074_v20 = vsel %vm1071_vm3, %v1072_v14, %v1073_v10  ;;  %v1075_v3 = vrot.slane %v4608_v31, 2 }
  0x83   :  { %8066 = vst [vmem:[#allocation69_spill] sm:$0xff] %v5296_v24 }
  0x85   :  { %3805 = vmatmul.msk.f32.gmra.mxu1 %vm389_vm2, %v4655_v49 }
  0x86   :  { %3783 = vmatmul.msk.f32.gmra.mxu2 %vm389_vm2, %v5279_v40 }
  0x87   :  { %v5289_v60 = vpop.f32.mrf.mxu0 }
  0x88   :  { %3800 = vmatmul.msk.f32.gmra.mxu3 %vm389_vm2, %v5285_v46 }
  0x89   :  { %v5300_v57 = vpop.f32.mrf.mxu2 }
  0x8a   :  { %8067 = vst [vmem:[#allocation70_spill] sm:$0xff] %v5300_v57  ;;  %v5302_v59 = vpop.f32.mrf.mxu1  ;;  %3753 = vmatmul.msk.f32.gmra.mxu0 %vm389_vm2, %v5296_v24 }
  0x8b   :  { %v5306_v40 = vpop.f32.mrf.mxu3 }
  0x8c   :  { %8068 = vst [vmem:[#allocation71_spill] sm:$0xff] %v5306_v40  ;;  %v1076_v40 = vsel %vm1071_vm3, %v1073_v10, %v1075_v3 }
  0x8d   :  { %3806 = vmatmul.msk.f32.gmra.mxu1 %vm389_vm2, %v4738_v26 }
  0x8e   :  { %3868 = vmatmul.msk.f32.vlgmr.msrb.gmra.mxu2 %vm389_vm2, %v1074_v20  ;;  %v1077_v20 = vrot.slane %v4650_v48, 2 }
  0x8f   :  { %v5312_v23 = vpop.f32.mrf.mxu0 }
  0x90   :  { %3934 = vmatmul.msk.f32.vlgmr.msrb.gmra.mxu3 %vm389_vm2, %v4650_v48 }
  0x91   :  { %v5317_v55 = vpop.f32.mrf.mxu2 }
  0x92   :  { %8069 = vst [vmem:[#allocation72_spill] sm:$0xff] %v5317_v55  ;;  %v5319_v46 = vpop.f32.mrf.mxu1  ;;  %4000 = vmatmul.msk.f32.vlgmr.msrb.gmra.mxu0 %vm389_vm2, %v4693_v0  ;;  %v1078_v55 = vrot.slane %v4655_v49, 2 }
  0x93   :  { %v5323_v14 = vpop.f32.mrf.mxu3 }
  0x94   :  { %8070 = vst [vmem:[#allocation73_spill] sm:$0xff] %v5323_v14  ;;  %v1082_v14 = vrot.slane %v4738_v26, 2 }
  0x95   :  { %3807 = vmatmul.msk.f32.gmra.mxu1 %vm389_vm2, %v4743_v28 }
  0x96   :  { %3869 = vmatmul.msk.f32.gmra.mxu2 %vm389_vm2, %v1076_v40  ;;  %v5344_v40 = vsel %vm1071_vm3, %v1077_v20, %v1078_v55 }
  0x97   :  { %v5329_v31 = vpop.f32.mrf.mxu0  ;;  %8072 = vst [vmem:[#allocation75_spill] sm:$0xff] %v5344_v40 }
  0x98   :  { %3935 = vmatmul.msk.f32.gmra.mxu3 %vm389_vm2, %v4655_v49  ;;  %v1080_v49 = vrot.slane %v4700_v2, 2 }
  0x99   :  { %v5335_v57 = vpop.f32.mrf.mxu2 }
  0x9a   :  { %v5337_v0 = vpop.f32.mrf.mxu1  ;;  %4001 = vmatmul.msk.f32.gmra.mxu0 %vm389_vm2, %v4731_v25 }
  0x9b   :  { %v5341_v10 = vpop.f32.mrf.mxu3 }
  0x9c   :  { %8071 = vst [vmem:[#allocation74_spill] sm:$0xff] %v5341_v10  ;;  %v5364_v10 = vsel %vm1071_vm3, %v1078_v55, %v1080_v49 }
  0x9d   :  { %3808 = vmatmul.msk.f32.gmra.mxu1 %vm389_vm2, %v4832_v19  ;;  %8074 = vst [vmem:[#allocation77_spill] sm:$0xff] %v5364_v10 }
  0x9e   :  { %3870 = vmatmul.msk.f32.gmra.mxu2 %vm389_vm2, %v5344_v40  ;;  %v1083_v40 = vrot.slane %v4743_v28, 2 }
  0x9f   :  { %v5350_v48 = vpop.f32.mrf.mxu0 }
  0xa0   :  { %3936 = vmatmul.msk.f32.gmra.mxu3 %vm389_vm2, %v4738_v26  ;;  %v5385_v49 = vsel %vm1071_vm3, %v1082_v14, %v1083_v40 }
  0xa1   :  { %v5355_v3 = vpop.f32.mrf.mxu2  ;;  %8076 = vst [vmem:[#allocation79_spill] sm:$0xff] %v5385_v49 }
  0xa2   :  { %v5357_v25 = vpop.f32.mrf.mxu1  ;;  %4002 = vmatmul.msk.f32.gmra.mxu0 %vm389_vm2, %v4784_v50 }
  0xa3   :  { %v5361_v20 = vpop.f32.mrf.mxu3 }
  0xa4   :  { %8073 = vst [vmem:[#allocation76_spill] sm:$0xff] %v5361_v20 }
  0xa5   :  { %3809 = vmatmul.msk.f32.gmra.mxu1 %vm389_vm2, %v4837_v21 }
  0xa6   :  { %3871 = vmatmul.msk.f32.gmra.mxu2 %vm389_vm2, %v5364_v10 }
  0xa7   :  { %v5370_v2 = vpop.f32.mrf.mxu0 }
  0xa8   :  { %3937 = vmatmul.msk.f32.gmra.mxu3 %vm389_vm2, %v4743_v28  ;;  %v1085_v28 = vrot.slane %v4791_v54, 2 }
  0xa9   :  { %v5376_v50 = vpop.f32.mrf.mxu2 }
  0xaa   :  { %v5378_v20 = vpop.f32.mrf.mxu1  ;;  %4003 = vmatmul.msk.f32.gmra.mxu0 %vm389_vm2, %v4825_v15 }
  0xab   :  { %v5382_v55 = vpop.f32.mrf.mxu3 }
  0xac   :  { %8075 = vst [vmem:[#allocation78_spill] sm:$0xff] %v5382_v55  ;;  %v5405_v55 = vsel %vm1071_vm3, %v1083_v40, %v1085_v28 }
  0xad   :  { %3810 = vmatmul.msk.f32.gmra.mxu1 %vm389_vm2, %v4926_v5  ;;  %8079 = vst [vmem:[#allocation82_spill] sm:$0xff] %v5405_v55 }
  0xae   :  { %3872 = vmatmul.msk.f32.gmra.mxu2 %vm389_vm2, %v5385_v49  ;;  %v1087_v49 = vrot.slane %v4832_v19, 2 }
  0xaf   :  { %v5391_v26 = vpop.f32.mrf.mxu0 }
  0xb0   :  { %3938 = vmatmul.msk.f32.gmra.mxu3 %vm389_vm2, %v4832_v19 }
  0xb1   :  { %v5396_v10 = vpop.f32.mrf.mxu2 }
  0xb2   :  { %8077 = vst [vmem:[#allocation80_spill] sm:$0xff] %v5396_v10  ;;  %v5398_v15 = vpop.f32.mrf.mxu1  ;;  %4004 = vmatmul.msk.f32.gmra.mxu0 %vm389_vm2, %v4878_v63  ;;  %v1088_v10 = vrot.slane %v4837_v21, 2 }
  0xb3   :  { %v5402_v14 = vpop.f32.mrf.mxu3 }
  0xb4   :  { %8078 = vst [vmem:[#allocation81_spill] sm:$0xff] %v5402_v14  ;;  %v5426_v28 = vsel %vm1071_vm3, %v1087_v49, %v1088_v10 }
  0xb5   :  { %3811 = vmatmul.msk.f32.gmra.mxu1 %vm389_vm2, %v4931_v4  ;;  %8081 = vst [vmem:[#allocation84_spill] sm:$0xff] %v5426_v28 }
  0xb6   :  { %3873 = vmatmul.msk.f32.gmra.mxu2 %vm389_vm2, %v5405_v55 }
  0xb7   :  { %v5411_v54 = vpop.f32.mrf.mxu0 }
  0xb8   :  { %3939 = vmatmul.msk.f32.gmra.mxu3 %vm389_vm2, %v4837_v21  ;;  %v1090_v21 = vrot.slane %v4885_v56, 2 }
  0xb9   :  { %v5417_v63 = vpop.f32.mrf.mxu2 }
  0xba   :  { %v5419_v14 = vpop.f32.mrf.mxu1  ;;  %4005 = vmatmul.msk.f32.gmra.mxu0 %vm389_vm2, %v4919_v45 }
  0xbb   :  { %v5423_v40 = vpop.f32.mrf.mxu3 }
  0xbc   :  { %8080 = vst [vmem:[#allocation83_spill] sm:$0xff] %v5423_v40  ;;  %v5446_v40 = vsel %vm1071_vm3, %v1088_v10, %v1090_v21 }
  0xbd   :  { %3812 = vmatmul.msk.f32.gmra.mxu1 %vm389_vm2, %v5020_v7  ;;  %8084 = vst [vmem:[#allocation87_spill] sm:$0xff] %v5446_v40 }
  0xbe   :  { %3874 = vmatmul.msk.f32.gmra.mxu2 %vm389_vm2, %v5426_v28  ;;  %v1092_v28 = vrot.slane %v4926_v5, 2 }
  0xbf   :  { %v5432_v19 = vpop.f32.mrf.mxu0 }
  0xc0   :  { %3940 = vmatmul.msk.f32.gmra.mxu3 %vm389_vm2, %v4926_v5 }
  0xc1   :  { %v5437_v55 = vpop.f32.mrf.mxu2 }
  0xc2   :  { %8082 = vst [vmem:[#allocation85_spill] sm:$0xff] %v5437_v55  ;;  %v5439_v45 = vpop.f32.mrf.mxu1  ;;  %4006 = vmatmul.msk.f32.gmra.mxu0 %vm389_vm2, %v4972_v22  ;;  %v1093_v55 = vrot.slane %v4931_v4, 2 }
  0xc3   :  { %v5443_v49 = vpop.f32.mrf.mxu3 }
  0xc4   :  { %8083 = vst [vmem:[#allocation86_spill] sm:$0xff] %v5443_v49  ;;  %v5467_v21 = vsel %vm1071_vm3, %v1092_v28, %v1093_v55 }
  0xc5   :  { %3813 = vmatmul.msk.f32.gmra.mxu1 %vm389_vm2, %v5025_v61  ;;  %8086 = vst [vmem:[#allocation89_spill] sm:$0xff] %v5467_v21 }
  0xc6   :  { %3875 = vmatmul.msk.f32.gmra.mxu2 %vm389_vm2, %v5446_v40 }
  0xc7   :  { %v5452_v56 = vpop.f32.mrf.mxu0 }
  0xc8   :  { %3941 = vmatmul.msk.f32.gmra.mxu3 %vm389_vm2, %v4931_v4  ;;  %v1095_v4 = vrot.slane %v4979_v42, 2 }
  0xc9   :  { %v5458_v22 = vpop.f32.mrf.mxu2 }
  0xca   :  { %v5460_v49 = vpop.f32.mrf.mxu1  ;;  %4007 = vmatmul.msk.f32.gmra.mxu0 %vm389_vm2, %v5013_v36 }
  0xcb   :  { %v5464_v10 = vpop.f32.mrf.mxu3 }
  0xcc   :  { %8085 = vst [vmem:[#allocation88_spill] sm:$0xff] %v5464_v10  ;;  %v5487_v10 = vsel %vm1071_vm3, %v1093_v55, %v1095_v4 }
  0xcd   :  { %3814 = vmatmul.msk.f32.gmra.mxu1 %vm389_vm2, %v5114_v43  ;;  %8089 = vst [vmem:[#allocation92_spill] sm:$0xff] %v5487_v10 }
  0xce   :  { %3876 = vmatmul.msk.f32.gmra.mxu2 %vm389_vm2, %v5467_v21  ;;  %v1097_v21 = vrot.slane %v5020_v7, 2 }
  0xcf   :  { %v5473_v5 = vpop.f32.mrf.mxu0 }
  0xd0   :  { %3942 = vmatmul.msk.f32.gmra.mxu3 %vm389_vm2, %v5020_v7 }
  0xd1   :  { %v5478_v40 = vpop.f32.mrf.mxu2 }
  0xd2   :  { %8087 = vst [vmem:[#allocation90_spill] sm:$0xff] %v5478_v40  ;;  %v5480_v36 = vpop.f32.mrf.mxu1  ;;  %4008 = vmatmul.msk.f32.gmra.mxu0 %vm389_vm2, %v5066_v41  ;;  %v1098_v40 = vrot.slane %v5025_v61, 2 }
  0xd3   :  { %v5484_v28 = vpop.f32.mrf.mxu3 }
  0xd4   :  { %8088 = vst [vmem:[#allocation91_spill] sm:$0xff] %v5484_v28  ;;  %v5508_v4 = vsel %vm1071_vm3, %v1097_v21, %v1098_v40 }
  0xd5   :  { %3815 = vmatmul.msk.f32.gmra.mxu1 %vm389_vm2, %v5119_v27  ;;  %8091 = vst [vmem:[#allocation94_spill] sm:$0xff] %v5508_v4 }
  0xd6   :  { %3877 = vmatmul.msk.f32.gmra.mxu2 %vm389_vm2, %v5487_v10 }
  0xd7   :  { %v5493_v42 = vpop.f32.mrf.mxu0 }
  0xd8   :  { %3943 = vmatmul.msk.f32.gmra.mxu3 %vm389_vm2, %v5025_v61  ;;  %v1100_v61 = vrot.slane %v5073_v17, 2 }
  0xd9   :  { %v5499_v41 = vpop.f32.mrf.mxu2 }
  0xda   :  { %v5501_v28 = vpop.f32.mrf.mxu1  ;;  %4009 = vmatmul.msk.f32.gmra.mxu0 %vm389_vm2, %v5107_v9 }
  0xdb   :  { %v5505_v55 = vpop.f32.mrf.mxu3 }
  0xdc   :  { %8090 = vst [vmem:[#allocation93_spill] sm:$0xff] %v5505_v55  ;;  %v5528_v55 = vsel %vm1071_vm3, %v1098_v40, %v1100_v61 }
  0xdd   :  { %3816 = vmatmul.msk.f32.gmra.mxu1 %vm389_vm2, %v5191_v13  ;;  %8094 = vst [vmem:[#allocation97_spill] sm:$0xff] %v5528_v55 }
  0xde   :  { %3878 = vmatmul.msk.f32.gmra.mxu2 %vm389_vm2, %v5508_v4  ;;  %v1102_v4 = vrot.slane %v5114_v43, 2 }
  0xdf   :  { %v5514_v7 = vpop.f32.mrf.mxu0 }
  0xe0   :  { %3944 = vmatmul.msk.f32.gmra.mxu3 %vm389_vm2, %v5114_v43 }
  0xe1   :  { %v5519_v10 = vpop.f32.mrf.mxu2 }
  0xe2   :  { %8092 = vst [vmem:[#allocation95_spill] sm:$0xff] %v5519_v10  ;;  %v5521_v9 = vpop.f32.mrf.mxu1  ;;  %4010 = vmatmul.msk.f32.gmra.mxu0 %vm389_vm2, %v5148_v58  ;;  %v1103_v10 = vrot.slane %v5119_v27, 2 }
  0xe3   :  { %v5525_v21 = vpop.f32.mrf.mxu3 }
  0xe4   :  { %8093 = vst [vmem:[#allocation96_spill] sm:$0xff] %v5525_v21  ;;  %v5547_v61 = vsel %vm1071_vm3, %v1102_v4, %v1103_v10 }
  0xe5   :  { %3817 = vmatmul.msk.f32.gmra.mxu1 %vm389_vm2, %v5196_v29  ;;  %8096 = vst [vmem:[#allocation99_spill] sm:$0xff] %v5547_v61 }
  0xe6   :  { %3879 = vmatmul.msk.f32.gmra.mxu2 %vm389_vm2, %v5528_v55 }
  0xe7   :  { %v5534_v17 = vpop.f32.mrf.mxu0 }
  0xe8   :  { %3945 = vmatmul.msk.f32.gmra.mxu3 %vm389_vm2, %v5119_v27  ;;  %v1105_v27 = vrot.slane %v5155_v47, 2 }
  0xe9   :  { %v5540_v58 = vpop.f32.mrf.mxu2 }
  0xea   :  { %v879_v21 = vpop.f32.mrf.mxu1  ;;  %4011 = vmatmul.msk.f32.gmra.mxu0 %vm389_vm2, %v5183_v44 }
  0xeb   :  { %v5544_v40 = vpop.f32.mrf.mxu3 }
  0xec   :  { %8095 = vst [vmem:[#allocation98_spill] sm:$0xff] %v5544_v40  ;;  %v5565_v40 = vsel %vm1071_vm3, %v1103_v10, %v1105_v27 }
  0xed   :  { %3818 = vmatmul.msk.f32.gmra.mxu1 %vm389_vm2, %v5270_v62  ;;  %8099 = vst [vmem:[#allocation102_spill] sm:$0xff] %v5565_v40 }
  0xee   :  { %3880 = vmatmul.msk.f32.gmra.mxu2 %vm389_vm2, %v5547_v61  ;;  %v1107_v61 = vrot.slane %v5191_v13, 2 }
  0xef   :  { %v5553_v43 = vpop.f32.mrf.mxu0 }
  0xf0   :  { %3946 = vmatmul.msk.f32.gmra.mxu3 %vm389_vm2, %v5191_v13 }
  0xf1   :  { %v5558_v55 = vpop.f32.mrf.mxu2 }
  0xf2   :  { %8097 = vst [vmem:[#allocation100_spill] sm:$0xff] %v5558_v55  ;;  %v882_v44 = vpop.f32.mrf.mxu1  ;;  %4012 = vmatmul.msk.f32.gmra.mxu0 %vm389_vm2, %v5230_v39  ;;  %v1108_v55 = vrot.slane %v5196_v29, 2 }
  0xf3   :  { %v5562_v4 = vpop.f32.mrf.mxu3 }
  0xf4   :  { %8098 = vst [vmem:[#allocation101_spill] sm:$0xff] %v5562_v4 }
  0xf5   :  { %3819 = vmatmul.msk.f32.gmra.mxu1 %vm389_vm2, %v4516_v1  ;;  %v5584_v1 = vsel %vm1071_vm3, %v1107_v61, %v1108_v55 }
  0xf6   :  { %3881 = vmatmul.msk.f32.gmra.mxu2 %vm389_vm2, %v5565_v40  ;;  %8102 = vst [vmem:[#allocation105_spill] sm:$0xff] %v5584_v1  ;;  %v880_v40 = vadd.f32 %v879_v21, %v5289_v60 }
  0xf7   :  { %v5571_v47 = vpop.f32.mrf.mxu0 }
  0xf8   :  { %3947 = vmatmul.msk.f32.gmra.mxu3 %vm389_vm2, %v5196_v29  ;;  %v1110_v29 = vrot.slane %v5237_v18, 2 }
  0xf9   :  { %v5577_v39 = vpop.f32.mrf.mxu2 }
  0xfa   :  { %8100 = vst [vmem:[#allocation103_spill] sm:$0xff] %v5577_v39  ;;  %v885_v4 = vpop.f32.mrf.mxu1  ;;  %4013 = vmatmul.msk.f32.gmra.mxu0 %vm389_vm2, %v5263_v32  ;;  %v883_v39 = vadd.f32 %v882_v44, %v5312_v23 }
  0xfb   :  { %v5581_v10 = vpop.f32.mrf.mxu3  ;;  %v886_v23 = vadd.f32 %v885_v4, %v5329_v31  ;;  %v1122_v4 = vrot.slane %v4665_v52, 2 }
  0xfc   :  { %8101 = vst [vmem:[#allocation104_spill] sm:$0xff] %v5581_v10  ;;  %v1112_v10 = vrot.slane %v5270_v62, 2 }
  0xfd   :  { %3820 = vmatmul.msk.f32.gmra.mxu1 %vm389_vm2, %v4542_v11  ;;  %v5604_v11 = vsel %vm1071_vm3, %v1108_v55, %v1110_v29 }
  0xfe   :  { %3882 = vmatmul.msk.f32.gmra.mxu2 %vm389_vm2, %v5584_v1  ;;  %8105 = vst [vmem:[#allocation108_spill] sm:$0xff] %v5604_v11  ;;  %v4335_v1 = vld [vmem:[%s7824_s0 + $0xc8] sm:$0xff] }
  0xff   :  { %v5590_v13 = vpop.f32.mrf.mxu0 }
 0x100   :  { %3948 = vmatmul.msk.f32.gmra.mxu3 %vm389_vm2, %v5270_v62 }
 0x101   :  { %v5595_v27 = vpop.f32.mrf.mxu2 }
 0x102   :  { %8103 = vst [vmem:[#allocation106_spill] sm:$0xff] %v5595_v27  ;;  %v5597_v32 = vpop.f32.mrf.mxu1  ;;  %4014 = vmatmul.msk.f32.gmra.mxu0 %vm389_vm2, %v5296_v24  ;;  %v1113_v24 = vrot.slane %v4335_v1, 2 }
 0x103   :  { %v5601_v61 = vpop.f32.mrf.mxu3 }
 0x104   :  { %8104 = vst [vmem:[#allocation107_spill] sm:$0xff] %v5601_v61  ;;  %v5626_v29 = vsel %vm1071_vm3, %v1112_v10, %v1113_v24 }
 0x105   :  { %3821 = vmatmul.msk.f32.gmra.mxu1 %vm389_vm2, %v4561_v16  ;;  %8108 = vst [vmem:[#allocation111_spill] sm:$0xff] %v5626_v29 }
 0x106   :  { %3883 = vmatmul.msk.f32.gmra.mxu2 %vm389_vm2, %v5604_v11 }
 0x107   :  { %v5610_v18 = vpop.f32.mrf.mxu0 }
 0x108   :  { %3949 = vmatmul.msk.f32.gmra.mxu3 %vm389_vm2, %v4335_v1  ;;  %v4336_v1 = vld [vmem:[%s7824_s0 + $0xd0] sm:$0x3] }
 0x109   :  { %v5617_v61 = vpop.f32.mrf.mxu2  ;;  %v1115_v11 = vrot.slane %v4336_v1, 2 }
 0x10a   :  { %8106 = vst [vmem:[#allocation109_spill] sm:$0xff] %v5617_v61  ;;  %v5619_v55 = vpop.f32.mrf.mxu1  ;;  %4015 = vmatmul.msk.f32.gmra.mxu0 %vm389_vm2, %v4548_v12 }
 0x10b   :  { %v5623_v16 = vpop.f32.mrf.mxu3  ;;  %v5645_v27 = vsel %vm1071_vm3, %v1113_v24, %v1115_v11 }
 0x10c   :  { %8107 = vst [vmem:[#allocation110_spill] sm:$0xff] %v5623_v16  ;;  %v4337_v16 = vld [vmem:[%s7824_s0 + $0xd8] sm:$0xff] }
 0x10d   :  { %3822 = vmatmul.msk.f32.gmra.mxu1 %vm389_vm2, %v4665_v52 }
 0x10e   :  { %3884 = vmatmul.msk.f32.gmra.mxu2 %vm389_vm2, %v5626_v29 }
 0x10f   :  { %v1970_v62 = vpop.f32.mrf.mxu0 }
 0x110   :  { %3950 = vmatmul.msk.f32.gmra.mxu3 %vm389_vm2, %v4337_v16 }
 0x111   :  { %v1382_v10 = vpop.f32.mrf.mxu2 }
 0x112   :  { %v1574_v12 = vadd.f32 %v1382_v10, %v880_v40  ;;  %v5640_v61 = vpop.f32.mrf.mxu1  ;;  %4016 = vmatmul.msk.f32.gmra.mxu0 %vm389_vm2, %v4612_v35  ;;  %v1117_v40 = vrot.slane %v4337_v16, 2  ;;  %v4338_v10 = vld [vmem:[%s7824_s0 + $0xe0] sm:$0xff] }
 0x113   :  { %v1672_v29 = vpop.f32.mrf.mxu3  ;;  %v1118_v35 = vrot.slane %v4338_v10, 2 }
 0x114   :  { %v1864_v1 = vadd.f32 %v1672_v29, %v1574_v12 }
 0x115   :  { %3823 = vmatmul.msk.f32.gmra.mxu1 %vm389_vm2, %v4670_v53 }
 0x116   :  { %v5649_v60 = vadd.f32 %v1970_v62, %v1864_v1  ;;  %3885 = vmatmul.msk.f32.gmra.mxu2 %vm389_vm2, %v5645_v27  ;;  %v5663_v62 = vsel %vm1071_vm3, %v1117_v40, %v1118_v35 }
 0x117   :  { %v1973_v21 = vpop.f32.mrf.mxu0 }
 0x118   :  { %3951 = vmatmul.msk.f32.gmra.mxu3 %vm389_vm2, %v4338_v10 }
 0x119   :  { %v1385_v12 = vpop.f32.mrf.mxu2 }
 0x11a   :  { %v1575_v24 = vadd.f32 %v1385_v12, %v883_v39  ;;  %v5658_v11 = vpop.f32.mrf.mxu1  ;;  %4017 = vmatmul.msk.f32.gmra.mxu0 %vm389_vm2, %v4659_v51  ;;  %v1120_v39 = vrot.slane %v4621_v37, 2 }
 0x11b   :  { %v1675_v29 = vpop.f32.mrf.mxu3 }
 0x11c   :  { %v1865_v16 = vadd.f32 %v1675_v29, %v1575_v24  ;;  %v5680_v24 = vsel %vm1071_vm3, %v1118_v35, %v1120_v39 }
 0x11d   :  { %3824 = vmatmul.msk.f32.gmra.mxu1 %vm389_vm2, %v4756_v33 }
 0x11e   :  { %v5667_v1 = vadd.f32 %v1973_v21, %v1865_v16  ;;  %3886 = vmatmul.msk.f32.gmra.mxu2 %vm389_vm2, %v5663_v62  ;;  %v1123_v16 = vrot.slane %v4670_v53, 2 }
 0x11f   :  { %v1976_v44 = vpop.f32.mrf.mxu0 }
 0x120   :  { %3952 = vmatmul.msk.f32.gmra.mxu3 %vm389_vm2, %v4665_v52 }
 0x121   :  { %v1388_v10 = vpop.f32.mrf.mxu2 }
 0x122   :  { %v1576_v40 = vadd.f32 %v1388_v10, %v886_v23  ;;  %v5675_v12 = vpop.f32.mrf.mxu1  ;;  %4018 = vmatmul.msk.f32.gmra.mxu0 %vm389_vm2, %v4703_v6  ;;  %v889_v23 = vadd.f32 %v5597_v32, %v5350_v48  ;;  %v8110_v32 = vld [vmem:[#allocation12_spill] sm:$0xff] }
 0x123   :  { %v1678_v21 = vpop.f32.mrf.mxu3  ;;  %v1125_v48 = vrot.slane %v8110_v32, 2 }
 0x124   :  { %v1866_v29 = vadd.f32 %v1678_v21, %v1576_v40  ;;  %v5699_v40 = vsel %vm1071_vm3, %v1122_v4, %v1123_v16 }
 0x125   :  { %3825 = vmatmul.msk.f32.gmra.mxu1 %vm389_vm2, %v4761_v34 }
 0x126   :  { %v5684_v37 = vadd.f32 %v1976_v44, %v1866_v29  ;;  %3887 = vmatmul.msk.f32.gmra.mxu2 %vm389_vm2, %v5680_v24  ;;  %v892_v29 = vadd.f32 %v5619_v55, %v5370_v2  ;;  %v1127_v55 = vrot.slane %v4756_v33, 2 }
 0x127   :  { %v1979_v31 = vpop.f32.mrf.mxu0 }
 0x128   :  { %3953 = vmatmul.msk.f32.gmra.mxu3 %vm389_vm2, %v4670_v53 }
 0x129   :  { %v1391_v35 = vpop.f32.mrf.mxu2 }
 0x12a   :  { %v1577_v39 = vadd.f32 %v1391_v35, %v889_v23  ;;  %v5694_v10 = vpop.f32.mrf.mxu1  ;;  %4019 = vmatmul.msk.f32.gmra.mxu0 %vm389_vm2, %v4746_v30 }
 0x12b   :  { %v1681_v44 = vpop.f32.mrf.mxu3 }
 0x12c   :  { %v1867_v52 = vadd.f32 %v1681_v44, %v1577_v39  ;;  %v8111_v39 = vld [vmem:[#allocation17_spill] sm:$0xff]  ;;  %v5717_v44 = vsel %vm1071_vm3, %v1123_v16, %v1125_v48 }
 0x12d   :  { %3826 = vmatmul.msk.f32.gmra.mxu1 %vm389_vm2, %v4850_v38 }
 0x12e   :  { %v5703_v21 = vadd.f32 %v1979_v31, %v1867_v52  ;;  %3888 = vmatmul.msk.f32.gmra.mxu2 %vm389_vm2, %v5699_v40 }
 0x12f   :  { %v1982_v53 = vpop.f32.mrf.mxu0 }
 0x130   :  { %8109 = vst [vmem:[#allocation112_spill] sm:$0xff] %v5703_v21  ;;  %3954 = vmatmul.msk.f32.gmra.mxu3 %vm389_vm2, %v4756_v33  ;;  %v8112_v21 = vld [vmem:[#allocation24_spill] sm:$0xff] }
 0x131   :  { %v1394_v4 = vpop.f32.mrf.mxu2 }
 0x132   :  { %v1578_v23 = vadd.f32 %v1394_v4, %v892_v29  ;;  %v5712_v35 = vpop.f32.mrf.mxu1  ;;  %4020 = vmatmul.msk.f32.gmra.mxu0 %vm389_vm2, %v8111_v39  ;;  %v1128_v29 = vrot.slane %v4761_v34, 2  ;;  %v895_v4 = vadd.f32 %v5640_v61, %v5391_v26  ;;  %v8117_v26 = vld [vmem:[#allocation19_spill] sm:$0xff] }
 0x133   :  { %v1684_v31 = vpop.f32.mrf.mxu3  ;;  %v1130_v61 = vrot.slane %v8117_v26, 2 }
 0x134   :  { %v1868_v52 = vadd.f32 %v1684_v31, %v1578_v23 }
 0x135   :  { %3827 = vmatmul.msk.f32.gmra.mxu1 %vm389_vm2, %v8112_v21 }
 0x136   :  { %v5721_v32 = vadd.f32 %v1982_v53, %v1868_v52  ;;  %3889 = vmatmul.msk.f32.gmra.mxu2 %vm389_vm2, %v5717_v44  ;;  %v8114_v53 = vld [vmem:[#allocation22_spill] sm:$0xff]  ;;  %v5736_v52 = vsel %vm1071_vm3, %v1127_v55, %v1128_v29 }
 0x137   :  { %v1985_v2 = vpop.f32.mrf.mxu0 }
 0x138   :  { %8113 = vst [vmem:[#allocation12_spill] sm:$0xff] %v5721_v32  ;;  %3955 = vmatmul.msk.f32.gmra.mxu3 %vm389_vm2, %v4761_v34  ;;  %v8115_v32 = vld [vmem:[#allocation34_spill] sm:$0xff] }
 0x139   :  { %v1397_v16 = vpop.f32.mrf.mxu2 }
 0x13a   :  { %v1579_v48 = vadd.f32 %v1397_v16, %v895_v4  ;;  %v5731_v23 = vpop.f32.mrf.mxu1  ;;  %4021 = vmatmul.msk.f32.gmra.mxu0 %vm389_vm2, %v8114_v53  ;;  %v898_v4 = vadd.f32 %v5658_v11, %v5411_v54  ;;  %v8119_v53 = vld [vmem:[#allocation35_spill] sm:$0xff]  ;;  %v1132_v11 = vrot.slane %v4850_v38, 2 }
 0x13b   :  { %v1687_v31 = vpop.f32.mrf.mxu3 }
 0x13c   :  { %v1869_v33 = vadd.f32 %v1687_v31, %v1579_v48  ;;  %v8118_v31 = vld [vmem:[#allocation27_spill] sm:$0xff] }
 0x13d   :  { %3828 = vmatmul.msk.f32.gmra.mxu1 %vm389_vm2, %v8115_v32 }
 0x13e   :  { %v5740_v39 = vadd.f32 %v1985_v2, %v1869_v33  ;;  %3890 = vmatmul.msk.f32.gmra.mxu2 %vm389_vm2, %v5736_v52  ;;  %v5754_v33 = vsel %vm1071_vm3, %v1128_v29, %v1130_v61 }
 0x13f   :  { %v1988_v34 = vpop.f32.mrf.mxu0 }
 0x140   :  { %8116 = vst [vmem:[#allocation24_spill] sm:$0xff] %v5740_v39  ;;  %3956 = vmatmul.msk.f32.gmra.mxu3 %vm389_vm2, %v4850_v38 }
 0x141   :  { %v1400_v55 = vpop.f32.mrf.mxu2 }
 0x142   :  { %v1580_v16 = vadd.f32 %v1400_v55, %v898_v4  ;;  %v5749_v48 = vpop.f32.mrf.mxu1  ;;  %4022 = vmatmul.msk.f32.gmra.mxu0 %vm389_vm2, %v8118_v31  ;;  %v1133_v4 = vrot.slane %v8112_v21, 2  ;;  %v901_v55 = vadd.f32 %v5675_v12, %v5432_v19  ;;  %v8124_v12 = vld [vmem:[#allocation29_spill] sm:$0xff] }
 0x143   :  { %v1690_v2 = vpop.f32.mrf.mxu3 }
 0x144   :  { %v1870_v39 = vadd.f32 %v1690_v2, %v1580_v16  ;;  %v5773_v2 = vsel %vm1071_vm3, %v1132_v11, %v1133_v4 }
 0x145   :  { %3829 = vmatmul.msk.f32.gmra.mxu1 %vm389_vm2, %v8119_v53 }
 0x146   :  { %v5758_v26 = vadd.f32 %v1988_v34, %v1870_v39  ;;  %3891 = vmatmul.msk.f32.gmra.mxu2 %vm389_vm2, %v5754_v33  ;;  %v8121_v39 = vld [vmem:[#allocation32_spill] sm:$0xff] }
 0x147   :  { %v1991_v54 = vpop.f32.mrf.mxu0 }
 0x148   :  { %8120 = vst [vmem:[#allocation34_spill] sm:$0xff] %v5758_v26  ;;  %3957 = vmatmul.msk.f32.gmra.mxu3 %vm389_vm2, %v8112_v21  ;;  %v8122_v26 = vld [vmem:[#allocation45_spill] sm:$0xff]  ;;  %v1135_v21 = vrot.slane %v8124_v12, 2 }
 0x149   :  { %v1403_v29 = vpop.f32.mrf.mxu2 }
 0x14a   :  { %v1581_v61 = vadd.f32 %v1403_v29, %v901_v55  ;;  %v5768_v16 = vpop.f32.mrf.mxu1  ;;  %4023 = vmatmul.msk.f32.gmra.mxu0 %vm389_vm2, %v8121_v39  ;;  %v904_v55 = vadd.f32 %v5694_v10, %v5452_v56  ;;  %v8126_v39 = vld [vmem:[#allocation46_spill] sm:$0xff]  ;;  %v1137_v10 = vrot.slane %v8115_v32, 2 }
 0x14b   :  { %v1693_v34 = vpop.f32.mrf.mxu3 }
 0x14c   :  { %v1871_v38 = vadd.f32 %v1693_v34, %v1581_v61  ;;  %v8125_v34 = vld [vmem:[#allocation38_spill] sm:$0xff] }
 0x14d   :  { %3830 = vmatmul.msk.f32.gmra.mxu1 %vm389_vm2, %v8122_v26 }
 0x14e   :  { %v5777_v31 = vadd.f32 %v1991_v54, %v1871_v38  ;;  %3892 = vmatmul.msk.f32.gmra.mxu2 %vm389_vm2, %v5773_v2  ;;  %v5791_v38 = vsel %vm1071_vm3, %v1133_v4, %v1135_v21 }
 0x14f   :  { %v1994_v19 = vpop.f32.mrf.mxu0 }
 0x150   :  { %8123 = vst [vmem:[#allocation19_spill] sm:$0xff] %v5777_v31  ;;  %3958 = vmatmul.msk.f32.gmra.mxu3 %vm389_vm2, %v8115_v32 }
 0x151   :  { %v1406_v11 = vpop.f32.mrf.mxu2 }
 0x152   :  { %v1582_v29 = vadd.f32 %v1406_v11, %v904_v55  ;;  %v5786_v61 = vpop.f32.mrf.mxu1  ;;  %4024 = vmatmul.msk.f32.gmra.mxu0 %vm389_vm2, %v8125_v34  ;;  %v1138_v55 = vrot.slane %v8119_v53, 2  ;;  %v907_v11 = vadd.f32 %v5712_v35, %v5473_v5 }
 0x153   :  { %v1696_v54 = vpop.f32.mrf.mxu3 }
 0x154   :  { %v1872_v31 = vadd.f32 %v1696_v54, %v1582_v29  ;;  %v5810_v54 = vsel %vm1071_vm3, %v1137_v10, %v1138_v55  ;;  %v910_v10 = vadd.f32 %v5731_v23, %v5493_v42 }
 0x155   :  { %3831 = vmatmul.msk.f32.gmra.mxu1 %vm389_vm2, %v8126_v39 }
 0x156   :  { %v5795_v12 = vadd.f32 %v1994_v19, %v1872_v31  ;;  %3893 = vmatmul.msk.f32.gmra.mxu2 %vm389_vm2, %v5791_v38  ;;  %v8128_v31 = vld [vmem:[#allocation43_spill] sm:$0xff] }
 0x157   :  { %v1997_v56 = vpop.f32.mrf.mxu0 }
 0x158   :  { %8127 = vst [vmem:[#allocation35_spill] sm:$0xff] %v5795_v12  ;;  %3959 = vmatmul.msk.f32.gmra.mxu3 %vm389_vm2, %v8119_v53  ;;  %v5815_v12 = vld [vmem:[%s7824_s0 + $0x168] sm:$0xff]  ;;  %v8130_v53 = vld [vmem:[#allocation40_spill] sm:$0xff] }
 0x159   :  { %v1409_v4 = vpop.f32.mrf.mxu2 }
 0x15a   :  { %v1583_v21 = vadd.f32 %v1409_v4, %v907_v11  ;;  %v5805_v29 = vpop.f32.mrf.mxu1  ;;  %4025 = vmatmul.msk.f32.gmra.mxu0 %vm389_vm2, %v8128_v31  ;;  %v1140_v11 = vrot.slane %v8130_v53, 2  ;;  %v8131_v31 = vld [vmem:[#allocation49_spill] sm:$0xff]  ;;  %v5838_v53 = vld [vmem:[%s7824_s0 + $0x170] sm:$0xff] }
 0x15b   :  { %v1699_v19 = vpop.f32.mrf.mxu3 }
 0x15c   :  { %v1873_v32 = vadd.f32 %v1699_v19, %v1583_v21 }
 0x15d   :  { %3832 = vmatmul.msk.f32.gmra.mxu1 %vm389_vm2, %v5815_v12 }
 0x15e   :  { %v5819_v5 = vadd.f32 %v1997_v56, %v1873_v32  ;;  %3894 = vmatmul.msk.f32.gmra.mxu2 %vm389_vm2, %v5810_v54  ;;  %v5833_v32 = vsel %vm1071_vm3, %v1138_v55, %v1140_v11  ;;  %v1143_v55 = vrot.slane %v8126_v39, 2  ;;  %v913_v11 = vadd.f32 %v5749_v48, %v5514_v7 }
 0x15f   :  { %v2000_v35 = vpop.f32.mrf.mxu0 }
 0x160   :  { %8129 = vst [vmem:[#allocation45_spill] sm:$0xff] %v5819_v5  ;;  %3960 = vmatmul.msk.f32.gmra.mxu3 %vm389_vm2, %v8122_v26 }
 0x161   :  { %v1412_v4 = vpop.f32.mrf.mxu2 }
 0x162   :  { %v1584_v21 = vadd.f32 %v1412_v4, %v910_v10  ;;  %v5828_v19 = vpop.f32.mrf.mxu1  ;;  %4026 = vmatmul.msk.f32.gmra.mxu0 %vm389_vm2, %v8131_v31  ;;  %v1142_v10 = vrot.slane %v8122_v26, 2  ;;  %v5862_v31 = vld [vmem:[%s7824_s0 + $0x1b0] sm:$0xff] }
 0x163   :  { %v1702_v56 = vpop.f32.mrf.mxu3 }
 0x164   :  { %v1874_v5 = vadd.f32 %v1702_v56, %v1584_v21 }
 0x165   :  { %3833 = vmatmul.msk.f32.gmra.mxu1 %vm389_vm2, %v5838_v53 }
 0x166   :  { %v5842_v42 = vadd.f32 %v2000_v35, %v1874_v5  ;;  %3895 = vmatmul.msk.f32.gmra.mxu2 %vm389_vm2, %v5833_v32  ;;  %v8133_v5 = vld [vmem:[#allocation54_spill] sm:$0xff] }
 0x167   :  { %v2003_v23 = vpop.f32.mrf.mxu0 }
 0x168   :  { %8132 = vst [vmem:[#allocation29_spill] sm:$0xff] %v5842_v42  ;;  %3961 = vmatmul.msk.f32.gmra.mxu3 %vm389_vm2, %v8126_v39  ;;  %v5857_v42 = vsel %vm1071_vm3, %v1142_v10, %v1143_v55  ;;  %v8136_v39 = vld [vmem:[#allocation51_spill] sm:$0xff]  ;;  %v916_v10 = vadd.f32 %v5768_v16, %v5534_v17 }
 0x169   :  { %v1415_v4 = vpop.f32.mrf.mxu2  ;;  %8134 = vst [vmem:[#allocation46_spill] sm:$0xff] %v5857_v42 }
 0x16a   :  { %v1585_v21 = vadd.f32 %v1415_v4, %v913_v11  ;;  %v5852_v56 = vpop.f32.mrf.mxu1  ;;  %4027 = vmatmul.msk.f32.gmra.mxu0 %vm389_vm2, %v8133_v5  ;;  %v1145_v11 = vrot.slane %v8136_v39, 2  ;;  %v8137_v5 = vld [vmem:[#allocation6_spill] sm:$0xff]  ;;  %v5885_v39 = vld [vmem:[%s7824_s0 + $0x1b8] sm:$0xff] }
 0x16b   :  { %v1705_v35 = vpop.f32.mrf.mxu3 }
 0x16c   :  { %v1875_v26 = vadd.f32 %v1705_v35, %v1585_v21 }
 0x16d   :  { %3834 = vmatmul.msk.f32.gmra.mxu1 %vm389_vm2, %v5862_v31 }
 0x16e   :  { %v5866_v7 = vadd.f32 %v2003_v23, %v1875_v26  ;;  %3896 = vmatmul.msk.f32.gmra.mxu2 %vm389_vm2, %v5857_v42  ;;  %v5880_v26 = vsel %vm1071_vm3, %v1143_v55, %v1145_v11  ;;  %v1148_v55 = vrot.slane %v5838_v53, 2  ;;  %v919_v11 = vadd.f32 %v5786_v61, %v5553_v43 }
 0x16f   :  { %v2006_v48 = vpop.f32.mrf.mxu0  ;;  %8138 = vst [vmem:[#allocation51_spill] sm:$0xff] %v5880_v26 }
 0x170   :  { %8135 = vst [vmem:[#allocation40_spill] sm:$0xff] %v5866_v7  ;;  %3962 = vmatmul.msk.f32.gmra.mxu3 %vm389_vm2, %v5815_v12 }
 0x171   :  { %v1418_v4 = vpop.f32.mrf.mxu2 }
 0x172   :  { %v1586_v21 = vadd.f32 %v1418_v4, %v916_v10  ;;  %v5875_v35 = vpop.f32.mrf.mxu1  ;;  %4028 = vmatmul.msk.f32.gmra.mxu0 %vm389_vm2, %v8137_v5  ;;  %v1147_v10 = vrot.slane %v5815_v12, 2  ;;  %v70_v4 = vld [vmem:[%s7824_s0 + $0x188] sm:$0xff]  ;;  %v69_v12 = vld [vmem:[%s7824_s0 + $0x180] sm:$0xff] }
 0x173   :  { %v1708_v23 = vpop.f32.mrf.mxu3  ;;  %v1930_v61 = vrot.slane %v69_v12, 1 }
 0x174   :  { %v1876_v7 = vadd.f32 %v1708_v23, %v1586_v21  ;;  %v8140_v23 = vld [vmem:[#allocation9_spill] sm:$0xff]  ;;  %v5910_v43 = vsel %vm1071_vm3, %v1147_v10, %v1148_v55  ;;  %v4344_v10 = vld [vmem:[%s7824_s0 + $0x178] sm:$0x3] }
 0x175   :  { %3835 = vmatmul.msk.f32.gmra.mxu1 %vm389_vm2, %v5885_v39  ;;  %8141 = vst [vmem:[#allocation114_spill] sm:$0xff] %v5910_v43 }
 0x176   :  { %v5889_v17 = vadd.f32 %v2006_v48, %v1876_v7  ;;  %3897 = vmatmul.msk.f32.gmra.mxu2 %vm389_vm2, %v5880_v26  ;;  %v1150_v26 = vrot.slane %v4344_v10, 2 }
 0x177   :  { %v2009_v16 = vpop.f32.mrf.mxu0 }
 0x178   :  { %8139 = vst [vmem:[#allocation113_spill] sm:$0xff] %v5889_v17  ;;  %3963 = vmatmul.msk.f32.gmra.mxu3 %vm389_vm2, %v5838_v53  ;;  %v1931_v53 = vrot.slane %v70_v4, 1 }
 0x179   :  { %v1421_v7 = vpop.f32.mrf.mxu2 }
 0x17a   :  { %v1587_v48 = vadd.f32 %v1421_v7, %v919_v11  ;;  %v5902_v21 = vpop.f32.mrf.mxu1  ;;  %4029 = vmatmul.msk.f32.gmra.mxu0 %vm389_vm2, %v8140_v23  ;;  %v5915_v11 = vld [vmem:[%s7824_s0 + $0x1c8] sm:$0xff] }
 0x17b   :  { %v1711_v17 = vpop.f32.mrf.mxu3 }
 0x17c   :  { %v1877_v5 = vadd.f32 %v1711_v17, %v1587_v48  ;;  %v5927_v17 = vsel %vm226_vm1, %v1930_v61, %v1931_v53  ;;  %v922_v48 = vadd.f32 %v5805_v29, %v5571_v47  ;;  %v5940_v61 = vsel %vm1071_vm3, %v1148_v55, %v1150_v26  ;;  %v5945_v47 = vld [vmem:[%s7824_s0 + $0x1d0] sm:$0xff] }
 0x17d   :  { %3836 = vmatmul.msk.f32.gmra.mxu1 %vm389_vm2, %v5915_v11  ;;  %v1153_v26 = vrot.slane %v5885_v39, 2  ;;  %v4347_v39 = vld [vmem:[%s7824_s0 + $0x1c0] sm:$0x3] }
 0x17e   :  { %v5919_v7 = vadd.f32 %v2009_v16, %v1877_v5  ;;  %3898 = vmatmul.msk.f32.gmra.mxu2 %vm389_vm2, %v5910_v43  ;;  %v71_v5 = vld [vmem:[%s7824_s0 + $0x190] sm:$0x3] }
 0x17f   :  { %v2012_v23 = vpop.f32.mrf.mxu0  ;;  %v1933_v34 = vrot.slane %v71_v5, 1 }
 0x180   :  { %8142 = vst [vmem:[#allocation115_spill] sm:$0xff] %v5919_v7  ;;  %3964 = vmatmul.msk.f32.gmra.mxu3 %vm389_vm2, %v69_v12 }
 0x181   :  { %v1424_v16 = vpop.f32.mrf.mxu2  ;;  %v5956_v55 = vsel %vm226_vm1, %v1931_v53, %v1933_v34  ;;  %v5969_v34 = vld [vmem:[%s7824_s0 + $0x1e0] sm:$0xff]  ;;  %v928_v53 = vadd.f32 %v5852_v56, %v5610_v18 }
 0x182   :  { %v1588_v7 = vadd.f32 %v1424_v16, %v922_v48  ;;  %v5935_v43 = vpop.f32.mrf.mxu1  ;;  %4030 = vmatmul.msk.f32.gmra.mxu0 %vm389_vm2, %v5927_v17  ;;  %v1152_v48 = vrot.slane %v5862_v31, 2 }
 0x183   :  { %v1714_v10 = vpop.f32.mrf.mxu3 }
 0x184   :  { %v1878_v42 = vadd.f32 %v1714_v10, %v1588_v7  ;;  %v925_v7 = vadd.f32 %v5828_v19, %v5590_v13  ;;  %v1154_v31 = vsel %vm1071_vm3, %v1152_v48, %v1153_v26 }
 0x185   :  { %3837 = vmatmul.msk.f32.gmra.mxu1 %vm389_vm2, %v5945_v47 }
 0x186   :  { %v5949_v29 = vadd.f32 %v2012_v23, %v1878_v42  ;;  %3899 = vmatmul.msk.f32.gmra.mxu2 %vm389_vm2, %v5940_v61 }
 0x187   :  { %v2015_v12 = vpop.f32.mrf.mxu0 }
 0x188   :  { %3965 = vmatmul.msk.f32.gmra.mxu3 %vm389_vm2, %v70_v4  ;;  %v1155_v4 = vrot.slane %v4347_v39, 2  ;;  %v1157_v39 = vrot.slane %v5915_v11, 2 }
 0x189   :  { %v1427_v5 = vpop.f32.mrf.mxu2 }
 0x18a   :  { %v1589_v16 = vadd.f32 %v1427_v5, %v925_v7  ;;  %v5961_v42 = vpop.f32.mrf.mxu1  ;;  %4031 = vmatmul.msk.f32.gmra.mxu0 %vm389_vm2, %v5956_v55 }
 0x18b   :  { %v1717_v23 = vpop.f32.mrf.mxu3 }
 0x18c   :  { %v1879_v10 = vadd.f32 %v1717_v23, %v1589_v16  ;;  %v1156_v23 = vsel %vm1071_vm3, %v1153_v26, %v1155_v4  ;;  %v931_v26 = vadd.f32 %v5875_v35, %v5272_v8 }
 0x18d   :  { %3838 = vmatmul.msk.f32.gmra.mxu1 %vm389_vm2, %v5969_v34 }
 0x18e   :  { %v5973_v13 = vadd.f32 %v2015_v12, %v1879_v10  ;;  %3900 = vmatmul.msk.f32.gmra.mxu2 %vm389_vm2, %v1154_v31  ;;  %v8143_v12 = vld [vmem:[#allocation14_spill] sm:$0xff] }
 0x18f   :  { %v2018_v19 = vpop.f32.mrf.mxu0  ;;  %v5991_v10 = vld [vmem:[%s7824_s0 + $0x1e8] sm:$0xff] }
 0x190   :  { %3966 = vmatmul.msk.f32.gmra.mxu3 %vm389_vm2, %v5915_v11 }
 0x191   :  { %v1430_v48 = vpop.f32.mrf.mxu2 }
 0x192   :  { %v1590_v7 = vadd.f32 %v1430_v48, %v928_v53  ;;  %v5983_v5 = vpop.f32.mrf.mxu1  ;;  %4032 = vmatmul.msk.f32.gmra.mxu0 %vm389_vm2, %v8143_v12  ;;  %v1158_v53 = vrot.slane %v5945_v47, 2  ;;  %v8144_v12 = vld [vmem:[#allocation18_spill] sm:$0xff] }
 0x193   :  { %v1720_v16 = vpop.f32.mrf.mxu3 }
 0x194   :  { %v1880_v31 = vadd.f32 %v1720_v16, %v1590_v7  ;;  %v6009_v16 = vsel %vm1071_vm3, %v1157_v39, %v1158_v53  ;;  %v934_v39 = vadd.f32 %v5902_v21, %v5302_v59 }
 0x195   :  { %3839 = vmatmul.msk.f32.gmra.mxu1 %vm389_vm2, %v5991_v10 }
 0x196   :  { %v5995_v18 = vadd.f32 %v2018_v19, %v1880_v31  ;;  %3901 = vmatmul.msk.f32.gmra.mxu2 %vm389_vm2, %v1156_v23  ;;  %v6014_v23 = vld [vmem:[%s7824_s0 + $0x1f8] sm:$0xff] }
 0x197   :  { %v2021_v56 = vpop.f32.mrf.mxu0 }
 0x198   :  { %3967 = vmatmul.msk.f32.gmra.mxu3 %vm389_vm2, %v5945_v47  ;;  %v4350_v47 = vld [vmem:[%s7824_s0 + $0x1d8] sm:$0x3] }
 0x199   :  { %v1433_v4 = vpop.f32.mrf.mxu2  ;;  %v1160_v31 = vrot.slane %v4350_v47, 2  ;;  %v6039_v47 = vld [vmem:[%s7824_s0 + $0x200] sm:$0xff] }
 0x19a   :  { %v1591_v48 = vadd.f32 %v1433_v4, %v931_v26  ;;  %v6004_v7 = vpop.f32.mrf.mxu1  ;;  %4033 = vmatmul.msk.f32.gmra.mxu0 %vm389_vm2, %v8144_v12 }
 0x19b   :  { %v1723_v19 = vpop.f32.mrf.mxu3 }
 0x19c   :  { %v1881_v11 = vadd.f32 %v1723_v19, %v1591_v48  ;;  %v6034_v19 = vsel %vm1071_vm3, %v1158_v53, %v1160_v31  ;;  %v1163_v53 = vrot.slane %v5991_v10, 2  ;;  %v937_v31 = vadd.f32 %v5935_v43, %v5319_v46 }
 0x19d   :  { %3840 = vmatmul.msk.f32.gmra.mxu1 %vm389_vm2, %v6014_v23 }
 0x19e   :  { %v6018_v8 = vadd.f32 %v2021_v56, %v1881_v11  ;;  %3902 = vmatmul.msk.f32.gmra.mxu2 %vm389_vm2, %v6009_v16  ;;  %v8146_v56 = vld [vmem:[#allocation23_spill] sm:$0xff] }
 0x19f   :  { %v2024_v35 = vpop.f32.mrf.mxu0 }
 0x1a0   :  { %8145 = vst [vmem:[#allocation14_spill] sm:$0xff] %v6018_v8  ;;  %3968 = vmatmul.msk.f32.gmra.mxu3 %vm389_vm2, %v5969_v34  ;;  %v6063_v8 = vld [vmem:[%s7824_s0 + $0x210] sm:$0xff] }
 0x1a1   :  { %v1436_v26 = vpop.f32.mrf.mxu2 }
 0x1a2   :  { %v1592_v4 = vadd.f32 %v1436_v26, %v934_v39  ;;  %v6029_v48 = vpop.f32.mrf.mxu1  ;;  %4034 = vmatmul.msk.f32.gmra.mxu0 %vm389_vm2, %v8146_v56  ;;  %v1162_v39 = vrot.slane %v5969_v34, 2 }
 0x1a3   :  { %v1726_v12 = vpop.f32.mrf.mxu3 }
 0x1a4   :  { %v1882_v11 = vadd.f32 %v1726_v12, %v1592_v4 }
 0x1a5   :  { %3841 = vmatmul.msk.f32.gmra.mxu1 %vm389_vm2, %v6039_v47 }
 0x1a6   :  { %v6043_v59 = vadd.f32 %v2024_v35, %v1882_v11  ;;  %3903 = vmatmul.msk.f32.gmra.mxu2 %vm389_vm2, %v6034_v19  ;;  %v8148_v35 = vld [vmem:[#allocation28_spill] sm:$0xff] }
 0x1a7   :  { %v2027_v21 = vpop.f32.mrf.mxu0 }
 0x1a8   :  { %8147 = vst [vmem:[#allocation18_spill] sm:$0xff] %v6043_v59  ;;  %3969 = vmatmul.msk.f32.gmra.mxu3 %vm389_vm2, %v5991_v10  ;;  %v6058_v59 = vsel %vm1071_vm3, %v1162_v39, %v1163_v53  ;;  %v4353_v10 = vld [vmem:[%s7824_s0 + $0x1f0] sm:$0x3] }
 0x1a9   :  { %v1439_v26 = vpop.f32.mrf.mxu2  ;;  %v1165_v39 = vrot.slane %v4353_v10, 2  ;;  %v6088_v10 = vld [vmem:[%s7824_s0 + $0x218] sm:$0xff] }
 0x1aa   :  { %v1593_v4 = vadd.f32 %v1439_v26, %v937_v31  ;;  %v6053_v12 = vpop.f32.mrf.mxu1  ;;  %4035 = vmatmul.msk.f32.gmra.mxu0 %vm389_vm2, %v8148_v35  ;;  %v940_v31 = vadd.f32 %v5961_v42, %v5337_v0 }
 0x1ab   :  { %v1729_v11 = vpop.f32.mrf.mxu3 }
 0x1ac   :  { %v1883_v34 = vadd.f32 %v1729_v11, %v1593_v4 }
 0x1ad   :  { %3842 = vmatmul.msk.f32.gmra.mxu1 %vm389_vm2, %v6063_v8 }
 0x1ae   :  { %v6067_v46 = vadd.f32 %v2027_v21, %v1883_v34  ;;  %3904 = vmatmul.msk.f32.gmra.mxu2 %vm389_vm2, %v6058_v59  ;;  %v8150_v21 = vld [vmem:[#allocation33_spill] sm:$0xff] }
 0x1af   :  { %v2030_v43 = vpop.f32.mrf.mxu0 }
 0x1b0   :  { %8149 = vst [vmem:[#allocation23_spill] sm:$0xff] %v6067_v46  ;;  %3970 = vmatmul.msk.f32.gmra.mxu3 %vm389_vm2, %v6014_v23  ;;  %v6083_v46 = vsel %vm1071_vm3, %v1163_v53, %v1165_v39  ;;  %v1168_v53 = vrot.slane %v6039_v47, 2  ;;  %v943_v39 = vadd.f32 %v5983_v5, %v5357_v25 }
 0x1b1   :  { %v1442_v26 = vpop.f32.mrf.mxu2 }
 0x1b2   :  { %v1594_v4 = vadd.f32 %v1442_v26, %v940_v31  ;;  %v6078_v11 = vpop.f32.mrf.mxu1  ;;  %4036 = vmatmul.msk.f32.gmra.mxu0 %vm389_vm2, %v8150_v21  ;;  %v1167_v31 = vrot.slane %v6014_v23, 2  ;;  %v6112_v21 = vld [vmem:[%s7824_s0 + $0x228] sm:$0xff] }
 0x1b3   :  { %v1732_v34 = vpop.f32.mrf.mxu3 }
 0x1b4   :  { %v1884_v35 = vadd.f32 %v1732_v34, %v1594_v4 }
 0x1b5   :  { %3843 = vmatmul.msk.f32.gmra.mxu1 %vm389_vm2, %v6088_v10 }
 0x1b6   :  { %v6092_v0 = vadd.f32 %v2030_v43, %v1884_v35  ;;  %3905 = vmatmul.msk.f32.gmra.mxu2 %vm389_vm2, %v6083_v46  ;;  %v8152_v35 = vld [vmem:[#allocation39_spill] sm:$0xff] }
 0x1b7   :  { %v2033_v42 = vpop.f32.mrf.mxu0 }
 0x1b8   :  { %8151 = vst [vmem:[#allocation116_spill] sm:$0xff] %v6092_v0  ;;  %3971 = vmatmul.msk.f32.gmra.mxu3 %vm389_vm2, %v6039_v47  ;;  %v6107_v0 = vsel %vm1071_vm3, %v1167_v31, %v1168_v53  ;;  %v4356_v47 = vld [vmem:[%s7824_s0 + $0x208] sm:$0x3] }
 0x1b9   :  { %v1445_v26 = vpop.f32.mrf.mxu2  ;;  %v1170_v31 = vrot.slane %v4356_v47, 2  ;;  %v6137_v47 = vld [vmem:[%s7824_s0 + $0x230] sm:$0xff] }
 0x1ba   :  { %v1595_v4 = vadd.f32 %v1445_v26, %v943_v39  ;;  %v6102_v34 = vpop.f32.mrf.mxu1  ;;  %4037 = vmatmul.msk.f32.gmra.mxu0 %vm389_vm2, %v8152_v35  ;;  %v946_v39 = vadd.f32 %v6004_v7, %v5378_v20 }
 0x1bb   :  { %v1735_v43 = vpop.f32.mrf.mxu3 }
 0x1bc   :  { %v1885_v23 = vadd.f32 %v1735_v43, %v1595_v4 }
 0x1bd   :  { %3844 = vmatmul.msk.f32.gmra.mxu1 %vm389_vm2, %v6112_v21 }
 0x1be   :  { %v6116_v25 = vadd.f32 %v2033_v42, %v1885_v23  ;;  %3906 = vmatmul.msk.f32.gmra.mxu2 %vm389_vm2, %v6107_v0  ;;  %v8154_v42 = vld [vmem:[#allocation44_spill] sm:$0xff] }
 0x1bf   :  { %v2036_v5 = vpop.f32.mrf.mxu0 }
 0x1c0   :  { %8153 = vst [vmem:[#allocation117_spill] sm:$0xff] %v6116_v25  ;;  %3972 = vmatmul.msk.f32.gmra.mxu3 %vm389_vm2, %v6063_v8  ;;  %v6132_v25 = vsel %vm1071_vm3, %v1168_v53, %v1170_v31  ;;  %v1173_v53 = vrot.slane %v6088_v10, 2  ;;  %v949_v31 = vadd.f32 %v6029_v48, %v5398_v15 }
 0x1c1   :  { %v1448_v26 = vpop.f32.mrf.mxu2 }
 0x1c2   :  { %v1596_v4 = vadd.f32 %v1448_v26, %v946_v39  ;;  %v6127_v43 = vpop.f32.mrf.mxu1  ;;  %4038 = vmatmul.msk.f32.gmra.mxu0 %vm389_vm2, %v8154_v42  ;;  %v1172_v39 = vrot.slane %v6063_v8, 2  ;;  %v6161_v42 = vld [vmem:[%s7824_s0 + $0x240] sm:$0xff] }
 0x1c3   :  { %v1738_v23 = vpop.f32.mrf.mxu3 }
 0x1c4   :  { %v1886_v35 = vadd.f32 %v1738_v23, %v1596_v4 }
 0x1c5   :  { %3845 = vmatmul.msk.f32.gmra.mxu1 %vm389_vm2, %v6137_v47 }
 0x1c6   :  { %v6141_v20 = vadd.f32 %v2036_v5, %v1886_v35  ;;  %3907 = vmatmul.msk.f32.gmra.mxu2 %vm389_vm2, %v6132_v25  ;;  %v8156_v35 = vld [vmem:[#allocation50_spill] sm:$0xff] }
 0x1c7   :  { %v2039_v7 = vpop.f32.mrf.mxu0 }
 0x1c8   :  { %8155 = vst [vmem:[#allocation118_spill] sm:$0xff] %v6141_v20  ;;  %3973 = vmatmul.msk.f32.gmra.mxu3 %vm389_vm2, %v6088_v10  ;;  %v6156_v20 = vsel %vm1071_vm3, %v1172_v39, %v1173_v53  ;;  %v4359_v10 = vld [vmem:[%s7824_s0 + $0x220] sm:$0x3] }
 0x1c9   :  { %v1451_v26 = vpop.f32.mrf.mxu2  ;;  %v1175_v39 = vrot.slane %v4359_v10, 2  ;;  %v6186_v10 = vld [vmem:[%s7824_s0 + $0x248] sm:$0xff] }
 0x1ca   :  { %v1597_v4 = vadd.f32 %v1451_v26, %v949_v31  ;;  %v6151_v23 = vpop.f32.mrf.mxu1  ;;  %4039 = vmatmul.msk.f32.gmra.mxu0 %vm389_vm2, %v8156_v35  ;;  %v952_v31 = vadd.f32 %v6053_v12, %v5419_v14 }
 0x1cb   :  { %v1741_v5 = vpop.f32.mrf.mxu3 }
 0x1cc   :  { %v1887_v8 = vadd.f32 %v1741_v5, %v1597_v4 }
 0x1cd   :  { %3846 = vmatmul.msk.f32.gmra.mxu1 %vm389_vm2, %v6161_v42 }
 0x1ce   :  { %v6165_v15 = vadd.f32 %v2039_v7, %v1887_v8  ;;  %3908 = vmatmul.msk.f32.gmra.mxu2 %vm389_vm2, %v6156_v20  ;;  %v8158_v7 = vld [vmem:[#allocation55_spill] sm:$0xff] }
 0x1cf   :  { %v2042_v48 = vpop.f32.mrf.mxu0 }
 0x1d0   :  { %8157 = vst [vmem:[#allocation119_spill] sm:$0xff] %v6165_v15  ;;  %3974 = vmatmul.msk.f32.gmra.mxu3 %vm389_vm2, %v6112_v21  ;;  %v6181_v15 = vsel %vm1071_vm3, %v1173_v53, %v1175_v39  ;;  %v1178_v53 = vrot.slane %v6137_v47, 2  ;;  %v955_v39 = vadd.f32 %v6078_v11, %v5439_v45 }
 0x1d1   :  { %v1454_v26 = vpop.f32.mrf.mxu2 }
 0x1d2   :  { %v1598_v4 = vadd.f32 %v1454_v26, %v952_v31  ;;  %v6176_v5 = vpop.f32.mrf.mxu1  ;;  %4040 = vmatmul.msk.f32.gmra.mxu0 %vm389_vm2, %v8158_v7  ;;  %v1177_v31 = vrot.slane %v6112_v21, 2  ;;  %v6210_v7 = vld [vmem:[%s7824_s0 + $0x258] sm:$0xff] }
 0x1d3   :  { %v1744_v8 = vpop.f32.mrf.mxu3 }
 0x1d4   :  { %v1888_v35 = vadd.f32 %v1744_v8, %v1598_v4 }
 0x1d5   :  { %3847 = vmatmul.msk.f32.gmra.mxu1 %vm389_vm2, %v6186_v10 }
 0x1d6   :  { %v6190_v14 = vadd.f32 %v2042_v48, %v1888_v35  ;;  %3909 = vmatmul.msk.f32.gmra.mxu2 %vm389_vm2, %v6181_v15  ;;  %v8160_v35 = vld [vmem:[#allocation58_spill] sm:$0xff] }
 0x1d7   :  { %v2045_v12 = vpop.f32.mrf.mxu0 }
 0x1d8   :  { %8159 = vst [vmem:[#allocation120_spill] sm:$0xff] %v6190_v14  ;;  %3975 = vmatmul.msk.f32.gmra.mxu3 %vm389_vm2, %v6137_v47  ;;  %v6205_v14 = vsel %vm1071_vm3, %v1177_v31, %v1178_v53  ;;  %v4362_v47 = vld [vmem:[%s7824_s0 + $0x238] sm:$0x3] }
 0x1d9   :  { %v1457_v26 = vpop.f32.mrf.mxu2  ;;  %v1180_v31 = vrot.slane %v4362_v47, 2  ;;  %v6235_v47 = vld [vmem:[%s7824_s0 + $0x260] sm:$0xff] }
 0x1da   :  { %v1599_v4 = vadd.f32 %v1457_v26, %v955_v39  ;;  %v6200_v8 = vpop.f32.mrf.mxu1  ;;  %4041 = vmatmul.msk.f32.gmra.mxu0 %vm389_vm2, %v8160_v35  ;;  %v958_v39 = vadd.f32 %v6102_v34, %v5460_v49 }
 0x1db   :  { %v1747_v48 = vpop.f32.mrf.mxu3 }
 0x1dc   :  { %v1889_v21 = vadd.f32 %v1747_v48, %v1599_v4 }
 0x1dd   :  { %3848 = vmatmul.msk.f32.gmra.mxu1 %vm389_vm2, %v6210_v7 }
 0x1de   :  { %v6214_v45 = vadd.f32 %v2045_v12, %v1889_v21  ;;  %3910 = vmatmul.msk.f32.gmra.mxu2 %vm389_vm2, %v6205_v14  ;;  %v8162_v12 = vld [vmem:[#allocation61_spill] sm:$0xff] }
 0x1df   :  { %v2048_v11 = vpop.f32.mrf.mxu0 }
 0x1e0   :  { %8161 = vst [vmem:[#allocation121_spill] sm:$0xff] %v6214_v45  ;;  %3976 = vmatmul.msk.f32.gmra.mxu3 %vm389_vm2, %v6161_v42  ;;  %v6230_v45 = vsel %vm1071_vm3, %v1178_v53, %v1180_v31  ;;  %v1183_v53 = vrot.slane %v6186_v10, 2  ;;  %v961_v31 = vadd.f32 %v6127_v43, %v5480_v36 }
 0x1e1   :  { %v1460_v26 = vpop.f32.mrf.mxu2 }
 0x1e2   :  { %v1600_v4 = vadd.f32 %v1460_v26, %v958_v39  ;;  %v6225_v48 = vpop.f32.mrf.mxu1  ;;  %4042 = vmatmul.msk.f32.gmra.mxu0 %vm389_vm2, %v8162_v12  ;;  %v1182_v39 = vrot.slane %v6161_v42, 2  ;;  %v6259_v12 = vld [vmem:[%s7824_s0 + $0x270] sm:$0xff] }
 0x1e3   :  { %v1750_v21 = vpop.f32.mrf.mxu3 }
 0x1e4   :  { %v1890_v35 = vadd.f32 %v1750_v21, %v1600_v4 }
 0x1e5   :  { %3849 = vmatmul.msk.f32.gmra.mxu1 %vm389_vm2, %v6235_v47 }
 0x1e6   :  { %v6239_v49 = vadd.f32 %v2048_v11, %v1890_v35  ;;  %3911 = vmatmul.msk.f32.gmra.mxu2 %vm389_vm2, %v6230_v45  ;;  %v8164_v35 = vld [vmem:[#allocation64_spill] sm:$0xff] }
 0x1e7   :  { %v2051_v34 = vpop.f32.mrf.mxu0 }
 0x1e8   :  { %8163 = vst [vmem:[#allocation122_spill] sm:$0xff] %v6239_v49  ;;  %3977 = vmatmul.msk.f32.gmra.mxu3 %vm389_vm2, %v6186_v10  ;;  %v6254_v49 = vsel %vm1071_vm3, %v1182_v39, %v1183_v53  ;;  %v4365_v10 = vld [vmem:[%s7824_s0 + $0x250] sm:$0x3] }
 0x1e9   :  { %v1463_v26 = vpop.f32.mrf.mxu2  ;;  %v1185_v39 = vrot.slane %v4365_v10, 2  ;;  %v6284_v10 = vld [vmem:[%s7824_s0 + $0x278] sm:$0xff] }
 0x1ea   :  { %v1601_v4 = vadd.f32 %v1463_v26, %v961_v31  ;;  %v6249_v21 = vpop.f32.mrf.mxu1  ;;  %4043 = vmatmul.msk.f32.gmra.mxu0 %vm389_vm2, %v8164_v35  ;;  %v964_v31 = vadd.f32 %v6151_v23, %v5501_v28 }
 0x1eb   :  { %v1753_v11 = vpop.f32.mrf.mxu3 }
 0x1ec   :  { %v1891_v42 = vadd.f32 %v1753_v11, %v1601_v4 }
 0x1ed   :  { %3850 = vmatmul.msk.f32.gmra.mxu1 %vm389_vm2, %v6259_v12 }
 0x1ee   :  { %v6263_v36 = vadd.f32 %v2051_v34, %v1891_v42  ;;  %3912 = vmatmul.msk.f32.gmra.mxu2 %vm389_vm2, %v6254_v49  ;;  %v8166_v34 = vld [vmem:[#allocation67_spill] sm:$0xff] }
 0x1ef   :  { %v2054_v43 = vpop.f32.mrf.mxu0 }
 0x1f0   :  { %8165 = vst [vmem:[#allocation123_spill] sm:$0xff] %v6263_v36  ;;  %3978 = vmatmul.msk.f32.gmra.mxu3 %vm389_vm2, %v6210_v7  ;;  %v6279_v36 = vsel %vm1071_vm3, %v1183_v53, %v1185_v39  ;;  %v1188_v53 = vrot.slane %v6235_v47, 2  ;;  %v967_v39 = vadd.f32 %v6176_v5, %v5521_v9 }
 0x1f1   :  { %v1466_v26 = vpop.f32.mrf.mxu2 }
 0x1f2   :  { %v1602_v4 = vadd.f32 %v1466_v26, %v964_v31  ;;  %v6274_v11 = vpop.f32.mrf.mxu1  ;;  %4044 = vmatmul.msk.f32.gmra.mxu0 %vm389_vm2, %v8166_v34  ;;  %v1187_v31 = vrot.slane %v6210_v7, 2  ;;  %v6308_v34 = vld [vmem:[%s7824_s0 + $0x288] sm:$0xff] }
 0x1f3   :  { %v1756_v42 = vpop.f32.mrf.mxu3 }
 0x1f4   :  { %v1892_v35 = vadd.f32 %v1756_v42, %v1602_v4 }
 0x1f5   :  { %3851 = vmatmul.msk.f32.gmra.mxu1 %vm389_vm2, %v6284_v10 }
 0x1f6   :  { %v6288_v28 = vadd.f32 %v2054_v43, %v1892_v35  ;;  %3913 = vmatmul.msk.f32.gmra.mxu2 %vm389_vm2, %v6279_v36  ;;  %v8168_v35 = vld [vmem:[#allocation7_spill] sm:$0xff] }
 0x1f7   :  { %v2057_v23 = vpop.f32.mrf.mxu0 }
 0x1f8   :  { %8167 = vst [vmem:[#allocation124_spill] sm:$0xff] %v6288_v28  ;;  %3979 = vmatmul.msk.f32.gmra.mxu3 %vm389_vm2, %v6235_v47  ;;  %v6303_v28 = vsel %vm1071_vm3, %v1187_v31, %v1188_v53  ;;  %v4368_v47 = vld [vmem:[%s7824_s0 + $0x268] sm:$0x3] }
 0x1f9   :  { %v1469_v26 = vpop.f32.mrf.mxu2  ;;  %8169 = vst [vmem:[#allocation125_spill] sm:$0xff] %v6303_v28  ;;  %v1190_v31 = vrot.slane %v4368_v47, 2  ;;  %v6333_v47 = vld [vmem:[%s7824_s0 + $0x290] sm:$0xff] }
 0x1fa   :  { %v1603_v4 = vadd.f32 %v1469_v26, %v967_v39  ;;  %v6298_v42 = vpop.f32.mrf.mxu1  ;;  %4045 = vmatmul.msk.f32.gmra.mxu0 %vm389_vm2, %v8168_v35  ;;  %v8171_v39 = vld [vmem:[#allocation70_spill] sm:$0xff] }
 0x1fb   :  { %v1759_v43 = vpop.f32.mrf.mxu3  ;;  %v970_v26 = vadd.f32 %v6200_v8, %v8171_v39 }
 0x1fc   :  { %v1893_v7 = vadd.f32 %v1759_v43, %v1603_v4 }
 0x1fd   :  { %3852 = vmatmul.msk.f32.gmra.mxu1 %vm389_vm2, %v6308_v34 }
 0x1fe   :  { %v6312_v9 = vadd.f32 %v2057_v23, %v1893_v7  ;;  %3914 = vmatmul.msk.f32.gmra.mxu2 %vm389_vm2, %v6303_v28  ;;  %v8172_v23 = vld [vmem:[#allocation10_spill] sm:$0xff] }
 0x1ff   :  { %v2060_v5 = vpop.f32.mrf.mxu0 }
 0x200   :  { %8170 = vst [vmem:[#allocation126_spill] sm:$0xff] %v6312_v9  ;;  %3980 = vmatmul.msk.f32.gmra.mxu3 %vm389_vm2, %v6259_v12  ;;  %v6328_v9 = vsel %vm1071_vm3, %v1188_v53, %v1190_v31  ;;  %v1193_v53 = vrot.slane %v6284_v10, 2  ;;  %v8175_v31 = vld [vmem:[#allocation72_spill] sm:$0xff] }
 0x201   :  { %v1472_v4 = vpop.f32.mrf.mxu2  ;;  %8173 = vst [vmem:[#allocation70_spill] sm:$0xff] %v6328_v9 }
 0x202   :  { %v1604_v43 = vadd.f32 %v1472_v4, %v970_v26  ;;  %v6323_v35 = vpop.f32.mrf.mxu1  ;;  %4046 = vmatmul.msk.f32.gmra.mxu0 %vm389_vm2, %v8172_v23  ;;  %v1192_v26 = vrot.slane %v6259_v12, 2  ;;  %v973_v4 = vadd.f32 %v6225_v48, %v8175_v31 }
 0x203   :  { %v1762_v7 = vpop.f32.mrf.mxu3 }
 0x204   :  { %v1894_v28 = vadd.f32 %v1762_v7, %v1604_v43 }
 0x205   :  { %3853 = vmatmul.msk.f32.gmra.mxu1 %vm389_vm2, %v6333_v47 }
 0x206   :  { %v6337_v8 = vadd.f32 %v2060_v5, %v1894_v28  ;;  %3915 = vmatmul.msk.f32.gmra.mxu2 %vm389_vm2, %v6328_v9  ;;  %v8176_v28 = vld [vmem:[#allocation11_spill] sm:$0xff]  ;;  %v6357_v9 = vld [vmem:[%s7824_s0 + $0x2a0] sm:$0xff] }
 0x207   :  { %v2063_v39 = vpop.f32.mrf.mxu0 }
 0x208   :  { %8174 = vst [vmem:[#allocation127_spill] sm:$0xff] %v6337_v8  ;;  %3981 = vmatmul.msk.f32.gmra.mxu3 %vm389_vm2, %v6284_v10  ;;  %v6352_v8 = vsel %vm1071_vm3, %v1192_v26, %v1193_v53  ;;  %v4371_v26 = vld [vmem:[%s7824_s0 + $0x280] sm:$0x3] }
 0x209   :  { %v1475_v43 = vpop.f32.mrf.mxu2  ;;  %v1195_v31 = vrot.slane %v4371_v26, 2  ;;  %v6382_v26 = vld [vmem:[%s7824_s0 + $0x2a8] sm:$0xff] }
 0x20a   :  { %v1605_v7 = vadd.f32 %v1475_v43, %v973_v4  ;;  %v6347_v23 = vpop.f32.mrf.mxu1  ;;  %4047 = vmatmul.msk.f32.gmra.mxu0 %vm389_vm2, %v8176_v28  ;;  %v976_v4 = vadd.f32 %v6249_v21, %v5335_v57 }
 0x20b   :  { %v1765_v5 = vpop.f32.mrf.mxu3 }
 0x20c   :  { %v1895_v12 = vadd.f32 %v1765_v5, %v1605_v7 }
 0x20d   :  { %3854 = vmatmul.msk.f32.gmra.mxu1 %vm389_vm2, %v6357_v9 }
 0x20e   :  { %v6361_v48 = vadd.f32 %v2063_v39, %v1895_v12  ;;  %3916 = vmatmul.msk.f32.gmra.mxu2 %vm389_vm2, %v6352_v8  ;;  %v8178_v39 = vld [vmem:[#allocation13_spill] sm:$0xff] }
 0x20f   :  { %v2066_v10 = vpop.f32.mrf.mxu0 }
 0x210   :  { %8177 = vst [vmem:[#allocation72_spill] sm:$0xff] %v6361_v48  ;;  %3982 = vmatmul.msk.f32.gmra.mxu3 %vm389_vm2, %v6308_v34  ;;  %v6377_v48 = vsel %vm1071_vm3, %v1193_v53, %v1195_v31  ;;  %v1198_v53 = vrot.slane %v6333_v47, 2  ;;  %v979_v31 = vadd.f32 %v6274_v11, %v5355_v3 }
 0x211   :  { %v1478_v43 = vpop.f32.mrf.mxu2 }
 0x212   :  { %v1606_v7 = vadd.f32 %v1478_v43, %v976_v4  ;;  %v6372_v5 = vpop.f32.mrf.mxu1  ;;  %4048 = vmatmul.msk.f32.gmra.mxu0 %vm389_vm2, %v8178_v39  ;;  %v1197_v4 = vrot.slane %v6308_v34, 2  ;;  %v6406_v39 = vld [vmem:[%s7824_s0 + $0x2b8] sm:$0xff] }
 0x213   :  { %v1768_v12 = vpop.f32.mrf.mxu3 }
 0x214   :  { %v1896_v28 = vadd.f32 %v1768_v12, %v1606_v7 }
 0x215   :  { %3855 = vmatmul.msk.f32.gmra.mxu1 %vm389_vm2, %v6382_v26 }
 0x216   :  { %v6386_v57 = vadd.f32 %v2066_v10, %v1896_v28  ;;  %3917 = vmatmul.msk.f32.gmra.mxu2 %vm389_vm2, %v6377_v48  ;;  %v8180_v28 = vld [vmem:[#allocation15_spill] sm:$0xff] }
 0x217   :  { %v2069_v21 = vpop.f32.mrf.mxu0 }
 0x218   :  { %8179 = vst [vmem:[#allocation128_spill] sm:$0xff] %v6386_v57  ;;  %3983 = vmatmul.msk.f32.gmra.mxu3 %vm389_vm2, %v6333_v47  ;;  %v6401_v57 = vsel %vm1071_vm3, %v1197_v4, %v1198_v53  ;;  %v4374_v47 = vld [vmem:[%s7824_s0 + $0x298] sm:$0x3] }
 0x219   :  { %v1481_v43 = vpop.f32.mrf.mxu2  ;;  %v1200_v4 = vrot.slane %v4374_v47, 2  ;;  %v6431_v47 = vld [vmem:[%s7824_s0 + $0x2c0] sm:$0xff] }
 0x21a   :  { %v1607_v7 = vadd.f32 %v1481_v43, %v979_v31  ;;  %v6396_v12 = vpop.f32.mrf.mxu1  ;;  %4049 = vmatmul.msk.f32.gmra.mxu0 %vm389_vm2, %v8180_v28  ;;  %v982_v31 = vadd.f32 %v6298_v42, %v5376_v50 }
 0x21b   :  { %v1771_v10 = vpop.f32.mrf.mxu3 }
 0x21c   :  { %v1897_v34 = vadd.f32 %v1771_v10, %v1607_v7 }
 0x21d   :  { %3856 = vmatmul.msk.f32.gmra.mxu1 %vm389_vm2, %v6406_v39 }
 0x21e   :  { %v6410_v3 = vadd.f32 %v2069_v21, %v1897_v34  ;;  %3918 = vmatmul.msk.f32.gmra.mxu2 %vm389_vm2, %v6401_v57  ;;  %v8182_v21 = vld [vmem:[#allocation20_spill] sm:$0xff] }
 0x21f   :  { %v2072_v11 = vpop.f32.mrf.mxu0 }
 0x220   :  { %8181 = vst [vmem:[#allocation129_spill] sm:$0xff] %v6410_v3  ;;  %3984 = vmatmul.msk.f32.gmra.mxu3 %vm389_vm2, %v6357_v9  ;;  %v6426_v3 = vsel %vm1071_vm3, %v1198_v53, %v1200_v4  ;;  %v1203_v53 = vrot.slane %v6382_v26, 2  ;;  %v8185_v4 = vld [vmem:[#allocation80_spill] sm:$0xff] }
 0x221   :  { %v1484_v43 = vpop.f32.mrf.mxu2  ;;  %8183 = vst [vmem:[#allocation130_spill] sm:$0xff] %v6426_v3 }
 0x222   :  { %v1608_v7 = vadd.f32 %v1484_v43, %v982_v31  ;;  %v6421_v10 = vpop.f32.mrf.mxu1  ;;  %4050 = vmatmul.msk.f32.gmra.mxu0 %vm389_vm2, %v8182_v21  ;;  %v1202_v31 = vrot.slane %v6357_v9, 2  ;;  %v985_v43 = vadd.f32 %v6323_v35, %v8185_v4 }
 0x223   :  { %v1774_v34 = vpop.f32.mrf.mxu3 }
 0x224   :  { %v1898_v28 = vadd.f32 %v1774_v34, %v1608_v7 }
 0x225   :  { %3857 = vmatmul.msk.f32.gmra.mxu1 %vm389_vm2, %v6431_v47 }
 0x226   :  { %v6435_v50 = vadd.f32 %v2072_v11, %v1898_v28  ;;  %3919 = vmatmul.msk.f32.gmra.mxu2 %vm389_vm2, %v6426_v3  ;;  %v8186_v28 = vld [vmem:[#allocation25_spill] sm:$0xff]  ;;  %v6455_v3 = vld [vmem:[%s7824_s0 + $0x2d0] sm:$0xff] }
 0x227   :  { %v2075_v42 = vpop.f32.mrf.mxu0 }
 0x228   :  { %8184 = vst [vmem:[#allocation131_spill] sm:$0xff] %v6435_v50  ;;  %3985 = vmatmul.msk.f32.gmra.mxu3 %vm389_vm2, %v6382_v26  ;;  %v6450_v50 = vsel %vm1071_vm3, %v1202_v31, %v1203_v53  ;;  %v4377_v31 = vld [vmem:[%s7824_s0 + $0x2b0] sm:$0x3] }
 0x229   :  { %v1487_v7 = vpop.f32.mrf.mxu2  ;;  %v1205_v4 = vrot.slane %v4377_v31, 2  ;;  %v6480_v31 = vld [vmem:[%s7824_s0 + $0x2d8] sm:$0xff] }
 0x22a   :  { %v1609_v34 = vadd.f32 %v1487_v7, %v985_v43  ;;  %v6445_v21 = vpop.f32.mrf.mxu1  ;;  %4051 = vmatmul.msk.f32.gmra.mxu0 %vm389_vm2, %v8186_v28  ;;  %v988_v43 = vadd.f32 %v6347_v23, %v5417_v63 }
 0x22b   :  { %v1777_v11 = vpop.f32.mrf.mxu3 }
 0x22c   :  { %v1899_v9 = vadd.f32 %v1777_v11, %v1609_v34 }
 0x22d   :  { %3858 = vmatmul.msk.f32.gmra.mxu1 %vm389_vm2, %v6455_v3 }
 0x22e   :  { %v6459_v35 = vadd.f32 %v2075_v42, %v1899_v9  ;;  %3920 = vmatmul.msk.f32.gmra.mxu2 %vm389_vm2, %v6450_v50  ;;  %v8188_v42 = vld [vmem:[#allocation30_spill] sm:$0xff] }
 0x22f   :  { %v2078_v26 = vpop.f32.mrf.mxu0 }
 0x230   :  { %8187 = vst [vmem:[#allocation80_spill] sm:$0xff] %v6459_v35  ;;  %3986 = vmatmul.msk.f32.gmra.mxu3 %vm389_vm2, %v6406_v39  ;;  %v6475_v35 = vsel %vm1071_vm3, %v1203_v53, %v1205_v4  ;;  %v1208_v53 = vrot.slane %v6431_v47, 2  ;;  %v8191_v4 = vld [vmem:[#allocation85_spill] sm:$0xff] }
 0x231   :  { %v1490_v7 = vpop.f32.mrf.mxu2  ;;  %8189 = vst [vmem:[#allocation132_spill] sm:$0xff] %v6475_v35 }
 0x232   :  { %v1610_v34 = vadd.f32 %v1490_v7, %v988_v43  ;;  %v6470_v11 = vpop.f32.mrf.mxu1  ;;  %4052 = vmatmul.msk.f32.gmra.mxu0 %vm389_vm2, %v8188_v42  ;;  %v1207_v43 = vrot.slane %v6406_v39, 2  ;;  %v991_v7 = vadd.f32 %v6372_v5, %v8191_v4 }
 0x233   :  { %v1780_v9 = vpop.f32.mrf.mxu3 }
 0x234   :  { %v1900_v28 = vadd.f32 %v1780_v9, %v1610_v34 }
 0x235   :  { %3859 = vmatmul.msk.f32.gmra.mxu1 %vm389_vm2, %v6480_v31 }
 0x236   :  { %v6484_v63 = vadd.f32 %v2078_v26, %v1900_v28  ;;  %3921 = vmatmul.msk.f32.gmra.mxu2 %vm389_vm2, %v6475_v35  ;;  %v8192_v28 = vld [vmem:[#allocation36_spill] sm:$0xff]  ;;  %v6504_v35 = vld [vmem:[%s7824_s0 + $0x2e8] sm:$0xff] }
 0x237   :  { %v2081_v23 = vpop.f32.mrf.mxu0 }
 0x238   :  { %8190 = vst [vmem:[#allocation133_spill] sm:$0xff] %v6484_v63  ;;  %3987 = vmatmul.msk.f32.gmra.mxu3 %vm389_vm2, %v6431_v47  ;;  %v6499_v63 = vsel %vm1071_vm3, %v1207_v43, %v1208_v53  ;;  %v4380_v43 = vld [vmem:[%s7824_s0 + $0x2c8] sm:$0x3] }
 0x239   :  { %v1493_v34 = vpop.f32.mrf.mxu2  ;;  %v1210_v4 = vrot.slane %v4380_v43, 2  ;;  %v6529_v43 = vld [vmem:[%s7824_s0 + $0x2f0] sm:$0xff] }
 0x23a   :  { %v1611_v9 = vadd.f32 %v1493_v34, %v991_v7  ;;  %v6494_v42 = vpop.f32.mrf.mxu1  ;;  %4053 = vmatmul.msk.f32.gmra.mxu0 %vm389_vm2, %v8192_v28  ;;  %v994_v7 = vadd.f32 %v6396_v12, %v5458_v22 }
 0x23b   :  { %v1783_v26 = vpop.f32.mrf.mxu3 }
 0x23c   :  { %v1901_v39 = vadd.f32 %v1783_v26, %v1611_v9 }
 0x23d   :  { %3860 = vmatmul.msk.f32.gmra.mxu1 %vm389_vm2, %v6504_v35 }
 0x23e   :  { %v6508_v5 = vadd.f32 %v2081_v23, %v1901_v39  ;;  %3922 = vmatmul.msk.f32.gmra.mxu2 %vm389_vm2, %v6499_v63  ;;  %v8194_v23 = vld [vmem:[#allocation41_spill] sm:$0xff] }
 0x23f   :  { %v2084_v47 = vpop.f32.mrf.mxu0 }
 0x240   :  { %8193 = vst [vmem:[#allocation85_spill] sm:$0xff] %v6508_v5  ;;  %3988 = vmatmul.msk.f32.gmra.mxu3 %vm389_vm2, %v6455_v3  ;;  %v6524_v5 = vsel %vm1071_vm3, %v1208_v53, %v1210_v4  ;;  %v1213_v53 = vrot.slane %v6480_v31, 2  ;;  %v8197_v4 = vld [vmem:[#allocation90_spill] sm:$0xff] }
 0x241   :  { %v1496_v34 = vpop.f32.mrf.mxu2  ;;  %8195 = vst [vmem:[#allocation134_spill] sm:$0xff] %v6524_v5 }
 0x242   :  { %v1612_v9 = vadd.f32 %v1496_v34, %v994_v7  ;;  %v6519_v26 = vpop.f32.mrf.mxu1  ;;  %4054 = vmatmul.msk.f32.gmra.mxu0 %vm389_vm2, %v8194_v23  ;;  %v1212_v7 = vrot.slane %v6455_v3, 2  ;;  %v997_v34 = vadd.f32 %v6421_v10, %v8197_v4 }
 0x243   :  { %v1786_v39 = vpop.f32.mrf.mxu3 }
 0x244   :  { %v1902_v28 = vadd.f32 %v1786_v39, %v1612_v9 }
 0x245   :  { %3861 = vmatmul.msk.f32.gmra.mxu1 %vm389_vm2, %v6529_v43 }
 0x246   :  { %v6533_v22 = vadd.f32 %v2084_v47, %v1902_v28  ;;  %3923 = vmatmul.msk.f32.gmra.mxu2 %vm389_vm2, %v6524_v5  ;;  %v8198_v28 = vld [vmem:[#allocation47_spill] sm:$0xff]  ;;  %v6553_v5 = vld [vmem:[%s7824_s0 + $0x300] sm:$0xff] }
 0x247   :  { %v2087_v12 = vpop.f32.mrf.mxu0 }
 0x248   :  { %8196 = vst [vmem:[#allocation135_spill] sm:$0xff] %v6533_v22  ;;  %3989 = vmatmul.msk.f32.gmra.mxu3 %vm389_vm2, %v6480_v31  ;;  %v6548_v22 = vsel %vm1071_vm3, %v1212_v7, %v1213_v53  ;;  %v4383_v7 = vld [vmem:[%s7824_s0 + $0x2e0] sm:$0x3] }
 0x249   :  { %v1499_v9 = vpop.f32.mrf.mxu2  ;;  %8199 = vst [vmem:[#allocation90_spill] sm:$0xff] %v6548_v22  ;;  %v1215_v4 = vrot.slane %v4383_v7, 2  ;;  %v6578_v7 = vld [vmem:[%s7824_s0 + $0x308] sm:$0xff] }
 0x24a   :  { %v1613_v39 = vadd.f32 %v1499_v9, %v997_v34  ;;  %v6543_v23 = vpop.f32.mrf.mxu1  ;;  %4055 = vmatmul.msk.f32.gmra.mxu0 %vm389_vm2, %v8198_v28  ;;  %v1000_v34 = vadd.f32 %v6445_v21, %v5499_v41 }
 0x24b   :  { %v1789_v47 = vpop.f32.mrf.mxu3 }
 0x24c   :  { %v1903_v3 = vadd.f32 %v1789_v47, %v1613_v39 }
 0x24d   :  { %3862 = vmatmul.msk.f32.gmra.mxu1 %vm389_vm2, %v6553_v5 }
 0x24e   :  { %v6557_v10 = vadd.f32 %v2087_v12, %v1903_v3  ;;  %3924 = vmatmul.msk.f32.gmra.mxu2 %vm389_vm2, %v6548_v22  ;;  %v8201_v12 = vld [vmem:[#allocation52_spill] sm:$0xff] }
 0x24f   :  { %v2090_v31 = vpop.f32.mrf.mxu0 }
 0x250   :  { %8200 = vst [vmem:[#allocation136_spill] sm:$0xff] %v6557_v10  ;;  %3990 = vmatmul.msk.f32.gmra.mxu3 %vm389_vm2, %v6504_v35  ;;  %v6573_v10 = vsel %vm1071_vm3, %v1213_v53, %v1215_v4  ;;  %v1218_v53 = vrot.slane %v6529_v43, 2  ;;  %v8204_v4 = vld [vmem:[#allocation95_spill] sm:$0xff] }
 0x251   :  { %v1502_v9 = vpop.f32.mrf.mxu2  ;;  %8202 = vst [vmem:[#allocation137_spill] sm:$0xff] %v6573_v10 }
 0x252   :  { %v1614_v39 = vadd.f32 %v1502_v9, %v1000_v34  ;;  %v6568_v47 = vpop.f32.mrf.mxu1  ;;  %4056 = vmatmul.msk.f32.gmra.mxu0 %vm389_vm2, %v8201_v12  ;;  %v1217_v34 = vrot.slane %v6504_v35, 2  ;;  %v1003_v9 = vadd.f32 %v6470_v11, %v8204_v4 }
 0x253   :  { %v1792_v3 = vpop.f32.mrf.mxu3 }
 0x254   :  { %v1904_v28 = vadd.f32 %v1792_v3, %v1614_v39 }
 0x255   :  { %3863 = vmatmul.msk.f32.gmra.mxu1 %vm389_vm2, %v6578_v7 }
 0x256   :  { %v6582_v41 = vadd.f32 %v2090_v31, %v1904_v28  ;;  %3925 = vmatmul.msk.f32.gmra.mxu2 %vm389_vm2, %v6573_v10  ;;  %v8205_v28 = vld [vmem:[#allocation56_spill] sm:$0xff] }
 0x257   :  { %v2093_v21 = vpop.f32.mrf.mxu0  ;;  %v6602_v10 = vld [vmem:[%s7824_s0 + $0x318] sm:$0xff] }
 0x258   :  { %8203 = vst [vmem:[#allocation138_spill] sm:$0xff] %v6582_v41  ;;  %3991 = vmatmul.msk.f32.gmra.mxu3 %vm389_vm2, %v6529_v43  ;;  %v6597_v41 = vsel %vm1071_vm3, %v1217_v34, %v1218_v53  ;;  %v4386_v34 = vld [vmem:[%s7824_s0 + $0x2f8] sm:$0x3] }
 0x259   :  { %v1505_v39 = vpop.f32.mrf.mxu2  ;;  %8206 = vst [vmem:[#allocation95_spill] sm:$0xff] %v6597_v41  ;;  %v1220_v4 = vrot.slane %v4386_v34, 2  ;;  %v6627_v34 = vld [vmem:[%s7824_s0 + $0x320] sm:$0xff] }
 0x25a   :  { %v1615_v3 = vadd.f32 %v1505_v39, %v1003_v9  ;;  %v6592_v12 = vpop.f32.mrf.mxu1  ;;  %4057 = vmatmul.msk.f32.gmra.mxu0 %vm389_vm2, %v8205_v28  ;;  %v1006_v9 = vadd.f32 %v6494_v42, %v5540_v58 }
 0x25b   :  { %v1795_v31 = vpop.f32.mrf.mxu3  ;;  %v6622_v28 = vsel %vm1071_vm3, %v1218_v53, %v1220_v4  ;;  %v1223_v53 = vrot.slane %v6578_v7, 2  ;;  %v8211_v4 = vld [vmem:[#allocation100_spill] sm:$0xff] }
 0x25c   :  { %v1905_v35 = vadd.f32 %v1795_v31, %v1615_v3  ;;  %8209 = vst [vmem:[#allocation140_spill] sm:$0xff] %v6622_v28 }
 0x25d   :  { %3864 = vmatmul.msk.f32.gmra.mxu1 %vm389_vm2, %v6602_v10 }
 0x25e   :  { %v6606_v11 = vadd.f32 %v2093_v21, %v1905_v35  ;;  %3926 = vmatmul.msk.f32.gmra.mxu2 %vm389_vm2, %v6597_v41  ;;  %v8208_v21 = vld [vmem:[#allocation59_spill] sm:$0xff] }
 0x25f   :  { %v2096_v43 = vpop.f32.mrf.mxu0 }
 0x260   :  { %8207 = vst [vmem:[#allocation139_spill] sm:$0xff] %v6606_v11  ;;  %3992 = vmatmul.msk.f32.gmra.mxu3 %vm389_vm2, %v6553_v5 }
 0x261   :  { %v1508_v39 = vpop.f32.mrf.mxu2 }
 0x262   :  { %v1616_v3 = vadd.f32 %v1508_v39, %v1006_v9  ;;  %v6617_v31 = vpop.f32.mrf.mxu1  ;;  %4058 = vmatmul.msk.f32.gmra.mxu0 %vm389_vm2, %v8208_v21  ;;  %v1222_v9 = vrot.slane %v6553_v5, 2  ;;  %v1009_v39 = vadd.f32 %v6519_v26, %v8211_v4 }
 0x263   :  { %v1798_v35 = vpop.f32.mrf.mxu3 }
 0x264   :  { %v1906_v11 = vadd.f32 %v1798_v35, %v1616_v3 }
 0x265   :  { %3865 = vmatmul.msk.f32.gmra.mxu1 %vm389_vm2, %v6627_v34 }
 0x266   :  { %v6631_v58 = vadd.f32 %v2096_v43, %v1906_v11  ;;  %3927 = vmatmul.msk.f32.gmra.mxu2 %vm389_vm2, %v6622_v28  ;;  %v8212_v11 = vld [vmem:[#allocation62_spill] sm:$0xff]  ;;  %v8214_v28 = vld [vmem:[#allocation75_spill] sm:$0xff] }
 0x267   :  { %v2099_v42 = vpop.f32.mrf.mxu0 }
 0x268   :  { %8210 = vst [vmem:[#allocation141_spill] sm:$0xff] %v6631_v58  ;;  %3993 = vmatmul.msk.f32.gmra.mxu3 %vm389_vm2, %v6578_v7  ;;  %v6646_v58 = vsel %vm1071_vm3, %v1222_v9, %v1223_v53  ;;  %v4388_v7 = vld [vmem:[%s7824_s0 + $0x310] sm:$0x3] }
 0x269   :  { %v1511_v3 = vpop.f32.mrf.mxu2  ;;  %8213 = vst [vmem:[#allocation100_spill] sm:$0xff] %v6646_v58  ;;  %v1225_v4 = vrot.slane %v4388_v7, 2 }
 0x26a   :  { %v1617_v35 = vadd.f32 %v1511_v3, %v1009_v39  ;;  %v6641_v21 = vpop.f32.mrf.mxu1  ;;  %4059 = vmatmul.msk.f32.gmra.mxu0 %vm389_vm2, %v8212_v11  ;;  %v8216_v39 = vld [vmem:[#allocation103_spill] sm:$0xff] }
 0x26b   :  { %v1801_v43 = vpop.f32.mrf.mxu3  ;;  %v1012_v3 = vadd.f32 %v6543_v23, %v8216_v39  ;;  %v1227_v39 = vrot.slane %v6602_v10, 2 }
 0x26c   :  { %v1907_v5 = vadd.f32 %v1801_v43, %v1617_v35 }
 0x26d   :  { %4066 = vmatmul.msk.f32.vlgmr.msra.gmra.mxu1 %vm389_vm2, %v8214_v28 }
 0x26e   :  { %v6650_v41 = vadd.f32 %v2099_v42, %v1907_v5  ;;  %3928 = vmatmul.msk.f32.gmra.mxu2 %vm389_vm2, %v6646_v58  ;;  %v8217_v42 = vld [vmem:[#allocation65_spill] sm:$0xff]  ;;  %v6666_v5 = vsel %vm1071_vm3, %v1223_v53, %v1225_v4  ;;  %v8222_v4 = vld [vmem:[#allocation68_spill] sm:$0xff] }
 0x26f   :  { %v2102_v26 = vpop.f32.mrf.mxu0  ;;  %8218 = vst [vmem:[#allocation103_spill] sm:$0xff] %v6666_v5  ;;  %v8227_v58 = vld [vmem:[#allocation109_spill] sm:$0xff] }
 0x270   :  { %8215 = vst [vmem:[#allocation75_spill] sm:$0xff] %v6650_v41  ;;  %3994 = vmatmul.msk.f32.gmra.mxu3 %vm389_vm2, %v6602_v10  ;;  %v8219_v41 = vld [vmem:[#allocation77_spill] sm:$0xff]  ;;  %v123_v10 = vld [vmem:[%s7824_s0 + $0x330] sm:$0xff] }
 0x271   :  { %v1514_v9 = vpop.f32.mrf.mxu2 }
 0x272   :  { %v1618_v35 = vadd.f32 %v1514_v9, %v1012_v3  ;;  %v6661_v28 = vpop.f32.mrf.mxu1  ;;  %4060 = vmatmul.msk.f32.gmra.mxu0 %vm389_vm2, %v8217_v42  ;;  %v1228_v3 = vrot.slane %v6627_v34, 2  ;;  %v8221_v9 = vld [vmem:[#allocation106_spill] sm:$0xff] }
 0x273   :  { %v1804_v43 = vpop.f32.mrf.mxu3  ;;  %v1015_v42 = vadd.f32 %v6568_v47, %v8221_v9 }
 0x274   :  { %v1908_v11 = vadd.f32 %v1804_v43, %v1618_v35  ;;  %v6691_v47 = vsel %vm1071_vm3, %v1227_v39, %v1228_v3 }
 0x275   :  { %4067 = vmatmul.msk.f32.gmra.mxu1 %vm389_vm2, %v8219_v41  ;;  %v124_v41 = vld [vmem:[%s7824_s0 + $0x338] sm:$0xff]  ;;  %8223 = vst [vmem:[#allocation106_spill] sm:$0xff] %v6691_v47 }
 0x276   :  { %v6670_v7 = vadd.f32 %v2102_v26, %v1908_v11  ;;  %3929 = vmatmul.msk.f32.gmra.mxu2 %vm389_vm2, %v6666_v5  ;;  %v1936_v43 = vrot.slane %v124_v41, 1 }
 0x277   :  { %v2105_v23 = vpop.f32.mrf.mxu0 }
 0x278   :  { %8220 = vst [vmem:[#allocation77_spill] sm:$0xff] %v6670_v7  ;;  %3995 = vmatmul.msk.f32.gmra.mxu3 %vm389_vm2, %v6627_v34  ;;  %v1935_v34 = vrot.slane %v123_v10, 1  ;;  %v8224_v7 = vld [vmem:[#allocation79_spill] sm:$0xff] }
 0x279   :  { %v1517_v53 = vpop.f32.mrf.mxu2 }
 0x27a   :  { %v1619_v11 = vadd.f32 %v1517_v53, %v1015_v42  ;;  %v6683_v26 = vpop.f32.mrf.mxu1  ;;  %4061 = vmatmul.msk.f32.gmra.mxu0 %vm389_vm2, %v8222_v4  ;;  %v4389_v4 = vld [vmem:[%s7824_s0 + $0x328] sm:$0x3]  ;;  %v6703_v39 = vsel %vm226_vm1, %v1935_v34, %v1936_v43 }
 0x27b   :  { %v1807_v35 = vpop.f32.mrf.mxu3  ;;  %v1230_v5 = vrot.slane %v4389_v4, 2  ;;  %8226 = vst [vmem:[#allocation142_spill] sm:$0xff] %v6703_v39 }
 0x27c   :  { %v1909_v9 = vadd.f32 %v1807_v35, %v1619_v11  ;;  %v1018_v11 = vadd.f32 %v6592_v12, %v8227_v58  ;;  %v8228_v12 = vld [vmem:[#allocation82_spill] sm:$0xff] }
 0x27d   :  { %4068 = vmatmul.msk.f32.gmra.mxu1 %vm389_vm2, %v8224_v7  ;;  %v6716_v34 = vsel %vm1071_vm3, %v1228_v3, %v1230_v5 }
 0x27e   :  { %v6695_v42 = vadd.f32 %v2105_v23, %v1909_v9  ;;  %3930 = vmatmul.msk.f32.gmra.mxu2 %vm389_vm2, %v6691_v47  ;;  %v125_v23 = vld [vmem:[%s7824_s0 + $0x340] sm:$0x3] }
 0x27f   :  { %v2108_v53 = vpop.f32.mrf.mxu0  ;;  %v1938_v47 = vrot.slane %v125_v23, 1 }
 0x280   :  { %8225 = vst [vmem:[#allocation79_spill] sm:$0xff] %v6695_v42  ;;  %3996 = vmatmul.msk.f32.gmra.mxu3 %vm389_vm2, %v123_v10 }
 0x281   :  { %v1520_v35 = vpop.f32.mrf.mxu2 }
 0x282   :  { %v1620_v9 = vadd.f32 %v1520_v35, %v1018_v11  ;;  %v6711_v42 = vpop.f32.mrf.mxu1  ;;  %4062 = vmatmul.msk.f32.gmra.mxu0 %vm389_vm2, %v6703_v39  ;;  %v6725_v11 = vsel %vm226_vm1, %v1936_v43, %v1938_v47  ;;  %v8230_v35 = vld [vmem:[#allocation71_spill] sm:$0xff] }
 0x283   :  { %v1810_v4 = vpop.f32.mrf.mxu3  ;;  %8229 = vst [vmem:[#allocation109_spill] sm:$0xff] %v6725_v11  ;;  %v1021_v39 = vadd.f32 %v6617_v31, %v8230_v35  ;;  %v4390_v47 = vld [vmem:[%s7824_s0 + $0x30] sm:$0xff] }
 0x284   :  { %v1910_v22 = vadd.f32 %v1810_v4, %v1620_v9  ;;  %v8231_v9 = vld [vmem:[#allocation84_spill] sm:$0xff] }
 0x285   :  { %4069 = vmatmul.msk.f32.gmra.mxu1 %vm389_vm2, %v8228_v12 }
 0x286   :  { %v6720_v58 = vadd.f32 %v2108_v53, %v1910_v22  ;;  %3931 = vmatmul.msk.f32.gmra.mxu2 %vm389_vm2, %v6716_v34 }
 0x287   :  { %v2111_v10 = vpop.f32.mrf.mxu0 }
 0x288   :  { %3997 = vmatmul.msk.f32.gmra.mxu3 %vm389_vm2, %v124_v41  ;;  %v8232_v41 = vld [vmem:[#allocation73_spill] sm:$0xff] }
 0x289   :  { %v1523_v5 = vpop.f32.mrf.mxu2  ;;  %v1024_v43 = vadd.f32 %v6641_v21, %v8232_v41  ;;  %v4391_v21 = vld [vmem:[%s7824_s0 + $0x38] sm:$0xff]  ;;  %v8236_v41 = vld [vmem:[#allocation74_spill] sm:$0xff] }
 0x28a   :  { %v1621_v3 = vadd.f32 %v1523_v5, %v1021_v39  ;;  %v1035_v23 = vpop.f32.mrf.mxu1  ;;  %4063 = vmatmul.msk.f32.gmra.mxu0 %vm389_vm2, %v6725_v11  ;;  %v8233_v39 = vld [vmem:[#allocation16_spill] sm:$0xff] }
 0x28b   :  { %v1813_v22 = vpop.f32.mrf.mxu3 }
 0x28c   :  { %v1911_v53 = vadd.f32 %v1813_v22, %v1621_v3 }
 0x28d   :  { %4070 = vmatmul.msk.f32.gmra.mxu1 %vm389_vm2, %v8231_v9 }
 0x28e   :  { %v6734_v4 = vadd.f32 %v2111_v10, %v1911_v53  ;;  %4132 = vmatmul.msk.f32.vlgmr.msra.gmra.mxu2 %vm389_vm2, %v4390_v47  ;;  %v8234_v53 = vld [vmem:[#allocation87_spill] sm:$0xff] }
 0x28f   :  { %v2114_v31 = vpop.f32.mrf.mxu0 }
 0x290   :  { %4198 = vmatmul.msk.f32.vlgmr.msra.gmra.mxu3 %vm389_vm2, %v8233_v39  ;;  %v8237_v39 = vld [vmem:[#allocation21_spill] sm:$0xff] }
 0x291   :  { %v1526_v35 = vpop.f32.mrf.mxu2 }
 0x292   :  { %v1622_v5 = vadd.f32 %v1526_v35, %v1024_v43  ;;  %v1038_v3 = vpop.f32.mrf.mxu1  ;;  %4264 = vmatmul.msk.f32.vlgmr.msra.gmra.mxu0 %vm389_vm2, %v8224_v7  ;;  %v1027_v43 = vadd.f32 %v6661_v28, %v8236_v41  ;;  %v4392_v28 = vld [vmem:[%s7824_s0 + $0x48] sm:$0xff]  ;;  %v8240_v41 = vld [vmem:[#allocation76_spill] sm:$0xff] }
 0x293   :  { %v1816_v10 = vpop.f32.mrf.mxu3 }
 0x294   :  { %v1912_v22 = vadd.f32 %v1816_v10, %v1622_v5 }
 0x295   :  { %4071 = vmatmul.msk.f32.gmra.mxu1 %vm389_vm2, %v8234_v53 }
 0x296   :  { %v6748_v11 = vadd.f32 %v2114_v31, %v1912_v22  ;;  %4133 = vmatmul.msk.f32.gmra.mxu2 %vm389_vm2, %v4391_v21  ;;  %v8238_v22 = vld [vmem:[#allocation89_spill] sm:$0xff] }
 0x297   :  { %v2117_v47 = vpop.f32.mrf.mxu0 }
 0x298   :  { %8235 = vst [vmem:[#allocation82_spill] sm:$0xff] %v6748_v11  ;;  %4199 = vmatmul.msk.f32.gmra.mxu3 %vm389_vm2, %v8237_v39  ;;  %v8241_v39 = vld [vmem:[#allocation26_spill] sm:$0xff] }
 0x299   :  { %v1529_v7 = vpop.f32.mrf.mxu2 }
 0x29a   :  { %v1623_v35 = vadd.f32 %v1529_v7, %v1027_v43  ;;  %v1041_v5 = vpop.f32.mrf.mxu1  ;;  %4265 = vmatmul.msk.f32.gmra.mxu0 %vm389_vm2, %v8228_v12  ;;  %v1030_v43 = vadd.f32 %v6683_v26, %v8240_v41  ;;  %v4393_v26 = vld [vmem:[%s7824_s0 + $0x50] sm:$0xff] }
 0x29b   :  { %v1819_v31 = vpop.f32.mrf.mxu3  ;;  %v8244_v41 = vld [vmem:[#allocation78_spill] sm:$0xff] }
 0x29c   :  { %v1913_v10 = vadd.f32 %v1819_v31, %v1623_v35 }
 0x29d   :  { %4072 = vmatmul.msk.f32.gmra.mxu1 %vm389_vm2, %v8238_v22 }
 0x29e   :  { %v6762_v11 = vadd.f32 %v2117_v47, %v1913_v10  ;;  %4134 = vmatmul.msk.f32.gmra.mxu2 %vm389_vm2, %v4392_v28  ;;  %v8242_v10 = vld [vmem:[#allocation92_spill] sm:$0xff] }
 0x29f   :  { %v2120_v21 = vpop.f32.mrf.mxu0 }
 0x2a0   :  { %8239 = vst [vmem:[#allocation71_spill] sm:$0xff] %v6762_v11  ;;  %4200 = vmatmul.msk.f32.gmra.mxu3 %vm389_vm2, %v8241_v39  ;;  %v8245_v39 = vld [vmem:[#allocation31_spill] sm:$0xff] }
 0x2a1   :  { %v1532_v12 = vpop.f32.mrf.mxu2 }
 0x2a2   :  { %v1624_v7 = vadd.f32 %v1532_v12, %v1030_v43  ;;  %v1044_v35 = vpop.f32.mrf.mxu1  ;;  %4266 = vmatmul.msk.f32.gmra.mxu0 %vm389_vm2, %v8231_v9  ;;  %v1033_v43 = vadd.f32 %v6711_v42, %v8244_v41  ;;  %v4394_v42 = vld [vmem:[%s7824_s0 + $0x60] sm:$0xff] }
 0x2a3   :  { %v1822_v47 = vpop.f32.mrf.mxu3  ;;  %v8248_v41 = vld [vmem:[#allocation81_spill] sm:$0xff] }
 0x2a4   :  { %v1914_v31 = vadd.f32 %v1822_v47, %v1624_v7 }
 0x2a5   :  { %4073 = vmatmul.msk.f32.gmra.mxu1 %vm389_vm2, %v8242_v10 }
 0x2a6   :  { %v6776_v11 = vadd.f32 %v2120_v21, %v1914_v31  ;;  %4135 = vmatmul.msk.f32.gmra.mxu2 %vm389_vm2, %v4393_v26  ;;  %v8246_v31 = vld [vmem:[#allocation94_spill] sm:$0xff] }
 0x2a7   :  { %v2123_v28 = vpop.f32.mrf.mxu0 }
 0x2a8   :  { %8243 = vst [vmem:[#allocation84_spill] sm:$0xff] %v6776_v11  ;;  %4201 = vmatmul.msk.f32.gmra.mxu3 %vm389_vm2, %v8245_v39  ;;  %v8249_v39 = vld [vmem:[#allocation37_spill] sm:$0xff] }
 0x2a9   :  { %v1535_v9 = vpop.f32.mrf.mxu2 }
 0x2aa   :  { %v1625_v12 = vadd.f32 %v1535_v9, %v1033_v43  ;;  %v1047_v7 = vpop.f32.mrf.mxu1  ;;  %4267 = vmatmul.msk.f32.gmra.mxu0 %vm389_vm2, %v8234_v53  ;;  %v1036_v43 = vadd.f32 %v1035_v23, %v8248_v41  ;;  %v4395_v23 = vld [vmem:[%s7824_s0 + $0x68] sm:$0xff]  ;;  %v8252_v41 = vld [vmem:[#allocation83_spill] sm:$0xff] }
 0x2ab   :  { %v1825_v21 = vpop.f32.mrf.mxu3 }
 0x2ac   :  { %v1915_v47 = vadd.f32 %v1825_v21, %v1625_v12 }
 0x2ad   :  { %4074 = vmatmul.msk.f32.gmra.mxu1 %vm389_vm2, %v8246_v31 }
 0x2ae   :  { %v6790_v11 = vadd.f32 %v2123_v28, %v1915_v47  ;;  %4136 = vmatmul.msk.f32.gmra.mxu2 %vm389_vm2, %v4394_v42  ;;  %v8250_v47 = vld [vmem:[#allocation97_spill] sm:$0xff] }
 0x2af   :  { %v2126_v26 = vpop.f32.mrf.mxu0 }
 0x2b0   :  { %8247 = vst [vmem:[#allocation73_spill] sm:$0xff] %v6790_v11  ;;  %4202 = vmatmul.msk.f32.gmra.mxu3 %vm389_vm2, %v8249_v39  ;;  %v8253_v39 = vld [vmem:[#allocation42_spill] sm:$0xff] }
 0x2b1   :  { %v1538_v53 = vpop.f32.mrf.mxu2 }
 0x2b2   :  { %v1626_v9 = vadd.f32 %v1538_v53, %v1036_v43  ;;  %v1050_v12 = vpop.f32.mrf.mxu1  ;;  %4268 = vmatmul.msk.f32.gmra.mxu0 %vm389_vm2, %v8238_v22  ;;  %v1039_v43 = vadd.f32 %v1038_v3, %v8252_v41  ;;  %v4396_v3 = vld [vmem:[%s7824_s0 + $0x78] sm:$0xff]  ;;  %v8256_v41 = vld [vmem:[#allocation86_spill] sm:$0xff] }
 0x2b3   :  { %v1828_v28 = vpop.f32.mrf.mxu3 }
 0x2b4   :  { %v1916_v21 = vadd.f32 %v1828_v28, %v1626_v9 }
 0x2b5   :  { %4075 = vmatmul.msk.f32.gmra.mxu1 %vm389_vm2, %v8250_v47 }
 0x2b6   :  { %v6803_v11 = vadd.f32 %v2126_v26, %v1916_v21  ;;  %4137 = vmatmul.msk.f32.gmra.mxu2 %vm389_vm2, %v4395_v23  ;;  %v8254_v21 = vld [vmem:[#allocation99_spill] sm:$0xff] }
 0x2b7   :  { %v2129_v42 = vpop.f32.mrf.mxu0 }
 0x2b8   :  { %8251 = vst [vmem:[#allocation16_spill] sm:$0xff] %v6803_v11  ;;  %4203 = vmatmul.msk.f32.gmra.mxu3 %vm389_vm2, %v8253_v39  ;;  %v8257_v39 = vld [vmem:[#allocation48_spill] sm:$0xff] }
 0x2b9   :  { %v1541_v22 = vpop.f32.mrf.mxu2 }
 0x2ba   :  { %v1627_v53 = vadd.f32 %v1541_v22, %v1039_v43  ;;  %v1053_v9 = vpop.f32.mrf.mxu1  ;;  %4269 = vmatmul.msk.f32.gmra.mxu0 %vm389_vm2, %v8242_v10  ;;  %v1042_v43 = vadd.f32 %v1041_v5, %v8256_v41  ;;  %v4397_v5 = vld [vmem:[%s7824_s0 + $0x80] sm:$0xff] }
 0x2bb   :  { %v1831_v26 = vpop.f32.mrf.mxu3  ;;  %v8260_v41 = vld [vmem:[#allocation88_spill] sm:$0xff] }
 0x2bc   :  { %v1917_v28 = vadd.f32 %v1831_v26, %v1627_v53 }
 0x2bd   :  { %4076 = vmatmul.msk.f32.gmra.mxu1 %vm389_vm2, %v8254_v21 }
 0x2be   :  { %v6816_v11 = vadd.f32 %v2129_v42, %v1917_v28  ;;  %4138 = vmatmul.msk.f32.gmra.mxu2 %vm389_vm2, %v4396_v3  ;;  %v8258_v28 = vld [vmem:[#allocation102_spill] sm:$0xff] }
 0x2bf   :  { %v2132_v23 = vpop.f32.mrf.mxu0 }
 0x2c0   :  { %8255 = vst [vmem:[#allocation87_spill] sm:$0xff] %v6816_v11  ;;  %4204 = vmatmul.msk.f32.gmra.mxu3 %vm389_vm2, %v8257_v39  ;;  %v8261_v39 = vld [vmem:[#allocation53_spill] sm:$0xff] }
 0x2c1   :  { %v1544_v10 = vpop.f32.mrf.mxu2 }
 0x2c2   :  { %v1628_v22 = vadd.f32 %v1544_v10, %v1042_v43  ;;  %v1056_v53 = vpop.f32.mrf.mxu1  ;;  %4270 = vmatmul.msk.f32.gmra.mxu0 %vm389_vm2, %v8246_v31  ;;  %v1045_v43 = vadd.f32 %v1044_v35, %v8260_v41  ;;  %v4398_v35 = vld [vmem:[%s7824_s0 + $0x90] sm:$0xff] }
 0x2c3   :  { %v1834_v42 = vpop.f32.mrf.mxu3  ;;  %v8264_v41 = vld [vmem:[#allocation91_spill] sm:$0xff] }
 0x2c4   :  { %v1918_v26 = vadd.f32 %v1834_v42, %v1628_v22 }
 0x2c5   :  { %4077 = vmatmul.msk.f32.gmra.mxu1 %vm389_vm2, %v8258_v28 }
 0x2c6   :  { %v6829_v11 = vadd.f32 %v2132_v23, %v1918_v26  ;;  %4139 = vmatmul.msk.f32.gmra.mxu2 %vm389_vm2, %v4397_v5  ;;  %v8262_v26 = vld [vmem:[#allocation105_spill] sm:$0xff] }
 0x2c7   :  { %v2135_v3 = vpop.f32.mrf.mxu0 }
 0x2c8   :  { %8259 = vst [vmem:[#allocation74_spill] sm:$0xff] %v6829_v11  ;;  %4205 = vmatmul.msk.f32.gmra.mxu3 %vm389_vm2, %v8261_v39  ;;  %v8265_v39 = vld [vmem:[#allocation57_spill] sm:$0xff] }
 0x2c9   :  { %v1547_v31 = vpop.f32.mrf.mxu2 }
 0x2ca   :  { %v1629_v10 = vadd.f32 %v1547_v31, %v1045_v43  ;;  %v1059_v22 = vpop.f32.mrf.mxu1  ;;  %4271 = vmatmul.msk.f32.gmra.mxu0 %vm389_vm2, %v8250_v47  ;;  %v1048_v43 = vadd.f32 %v1047_v7, %v8264_v41  ;;  %v4399_v7 = vld [vmem:[%s7824_s0 + $0x98] sm:$0xff]  ;;  %v8268_v41 = vld [vmem:[#allocation93_spill] sm:$0xff] }
 0x2cb   :  { %v1837_v23 = vpop.f32.mrf.mxu3 }
 0x2cc   :  { %v1919_v42 = vadd.f32 %v1837_v23, %v1629_v10 }
 0x2cd   :  { %4078 = vmatmul.msk.f32.gmra.mxu1 %vm389_vm2, %v8262_v26 }
 0x2ce   :  { %v6842_v11 = vadd.f32 %v2135_v3, %v1919_v42  ;;  %4140 = vmatmul.msk.f32.gmra.mxu2 %vm389_vm2, %v4398_v35  ;;  %v8266_v42 = vld [vmem:[#allocation108_spill] sm:$0xff] }
 0x2cf   :  { %v2138_v5 = vpop.f32.mrf.mxu0 }
 0x2d0   :  { %8263 = vst [vmem:[#allocation21_spill] sm:$0xff] %v6842_v11  ;;  %4206 = vmatmul.msk.f32.gmra.mxu3 %vm389_vm2, %v8265_v39  ;;  %v8269_v39 = vld [vmem:[#allocation60_spill] sm:$0xff] }
 0x2d1   :  { %v1550_v47 = vpop.f32.mrf.mxu2 }
 0x2d2   :  { %v1630_v31 = vadd.f32 %v1550_v47, %v1048_v43  ;;  %v1062_v10 = vpop.f32.mrf.mxu1  ;;  %4272 = vmatmul.msk.f32.gmra.mxu0 %vm389_vm2, %v8254_v21  ;;  %v1051_v43 = vadd.f32 %v1050_v12, %v8268_v41  ;;  %v4400_v12 = vld [vmem:[%s7824_s0 + $0xa8] sm:$0xff]  ;;  %v8271_v41 = vld [vmem:[#allocation96_spill] sm:$0xff] }
 0x2d3   :  { %v1840_v3 = vpop.f32.mrf.mxu3 }
 0x2d4   :  { %v1920_v23 = vadd.f32 %v1840_v3, %v1630_v31 }
 0x2d5   :  { %4079 = vmatmul.msk.f32.gmra.mxu1 %vm389_vm2, %v8266_v42 }
 0x2d6   :  { %v6855_v11 = vadd.f32 %v2138_v5, %v1920_v23  ;;  %4141 = vmatmul.msk.f32.gmra.mxu2 %vm389_vm2, %v4399_v7  ;;  %v8270_v23 = vld [vmem:[#allocation111_spill] sm:$0xff] }
 0x2d7   :  { %v2141_v35 = vpop.f32.mrf.mxu0 }
 0x2d8   :  { %8267 = vst [vmem:[#allocation89_spill] sm:$0xff] %v6855_v11  ;;  %4207 = vmatmul.msk.f32.gmra.mxu3 %vm389_vm2, %v8269_v39  ;;  %v8272_v39 = vld [vmem:[#allocation63_spill] sm:$0xff] }
 0x2d9   :  { %v1553_v21 = vpop.f32.mrf.mxu2 }
 0x2da   :  { %v1631_v47 = vadd.f32 %v1553_v21, %v1051_v43  ;;  %v1065_v31 = vpop.f32.mrf.mxu1  ;;  %4273 = vmatmul.msk.f32.gmra.mxu0 %vm389_vm2, %v8258_v28  ;;  %v1054_v43 = vadd.f32 %v1053_v9, %v8271_v41  ;;  %v4401_v9 = vld [vmem:[%s7824_s0 + $0xb0] sm:$0xff] }
 0x2db   :  { %v1843_v5 = vpop.f32.mrf.mxu3  ;;  %v8273_v41 = vld [vmem:[#allocation98_spill] sm:$0xff] }
 0x2dc   :  { %v1921_v3 = vadd.f32 %v1843_v5, %v1631_v47 }
 0x2dd   :  { %4080 = vmatmul.msk.f32.gmra.mxu1 %vm389_vm2, %v8270_v23 }
 0x2de   :  { %v6868_v11 = vadd.f32 %v2141_v35, %v1921_v3  ;;  %4142 = vmatmul.msk.f32.gmra.mxu2 %vm389_vm2, %v4400_v12 }
 0x2df   :  { %v2144_v7 = vpop.f32.mrf.mxu0 }
 0x2e0   :  { %4208 = vmatmul.msk.f32.gmra.mxu3 %vm389_vm2, %v8272_v39  ;;  %v8274_v39 = vld [vmem:[#allocation66_spill] sm:$0xff] }
 0x2e1   :  { %v1556_v28 = vpop.f32.mrf.mxu2 }
 0x2e2   :  { %v1632_v21 = vadd.f32 %v1556_v28, %v1054_v43  ;;  %v1068_v47 = vpop.f32.mrf.mxu1  ;;  %4274 = vmatmul.msk.f32.gmra.mxu0 %vm389_vm2, %v8262_v26  ;;  %v1057_v43 = vadd.f32 %v1056_v53, %v8273_v41  ;;  %v4402_v53 = vld [vmem:[%s7824_s0 + $0xc0] sm:$0xff] }
 0x2e3   :  { %v1846_v35 = vpop.f32.mrf.mxu3  ;;  %v8275_v41 = vld [vmem:[#allocation101_spill] sm:$0xff] }
 0x2e4   :  { %v1922_v5 = vadd.f32 %v1846_v35, %v1632_v21 }
 0x2e5   :  { %4081 = vmatmul.msk.f32.gmra.mxu1 %vm389_vm2, %v5645_v27 }
 0x2e6   :  { %v6881_v3 = vadd.f32 %v2144_v7, %v1922_v5  ;;  %4143 = vmatmul.msk.f32.gmra.mxu2 %vm389_vm2, %v4401_v9 }
 0x2e7   :  { %v2147_v12 = vpop.f32.mrf.mxu0 }
 0x2e8   :  { %4209 = vmatmul.msk.f32.gmra.mxu3 %vm389_vm2, %v8274_v39  ;;  %v8276_v39 = vld [vmem:[#allocation69_spill] sm:$0xff] }
 0x2e9   :  { %v1559_v26 = vpop.f32.mrf.mxu2 }
 0x2ea   :  { %v1633_v28 = vadd.f32 %v1559_v26, %v1057_v43  ;;  %v6890_v21 = vpop.f32.mrf.mxu1  ;;  %4275 = vmatmul.msk.f32.gmra.mxu0 %vm389_vm2, %v8266_v42  ;;  %v1060_v43 = vadd.f32 %v1059_v22, %v8275_v41  ;;  %v4403_v22 = vld [vmem:[%s7824_s0 + $0xc8] sm:$0xff]  ;;  %v8277_v41 = vld [vmem:[#allocation104_spill] sm:$0xff] }
 0x2eb   :  { %v1849_v7 = vpop.f32.mrf.mxu3 }
 0x2ec   :  { %v1923_v35 = vadd.f32 %v1849_v7, %v1633_v28 }
 0x2ed   :  { %4082 = vmatmul.msk.f32.gmra.mxu1 %vm389_vm2, %v5663_v62 }
 0x2ee   :  { %v6896_v5 = vadd.f32 %v2147_v12, %v1923_v35  ;;  %4144 = vmatmul.msk.f32.gmra.mxu2 %vm389_vm2, %v4402_v53 }
 0x2ef   :  { %v2150_v9 = vpop.f32.mrf.mxu0 }
 0x2f0   :  { %4210 = vmatmul.msk.f32.gmra.mxu3 %vm389_vm2, %v8276_v39  ;;  %v8278_v39 = vld [vmem:[#allocation5_spill] sm:$0xff] }
 0x2f1   :  { %v1562_v42 = vpop.f32.mrf.mxu2 }
 0x2f2   :  { %v1634_v26 = vadd.f32 %v1562_v42, %v1060_v43  ;;  %v6905_v28 = vpop.f32.mrf.mxu1  ;;  %4276 = vmatmul.msk.f32.gmra.mxu0 %vm389_vm2, %v8270_v23  ;;  %v1063_v43 = vadd.f32 %v1062_v10, %v8277_v41  ;;  %v4404_v10 = vld [vmem:[%s7824_s0 + $0xd8] sm:$0xff] }
 0x2f3   :  { %v1852_v12 = vpop.f32.mrf.mxu3  ;;  %v8279_v41 = vld [vmem:[#allocation107_spill] sm:$0xff] }
 0x2f4   :  { %v1924_v7 = vadd.f32 %v1852_v12, %v1634_v26 }
 0x2f5   :  { %4083 = vmatmul.msk.f32.gmra.mxu1 %vm389_vm2, %v5680_v24 }
 0x2f6   :  { %v6911_v35 = vadd.f32 %v2150_v9, %v1924_v7  ;;  %4145 = vmatmul.msk.f32.gmra.mxu2 %vm389_vm2, %v4403_v22 }
 0x2f7   :  { %v2153_v53 = vpop.f32.mrf.mxu0 }
 0x2f8   :  { %4211 = vmatmul.msk.f32.gmra.mxu3 %vm389_vm2, %v8278_v39  ;;  %v8280_v39 = vld [vmem:[#allocation8_spill] sm:$0xff] }
 0x2f9   :  { %v1565_v23 = vpop.f32.mrf.mxu2 }
 0x2fa   :  { %v1635_v42 = vadd.f32 %v1565_v23, %v1063_v43  ;;  %v6920_v26 = vpop.f32.mrf.mxu1  ;;  %4277 = vmatmul.msk.f32.gmra.mxu0 %vm389_vm2, %v5645_v27  ;;  %v1066_v43 = vadd.f32 %v1065_v31, %v8279_v41  ;;  %v4405_v31 = vld [vmem:[%s7824_s0 + $0xe0] sm:$0xff]  ;;  %v8281_v41 = vld [vmem:[#allocation110_spill] sm:$0xff] }
 0x2fb   :  { %v1855_v9 = vpop.f32.mrf.mxu3 }
 0x2fc   :  { %v1925_v12 = vadd.f32 %v1855_v9, %v1635_v42 }
 0x2fd   :  { %4084 = vmatmul.msk.f32.gmra.mxu1 %vm389_vm2, %v5699_v40 }
 0x2fe   :  { %v6926_v7 = vadd.f32 %v2153_v53, %v1925_v12  ;;  %4146 = vmatmul.msk.f32.gmra.mxu2 %vm389_vm2, %v4404_v10 }
 0x2ff   :  { %v2156_v22 = vpop.f32.mrf.mxu0 }
 0x300   :  { %4212 = vmatmul.msk.f32.gmra.mxu3 %vm389_vm2, %v8280_v39 }
 0x301   :  { %v1568_v27 = vpop.f32.mrf.mxu2 }
 0x302   :  { %v1636_v23 = vadd.f32 %v1568_v27, %v1066_v43  ;;  %v6935_v42 = vpop.f32.mrf.mxu1  ;;  %4278 = vmatmul.msk.f32.gmra.mxu0 %vm389_vm2, %v5663_v62  ;;  %v1069_v43 = vadd.f32 %v1068_v47, %v8281_v41 }
 0x303   :  { %v1858_v53 = vpop.f32.mrf.mxu3 }
 0x304   :  { %v1926_v9 = vadd.f32 %v1858_v53, %v1636_v23  ;;  %v3686_v53 = vld [vmem:[%s7827_s3 + $0x38] sm:$0xff] }
 0x305   :  { %4085 = vmatmul.msk.f32.gmra.mxu1 %vm389_vm2, %v5717_v44 }
 0x306   :  { %v6941_v12 = vadd.f32 %v2156_v22, %v1926_v9  ;;  %4147 = vmatmul.msk.f32.gmra.mxu2 %vm389_vm2, %v4405_v31  ;;  %3705 = vmatpush.msrb.mxu1 %v3686_v53 }
 0x307   :  { %v2159_v10 = vpop.f32.mrf.mxu0 }
 0x308   :  { %4213 = vmatmul.msk.f32.gmra.mxu3 %vm389_vm2, %v4659_v51  ;;  %v4406_v51 = vld [vmem:[%s7824_s0 + $0xf0] sm:$0xff] }
 0x309   :  { %v1571_v62 = vpop.f32.mrf.mxu2 }
 0x30a   :  { %v1637_v39 = vadd.f32 %v1571_v62, %v1069_v43  ;;  %v6950_v27 = vpop.f32.mrf.mxu1  ;;  %4279 = vmatmul.msk.f32.gmra.mxu0 %vm389_vm2, %v5680_v24  ;;  %v2458_v24 = vadd.f32 %v6890_v21, %v5649_v60  ;;  %v4407_v60 = vld [vmem:[%s7824_s0 + $0xf8] sm:$0xff]  ;;  %v2459_v21 = vadd.f32 %v6905_v28, %v5667_v1  ;;  %v4408_v28 = vld [vmem:[%s7824_s0 + $0x108] sm:$0xff] }
 0x30b   :  { %v1861_v22 = vpop.f32.mrf.mxu3 }
 0x30c   :  { %v1927_v23 = vadd.f32 %v1861_v22, %v1637_v39 }
 0x30d   :  { %4086 = vmatmul.msk.f32.gmra.mxu1 %vm389_vm2, %v5736_v52 }
 0x30e   :  { %v6959_v47 = vadd.f32 %v2159_v10, %v1927_v23  ;;  %4148 = vmatmul.msk.f32.gmra.mxu2 %vm389_vm2, %v4406_v51 }
 0x30f   :  { %v3150_v9 = vpop.f32.mrf.mxu0 }
 0x310   :  { %4214 = vmatmul.msk.f32.gmra.mxu3 %vm389_vm2, %v4703_v6 }
 0x311   :  { %v2556_v31 = vpop.f32.mrf.mxu2 }
 0x312   :  { %v2748_v41 = vadd.f32 %v2556_v31, %v2458_v24  ;;  %v6969_v43 = vpop.f32.mrf.mxu1  ;;  %4280 = vmatmul.msk.f32.gmra.mxu0 %vm389_vm2, %v5699_v40  ;;  %v6984_v40 = vld [vmem:[%s7826_s2] ss:$0 sm:$0xff]  ;;  %v2460_v31 = vadd.f32 %v6920_v26, %v5684_v37 }
 0x313   :  { %v2854_v10 = vpop.f32.mrf.mxu3 }
 0x314   :  { %v3046_v62 = vadd.f32 %v2854_v10, %v2748_v41  ;;  %v8282_v10 = vld [vmem:[#allocation17_spill] sm:$0xff] }
 0x315   :  { %4087 = vmatmul.msk.f32.gmra.mxu1 %vm389_vm2, %v5754_v33 }
 0x316   :  { %v3342_v39 = vadd.f32 %v3150_v9, %v3046_v62  ;;  %4149 = vmatmul.msk.f32.gmra.mxu2 %vm389_vm2, %v4407_v60 }
 0x317   :  { %v3153_v6 = vpop.f32.mrf.mxu0 }
 0x318   :  { %4215 = vmatmul.msk.f32.gmra.mxu3 %vm389_vm2, %v4746_v30  ;;  %v3410_v9 = vadd.f32 %v6984_v40, %v3342_v39 }
 0x319   :  { %v2559_v22 = vpop.f32.mrf.mxu2 }
 0x31a   :  { %v2749_v23 = vadd.f32 %v2559_v22, %v2459_v21  ;;  %v6988_v53 = vpop.f32.mrf.mxu1  ;;  %4281 = vmatmul.msk.f32.gmra.mxu0 %vm389_vm2, %v5717_v44  ;;  %v3474_v41 = vmax.f32 %v3410_v9, 0.0  ;;  %v4409_v9 = vld [vmem:[%s7824_s0 + $0x110] sm:$0xff] }
 0x31b   :  { %v2857_v51 = vpop.f32.mrf.mxu3 }
 0x31c   :  { %v3047_v24 = vadd.f32 %v2857_v51, %v2749_v23  ;;  %v3539_v22 = vsel %vm3538_vm4, %v3474_v41, 0.0 }
 0x31d   :  { %4088 = vmatmul.msk.f32.gmra.mxu1 %vm389_vm2, %v5773_v2 }
 0x31e   :  { %v3343_v1 = vadd.f32 %v3153_v6, %v3047_v24  ;;  %4150 = vmatmul.msk.f32.gmra.mxu2 %vm389_vm2, %v4408_v28 }
 0x31f   :  { %v3156_v30 = vpop.f32.mrf.mxu0 }
 0x320   :  { %v3411_v44 = vadd.f32 %v6984_v40, %v3343_v1  ;;  %4216 = vmatmul.msk.f32.gmra.mxu3 %vm389_vm2, %v8282_v10  ;;  %v8283_v1 = vld [vmem:[#allocation112_spill] sm:$0xff] }
 0x321   :  { %v2562_v62 = vpop.f32.mrf.mxu2 }
 0x322   :  { %v3475_v39 = vmax.f32 %v3411_v44, 0.0  ;;  %v2750_v60 = vadd.f32 %v2562_v62, %v2460_v31  ;;  %v7004_v6 = vpop.f32.mrf.mxu1  ;;  %4282 = vmatmul.msk.f32.gmra.mxu0 %vm389_vm2, %v5736_v52  ;;  %v2461_v52 = vadd.f32 %v6935_v42, %v8283_v1  ;;  %v8284_v31 = vld [vmem:[#allocation22_spill] sm:$0xff] }
 0x323   :  { %v2860_v21 = vpop.f32.mrf.mxu3 }
 0x324   :  { %v3540_v37 = vsel %vm3538_vm4, %v3475_v39, 0.0  ;;  %v3048_v26 = vadd.f32 %v2860_v21, %v2750_v60 }
 0x325   :  { %v3541_v23 = vadd.f32 %v3540_v37, %v3539_v22  ;;  %4089 = vmatmul.msk.f32.gmra.mxu1 %vm389_vm2, %v5791_v38  ;;  %v4410_v22 = vld [vmem:[%s7824_s0 + $0x120] sm:$0xff] }
 0x326   :  { %v3344_v51 = vadd.f32 %v3156_v30, %v3048_v26  ;;  %4151 = vmatmul.msk.f32.gmra.mxu2 %vm389_vm2, %v4409_v9  ;;  %v8285_v26 = vld [vmem:[#allocation12_spill] sm:$0xff]  ;;  %v8286_v9 = vld [vmem:[#allocation27_spill] sm:$0xff] }
 0x327   :  { %v3159_v24 = vpop.f32.mrf.mxu0 }
 0x328   :  { %v3412_v28 = vadd.f32 %v6984_v40, %v3344_v51  ;;  %4217 = vmatmul.msk.f32.gmra.mxu3 %vm389_vm2, %v8284_v31  ;;  %v2462_v51 = vadd.f32 %v6950_v27, %v8285_v26 }
 0x329   :  { %v2565_v41 = vpop.f32.mrf.mxu2 }
 0x32a   :  { %v3476_v44 = vmax.f32 %v3412_v28, 0.0  ;;  %v2751_v10 = vadd.f32 %v2565_v41, %v2461_v52  ;;  %v7021_v62 = vpop.f32.mrf.mxu1  ;;  %4283 = vmatmul.msk.f32.gmra.mxu0 %vm389_vm2, %v5754_v33 }
 0x32b   :  { %v2863_v30 = vpop.f32.mrf.mxu3 }
 0x32c   :  { %v3542_v39 = vsel %vm3538_vm4, %v3476_v44, 0.0  ;;  %v3049_v60 = vadd.f32 %v2863_v30, %v2751_v10  ;;  %v4411_v10 = vld [vmem:[%s7824_s0 + $0x128] sm:$0xff] }
 0x32d   :  { %v3543_v21 = vadd.f32 %v3542_v39, %v3541_v23  ;;  %4090 = vmatmul.msk.f32.gmra.mxu1 %vm389_vm2, %v5810_v54  ;;  %v8287_v39 = vld [vmem:[#allocation24_spill] sm:$0xff] }
 0x32e   :  { %v3345_v42 = vadd.f32 %v3159_v24, %v3049_v60  ;;  %4152 = vmatmul.msk.f32.gmra.mxu2 %vm389_vm2, %v4410_v22  ;;  %v2463_v60 = vadd.f32 %v6969_v43, %v8287_v39 }
 0x32f   :  { %v3162_v37 = vpop.f32.mrf.mxu0 }
 0x330   :  { %v3413_v33 = vadd.f32 %v6984_v40, %v3345_v42  ;;  %4218 = vmatmul.msk.f32.gmra.mxu3 %vm389_vm2, %v8286_v9  ;;  %v8288_v42 = vld [vmem:[#allocation32_spill] sm:$0xff] }
 0x331   :  { %v2568_v23 = vpop.f32.mrf.mxu2 }
 0x332   :  { %v3477_v1 = vmax.f32 %v3413_v33, 0.0  ;;  %v2752_v52 = vadd.f32 %v2568_v23, %v2462_v51  ;;  %v7037_v28 = vpop.f32.mrf.mxu1  ;;  %4284 = vmatmul.msk.f32.gmra.mxu0 %vm389_vm2, %v5773_v2 }
 0x333   :  { %v2866_v24 = vpop.f32.mrf.mxu3 }
 0x334   :  { %v3544_v31 = vsel %vm3538_vm4, %v3477_v1, 0.0  ;;  %v3050_v41 = vadd.f32 %v2866_v24, %v2752_v52  ;;  %v8289_v1 = vld [vmem:[#allocation46_spill] sm:$0xff]  ;;  %v4412_v52 = vld [vmem:[%s7824_s0 + $0x138] sm:$0xff] }
 0x335   :  { %v3545_v44 = vadd.f32 %v3544_v31, %v3543_v21  ;;  %4091 = vmatmul.msk.f32.gmra.mxu1 %vm389_vm2, %v5833_v32  ;;  %v8290_v31 = vld [vmem:[#allocation34_spill] sm:$0xff] }
 0x336   :  { %v3346_v27 = vadd.f32 %v3162_v37, %v3050_v41  ;;  %4153 = vmatmul.msk.f32.gmra.mxu2 %vm389_vm2, %v4411_v10  ;;  %v2464_v41 = vadd.f32 %v6988_v53, %v8290_v31 }
 0x337   :  { %v3165_v30 = vpop.f32.mrf.mxu0 }
 0x338   :  { %v3414_v2 = vadd.f32 %v6984_v40, %v3346_v27  ;;  %4219 = vmatmul.msk.f32.gmra.mxu3 %vm389_vm2, %v8288_v42  ;;  %v8291_v27 = vld [vmem:[#allocation38_spill] sm:$0xff] }
 0x339   :  { %v2571_v21 = vpop.f32.mrf.mxu2 }
 0x33a   :  { %v3478_v22 = vmax.f32 %v3414_v2, 0.0  ;;  %v2753_v26 = vadd.f32 %v2571_v21, %v2463_v60  ;;  %v7053_v51 = vpop.f32.mrf.mxu1  ;;  %4285 = vmatmul.msk.f32.gmra.mxu0 %vm389_vm2, %v5791_v38 }
 0x33b   :  { %v2869_v37 = vpop.f32.mrf.mxu3 }
 0x33c   :  { %v3546_v33 = vsel %vm3538_vm4, %v3478_v22, 0.0  ;;  %v3051_v9 = vadd.f32 %v2869_v37, %v2753_v26  ;;  %v8292_v22 = vld [vmem:[#allocation51_spill] sm:$0xff]  ;;  %v4413_v26 = vld [vmem:[%s7824_s0 + $0x140] sm:$0xff] }
 0x33d   :  { %v3547_v23 = vadd.f32 %v3546_v33, %v3545_v44  ;;  %4092 = vmatmul.msk.f32.gmra.mxu1 %vm389_vm2, %v8289_v1  ;;  %v8293_v33 = vld [vmem:[#allocation19_spill] sm:$0xff] }
 0x33e   :  { %v3347_v43 = vadd.f32 %v3165_v30, %v3051_v9  ;;  %4154 = vmatmul.msk.f32.gmra.mxu2 %vm389_vm2, %v4412_v52  ;;  %v2465_v9 = vadd.f32 %v7004_v6, %v8293_v33  ;;  %v3685_v6 = vld [vmem:[%s7827_s3 + $0x30] sm:$0xff] }
 0x33f   :  { %v3168_v24 = vpop.f32.mrf.mxu0  ;;  %3706 = vmatpush.msrb.mxu1 %v3685_v6  ;;  %v8298_v6 = vld [vmem:[#allocation45_spill] sm:$0xff] }
 0x340   :  { %v3415_v38 = vadd.f32 %v6984_v40, %v3347_v43  ;;  %4220 = vmatmul.msk.f32.gmra.mxu3 %vm389_vm2, %v8291_v27  ;;  %v8294_v43 = vld [vmem:[#allocation43_spill] sm:$0xff] }
 0x341   :  { %v2574_v44 = vpop.f32.mrf.mxu2 }
 0x342   :  { %v3479_v10 = vmax.f32 %v3415_v38, 0.0  ;;  %v2754_v39 = vadd.f32 %v2574_v44, %v2464_v41  ;;  %v7069_v60 = vpop.f32.mrf.mxu1  ;;  %4286 = vmatmul.msk.f32.gmra.mxu0 %vm389_vm2, %v5810_v54 }
 0x343   :  { %v2872_v30 = vpop.f32.mrf.mxu3 }
 0x344   :  { %v3548_v2 = vsel %vm3538_vm4, %v3479_v10, 0.0  ;;  %v3052_v42 = vadd.f32 %v2872_v30, %v2754_v39  ;;  %v8295_v10 = vld [vmem:[#allocation114_spill] sm:$0xff] }
 0x345   :  { %v3549_v21 = vadd.f32 %v3548_v2, %v3547_v23  ;;  %4093 = vmatmul.msk.f32.gmra.mxu1 %vm389_vm2, %v8292_v22  ;;  %v4414_v30 = vld [vmem:[%s7824_s0 + $0x150] sm:$0xff] }
 0x346   :  { %v3348_v53 = vadd.f32 %v3168_v24, %v3052_v42  ;;  %4155 = vmatmul.msk.f32.gmra.mxu2 %vm389_vm2, %v4413_v26  ;;  %v8296_v2 = vld [vmem:[#allocation35_spill] sm:$0xff] }
 0x347   :  { %v3171_v37 = vpop.f32.mrf.mxu0  ;;  %v2466_v42 = vadd.f32 %v7021_v62, %v8296_v2  ;;  %v4415_v62 = vld [vmem:[%s7824_s0 + $0x180] sm:$0xff]  ;;  %v8299_v2 = vld [vmem:[#allocation54_spill] sm:$0xff] }
 0x348   :  { %v3416_v54 = vadd.f32 %v6984_v40, %v3348_v53  ;;  %4221 = vmatmul.msk.f32.gmra.mxu3 %vm389_vm2, %v8294_v43  ;;  %v8297_v53 = vld [vmem:[#allocation49_spill] sm:$0xff] }
 0x349   :  { %v2577_v23 = vpop.f32.mrf.mxu2 }
 0x34a   :  { %v3480_v52 = vmax.f32 %v3416_v54, 0.0  ;;  %v2755_v31 = vadd.f32 %v2577_v23, %v2465_v9  ;;  %v7085_v41 = vpop.f32.mrf.mxu1  ;;  %4287 = vmatmul.msk.f32.gmra.mxu0 %vm389_vm2, %v5833_v32 }
 0x34b   :  { %v2875_v24 = vpop.f32.mrf.mxu3 }
 0x34c   :  { %v3550_v38 = vsel %vm3538_vm4, %v3480_v52, 0.0  ;;  %v3053_v27 = vadd.f32 %v2875_v24, %v2755_v31  ;;  %v2226_v31 = vrot.slane %v4415_v62, 2  ;;  %v7117_v24 = vld [vmem:[%s7824_s0 + $0x188] sm:$0xff] }
 0x34d   :  { %v3551_v44 = vadd.f32 %v3550_v38, %v3549_v21  ;;  %4094 = vmatmul.msk.f32.gmra.mxu1 %vm389_vm2, %v8295_v10 }
 0x34e   :  { %v3349_v39 = vadd.f32 %v3171_v37, %v3053_v27  ;;  %4156 = vmatmul.msk.f32.gmra.mxu2 %vm389_vm2, %v4414_v30  ;;  %v4417_v27 = vld [vmem:[%s7824_s0 + $0x158] sm:$0xff] }
 0x34f   :  { %v3174_v32 = vpop.f32.mrf.mxu0 }
 0x350   :  { %v3417_v21 = vadd.f32 %v6984_v40, %v3349_v39  ;;  %4222 = vmatmul.msk.f32.gmra.mxu3 %vm389_vm2, %v8297_v53  ;;  %v2467_v39 = vadd.f32 %v7037_v28, %v8298_v6 }
 0x351   :  { %v2580_v26 = vpop.f32.mrf.mxu2 }
 0x352   :  { %v3481_v33 = vmax.f32 %v3417_v21, 0.0  ;;  %v2756_v9 = vadd.f32 %v2580_v26, %v2466_v42  ;;  %v7104_v37 = vpop.f32.mrf.mxu1  ;;  %4288 = vmatmul.msk.f32.gmra.mxu0 %vm389_vm2, %v8289_v1  ;;  %v2227_v1 = vrot.slane %v7117_v24, 2 }
 0x353   :  { %v2878_v54 = vpop.f32.mrf.mxu3 }
 0x354   :  { %v3552_v43 = vsel %vm3538_vm4, %v3481_v33, 0.0  ;;  %v3054_v23 = vadd.f32 %v2878_v54, %v2756_v9 }
 0x355   :  { %v3553_v52 = vadd.f32 %v3552_v43, %v3551_v44  ;;  %4095 = vmatmul.msk.f32.gmra.mxu1 %vm389_vm2, %v5940_v61 }
 0x356   :  { %v3350_v38 = vadd.f32 %v3174_v32, %v3054_v23  ;;  %4157 = vmatmul.msk.f32.gmra.mxu2 %vm389_vm2, %v4417_v27  ;;  %v2228_v32 = vsel %vm1071_vm3, %v2226_v31, %v2227_v1  ;;  %v4418_v23 = vld [vmem:[%s7824_s0 + $0x168] sm:$0xff]  ;;  %v4419_v31 = vld [vmem:[%s7824_s0 + $0x190] sm:$0x3] }
 0x357   :  { %v3177_v44 = vpop.f32.mrf.mxu0  ;;  %v8300_v27 = vld [vmem:[#allocation29_spill] sm:$0xff] }
 0x358   :  { %v3418_v30 = vadd.f32 %v6984_v40, %v3350_v38  ;;  %4223 = vmatmul.msk.f32.gmra.mxu3 %vm389_vm2, %v8299_v2  ;;  %v2229_v38 = vrot.slane %v4419_v31, 2  ;;  %v2468_v6 = vadd.f32 %v7053_v51, %v8300_v27  ;;  %v8302_v31 = vld [vmem:[#allocation40_spill] sm:$0xff] }
 0x359   :  { %v2583_v42 = vpop.f32.mrf.mxu2 }
 0x35a   :  { %v3482_v21 = vmax.f32 %v3418_v30, 0.0  ;;  %v2757_v53 = vadd.f32 %v2583_v42, %v2467_v39  ;;  %v7129_v26 = vpop.f32.mrf.mxu1  ;;  %4289 = vmatmul.msk.f32.gmra.mxu0 %vm389_vm2, %v8292_v22  ;;  %v8301_v39 = vld [vmem:[#allocation6_spill] sm:$0xff] }
 0x35b   :  { %v2881_v33 = vpop.f32.mrf.mxu3 }
 0x35c   :  { %v3554_v9 = vsel %vm3538_vm4, %v3482_v21, 0.0  ;;  %v3055_v54 = vadd.f32 %v2881_v33, %v2757_v53  ;;  %v2230_v21 = vsel %vm1071_vm3, %v2227_v1, %v2229_v38  ;;  %v2469_v1 = vadd.f32 %v7069_v60, %v8302_v31  ;;  %v8303_v38 = vld [vmem:[#allocation9_spill] sm:$0xff] }
 0x35d   :  { %v3555_v28 = vadd.f32 %v3554_v9, %v3553_v52  ;;  %4096 = vmatmul.msk.f32.gmra.mxu1 %vm389_vm2, %v2228_v32 }
 0x35e   :  { %v3351_v43 = vadd.f32 %v3177_v44, %v3055_v54  ;;  %4158 = vmatmul.msk.f32.gmra.mxu2 %vm389_vm2, %v4418_v23 }
 0x35f   :  { %v3180_v22 = vpop.f32.mrf.mxu0 }
 0x360   :  { %v3419_v52 = vadd.f32 %v6984_v40, %v3351_v43  ;;  %4224 = vmatmul.msk.f32.gmra.mxu3 %vm389_vm2, %v8301_v39  ;;  %v4420_v43 = vld [vmem:[%s7824_s0 + $0x170] sm:$0xff] }
 0x361   :  { %v2586_v44 = vpop.f32.mrf.mxu2 }
 0x362   :  { %v3483_v30 = vmax.f32 %v3419_v52, 0.0  ;;  %v2758_v2 = vadd.f32 %v2586_v44, %v2468_v6  ;;  %v7148_v42 = vpop.f32.mrf.mxu1  ;;  %4290 = vmatmul.msk.f32.gmra.mxu0 %vm389_vm2, %v8295_v10 }
 0x363   :  { %v2884_v53 = vpop.f32.mrf.mxu3 }
 0x364   :  { %v3556_v33 = vsel %vm3538_vm4, %v3483_v30, 0.0  ;;  %v3056_v9 = vadd.f32 %v2884_v53, %v2758_v2  ;;  %v8304_v53 = vld [vmem:[#allocation113_spill] sm:$0xff] }
 0x365   :  { %v3557_v51 = vadd.f32 %v3556_v33, %v3555_v28  ;;  %4097 = vmatmul.msk.f32.gmra.mxu1 %vm389_vm2, %v2230_v21  ;;  %v2470_v33 = vadd.f32 %v7085_v41, %v8304_v53 }
 0x366   :  { %v3352_v54 = vadd.f32 %v3180_v22, %v3056_v9  ;;  %4159 = vmatmul.msk.f32.gmra.mxu2 %vm389_vm2, %v4420_v43 }
 0x367   :  { %v3183_v23 = vpop.f32.mrf.mxu0 }
 0x368   :  { %v3420_v10 = vadd.f32 %v6984_v40, %v3352_v54  ;;  %4225 = vmatmul.msk.f32.gmra.mxu3 %vm389_vm2, %v8303_v38 }
 0x369   :  { %v2589_v27 = vpop.f32.mrf.mxu2 }
 0x36a   :  { %v3484_v28 = vmax.f32 %v3420_v10, 0.0  ;;  %v2759_v6 = vadd.f32 %v2589_v27, %v2469_v1  ;;  %v7164_v52 = vpop.f32.mrf.mxu1  ;;  %4291 = vmatmul.msk.f32.gmra.mxu0 %vm389_vm2, %v5940_v61  ;;  %v8305_v10 = vld [vmem:[#allocation115_spill] sm:$0xff] }
 0x36b   :  { %v2887_v22 = vpop.f32.mrf.mxu3  ;;  %v2471_v38 = vadd.f32 %v7104_v37, %v8305_v10 }
 0x36c   :  { %v3558_v39 = vsel %vm3538_vm4, %v3484_v28, 0.0  ;;  %v3057_v44 = vadd.f32 %v2887_v22, %v2759_v6 }
 0x36d   :  { %v3559_v30 = vadd.f32 %v3558_v39, %v3557_v51  ;;  %4098 = vmatmul.msk.f32.gmra.mxu1 %vm389_vm2, %v6009_v16 }
 0x36e   :  { %v3353_v60 = vadd.f32 %v3183_v23, %v3057_v44  ;;  %4160 = vmatmul.msk.f32.gmra.mxu2 %vm389_vm2, %v4415_v62 }
 0x36f   :  { %v3186_v2 = vpop.f32.mrf.mxu0 }
 0x370   :  { %v3421_v9 = vadd.f32 %v6984_v40, %v3353_v60  ;;  %4226 = vmatmul.msk.f32.gmra.mxu3 %vm389_vm2, %v5927_v17  ;;  %v72_v17 = vld [vmem:[%s7824_s0 + $0x198] sm:$0xff] }
 0x371   :  { %v2592_v61 = vpop.f32.mrf.mxu2  ;;  %v2814_v28 = vrot.slane %v72_v17, 1 }
 0x372   :  { %v3485_v54 = vmax.f32 %v3421_v9, 0.0  ;;  %v2760_v43 = vadd.f32 %v2592_v61, %v2470_v33  ;;  %v7177_v31 = vpop.f32.mrf.mxu1  ;;  %4292 = vmatmul.msk.f32.gmra.mxu0 %vm389_vm2, %v2228_v32  ;;  %v73_v32 = vld [vmem:[%s7824_s0 + $0x1a0] sm:$0xff]  ;;  %v74_v9 = vld [vmem:[%s7824_s0 + $0x1a8] sm:$0x3] }
 0x373   :  { %v2890_v16 = vpop.f32.mrf.mxu3  ;;  %v3111_v60 = vrot.slane %v73_v32, 2 }
 0x374   :  { %v3560_v51 = vsel %vm3538_vm4, %v3485_v54, 0.0  ;;  %v3058_v62 = vadd.f32 %v2890_v16, %v2760_v43  ;;  %v2472_v54 = vadd.f32 %v7129_v26, %v5949_v29 }
 0x375   :  { %v3561_v23 = vadd.f32 %v3560_v51, %v3559_v30  ;;  %4099 = vmatmul.msk.f32.gmra.mxu1 %vm389_vm2, %v6034_v19  ;;  %v3110_v30 = vrot.slane %v72_v17, 2  ;;  %v2817_v51 = vrot.slane %v74_v9, 1 }
 0x376   :  { %v3354_v41 = vadd.f32 %v3186_v2, %v3058_v62  ;;  %4161 = vmatmul.msk.f32.gmra.mxu2 %vm389_vm2, %v7117_v24  ;;  %v2815_v24 = vrot.slane %v73_v32, 1 }
 0x377   :  { %v3189_v1 = vpop.f32.mrf.mxu0  ;;  %v3112_v61 = vsel %vm1071_vm3, %v3110_v30, %v3111_v60 }
 0x378   :  { %v3422_v27 = vadd.f32 %v6984_v40, %v3354_v41  ;;  %4227 = vmatmul.msk.f32.gmra.mxu3 %vm389_vm2, %v5956_v55  ;;  %v2816_v55 = vsel %vm226_vm1, %v2814_v28, %v2815_v24  ;;  %v2818_v29 = vsel %vm226_vm1, %v2815_v24, %v2817_v51 }
 0x379   :  { %v2595_v19 = vpop.f32.mrf.mxu2 }
 0x37a   :  { %v3486_v6 = vmax.f32 %v3422_v27, 0.0  ;;  %v2761_v22 = vadd.f32 %v2595_v19, %v2471_v38  ;;  %v7196_v39 = vpop.f32.mrf.mxu1  ;;  %4293 = vmatmul.msk.f32.gmra.mxu0 %vm389_vm2, %v2230_v21 }
 0x37b   :  { %v2893_v44 = vpop.f32.mrf.mxu3 }
 0x37c   :  { %v3562_v2 = vsel %vm3538_vm4, %v3486_v6, 0.0  ;;  %v3059_v37 = vadd.f32 %v2893_v44, %v2761_v22  ;;  %v2473_v6 = vadd.f32 %v7148_v42, %v5973_v13  ;;  %v3684_v13 = vld [vmem:[%s7827_s3 + $0x28] sm:$0xff] }
 0x37d   :  { %v3563_v53 = vadd.f32 %v3562_v2, %v3561_v23  ;;  %4100 = vmatmul.msk.f32.gmra.mxu1 %vm389_vm2, %v6058_v59 }
 0x37e   :  { %v3355_v33 = vadd.f32 %v3189_v1, %v3059_v37  ;;  %4162 = vmatmul.msk.f32.gmra.mxu2 %vm389_vm2, %v72_v17  ;;  %v3113_v1 = vrot.slane %v74_v9, 2  ;;  %3707 = vmatpush.msrb.mxu1 %v3684_v13  ;;  %v2474_v9 = vadd.f32 %v7164_v52, %v5995_v18 }
 0x37f   :  { %v3192_v21 = vpop.f32.mrf.mxu0 }
 0x380   :  { %v3423_v43 = vadd.f32 %v6984_v40, %v3355_v33  ;;  %4228 = vmatmul.msk.f32.gmra.mxu3 %vm389_vm2, %v2816_v55  ;;  %v3114_v28 = vsel %vm1071_vm3, %v3111_v60, %v3113_v1  ;;  %v4421_v60 = vld [vmem:[%s7824_s0 + $0x1e0] sm:$0xff]  ;;  %v8306_v1 = vld [vmem:[#allocation14_spill] sm:$0xff] }
 0x381   :  { %v2598_v16 = vpop.f32.mrf.mxu2 }
 0x382   :  { %v3487_v62 = vmax.f32 %v3423_v43, 0.0  ;;  %v2762_v23 = vadd.f32 %v2598_v16, %v2472_v54  ;;  %v7212_v41 = vpop.f32.mrf.mxu1  ;;  %4294 = vmatmul.msk.f32.gmra.mxu0 %vm389_vm2, %v3112_v61 }
 0x383   :  { %v2896_v17 = vpop.f32.mrf.mxu3 }
 0x384   :  { %v3564_v10 = vsel %vm3538_vm4, %v3487_v62, 0.0  ;;  %v3060_v38 = vadd.f32 %v2896_v17, %v2762_v23 }
 0x385   :  { %v3565_v27 = vadd.f32 %v3564_v10, %v3563_v53  ;;  %4101 = vmatmul.msk.f32.gmra.mxu1 %vm389_vm2, %v6083_v46  ;;  %v2475_v10 = vadd.f32 %v7177_v31, %v8306_v1 }
 0x386   :  { %v3356_v26 = vadd.f32 %v3192_v21, %v3060_v38  ;;  %4163 = vmatmul.msk.f32.gmra.mxu2 %vm389_vm2, %v73_v32  ;;  %v8307_v38 = vld [vmem:[#allocation28_spill] sm:$0xff] }
 0x387   :  { %v3195_v19 = vpop.f32.mrf.mxu0 }
 0x388   :  { %v3424_v22 = vadd.f32 %v6984_v40, %v3356_v26  ;;  %4229 = vmatmul.msk.f32.gmra.mxu3 %vm389_vm2, %v2818_v29 }
 0x389   :  { %v2601_v44 = vpop.f32.mrf.mxu2 }
 0x38a   :  { %v3488_v30 = vmax.f32 %v3424_v22, 0.0  ;;  %v2763_v2 = vadd.f32 %v2601_v44, %v2473_v6  ;;  %v7225_v37 = vpop.f32.mrf.mxu1  ;;  %4295 = vmatmul.msk.f32.gmra.mxu0 %vm389_vm2, %v3114_v28 }
 0x38b   :  { %v2899_v24 = vpop.f32.mrf.mxu3 }
 0x38c   :  { %v3566_v32 = vsel %vm3538_vm4, %v3488_v30, 0.0  ;;  %v3061_v53 = vadd.f32 %v2899_v24, %v2763_v2  ;;  %v4423_v30 = vld [vmem:[%s7824_s0 + $0x1f8] sm:$0xff]  ;;  %v8308_v24 = vld [vmem:[#allocation18_spill] sm:$0xff] }
 0x38d   :  { %v3567_v55 = vadd.f32 %v3566_v32, %v3565_v27  ;;  %4102 = vmatmul.msk.f32.gmra.mxu1 %vm389_vm2, %v6107_v0  ;;  %v2476_v32 = vadd.f32 %v7196_v39, %v8308_v24 }
 0x38e   :  { %v3357_v42 = vadd.f32 %v3195_v19, %v3061_v53  ;;  %4164 = vmatmul.msk.f32.gmra.mxu2 %vm389_vm2, %v4421_v60  ;;  %v8309_v53 = vld [vmem:[#allocation33_spill] sm:$0xff] }
 0x38f   :  { %v3198_v33 = vpop.f32.mrf.mxu0 }
 0x390   :  { %v3425_v21 = vadd.f32 %v6984_v40, %v3357_v42  ;;  %4230 = vmatmul.msk.f32.gmra.mxu3 %vm389_vm2, %v8146_v56  ;;  %v4422_v56 = vld [vmem:[%s7824_s0 + $0x1e8] sm:$0xff] }
 0x391   :  { %v2604_v61 = vpop.f32.mrf.mxu2 }
 0x392   :  { %v3489_v54 = vmax.f32 %v3425_v21, 0.0  ;;  %v2764_v43 = vadd.f32 %v2604_v61, %v2474_v9  ;;  %v7243_v16 = vpop.f32.mrf.mxu1  ;;  %4296 = vmatmul.msk.f32.gmra.mxu0 %vm389_vm2, %v6058_v59 }
 0x393   :  { %v2902_v51 = vpop.f32.mrf.mxu3 }
 0x394   :  { %v3568_v62 = vsel %vm3538_vm4, %v3489_v54, 0.0  ;;  %v3062_v23 = vadd.f32 %v2902_v51, %v2764_v43  ;;  %v4424_v54 = vld [vmem:[%s7824_s0 + $0x200] sm:$0xff]  ;;  %v8310_v51 = vld [vmem:[#allocation23_spill] sm:$0xff] }
 0x395   :  { %v3569_v17 = vadd.f32 %v3568_v62, %v3567_v55  ;;  %4103 = vmatmul.msk.f32.gmra.mxu1 %vm389_vm2, %v6132_v25  ;;  %v2477_v62 = vadd.f32 %v7212_v41, %v8310_v51 }
 0x396   :  { %v3358_v18 = vadd.f32 %v3198_v33, %v3062_v23  ;;  %4165 = vmatmul.msk.f32.gmra.mxu2 %vm389_vm2, %v4422_v56  ;;  %v8311_v23 = vld [vmem:[#allocation39_spill] sm:$0xff] }
 0x397   :  { %v3201_v52 = vpop.f32.mrf.mxu0 }
 0x398   :  { %v3426_v59 = vadd.f32 %v6984_v40, %v3358_v18  ;;  %4231 = vmatmul.msk.f32.gmra.mxu3 %vm389_vm2, %v8307_v38 }
 0x399   :  { %v2607_v27 = vpop.f32.mrf.mxu2 }
 0x39a   :  { %v3490_v29 = vmax.f32 %v3426_v59, 0.0  ;;  %v2765_v26 = vadd.f32 %v2607_v27, %v2475_v10  ;;  %v7259_v19 = vpop.f32.mrf.mxu1  ;;  %4297 = vmatmul.msk.f32.gmra.mxu0 %vm389_vm2, %v6083_v46  ;;  %v4425_v27 = vld [vmem:[%s7824_s0 + $0x210] sm:$0xff] }
 0x39b   :  { %v2905_v28 = vpop.f32.mrf.mxu3 }
 0x39c   :  { %v3570_v6 = vsel %vm3538_vm4, %v3490_v29, 0.0  ;;  %v3063_v22 = vadd.f32 %v2905_v28, %v2765_v26  ;;  %v8312_v26 = vld [vmem:[#allocation116_spill] sm:$0xff] }
 0x39d   :  { %v3571_v44 = vadd.f32 %v3570_v6, %v3569_v17  ;;  %4104 = vmatmul.msk.f32.gmra.mxu1 %vm389_vm2, %v6156_v20  ;;  %v2478_v28 = vadd.f32 %v7225_v37, %v8312_v26  ;;  %v8313_v6 = vld [vmem:[#allocation44_spill] sm:$0xff] }
 0x39e   :  { %v3359_v31 = vadd.f32 %v3201_v52, %v3063_v22  ;;  %4166 = vmatmul.msk.f32.gmra.mxu2 %vm389_vm2, %v4423_v30 }
 0x39f   :  { %v3204_v2 = vpop.f32.mrf.mxu0 }
 0x3a0   :  { %v3427_v46 = vadd.f32 %v6984_v40, %v3359_v31  ;;  %4232 = vmatmul.msk.f32.gmra.mxu3 %vm389_vm2, %v8309_v53  ;;  %v4426_v53 = vld [vmem:[%s7824_s0 + $0x218] sm:$0xff] }
 0x3a1   :  { %v2610_v55 = vpop.f32.mrf.mxu2 }
 0x3a2   :  { %v3491_v13 = vmax.f32 %v3427_v46, 0.0  ;;  %v2766_v42 = vadd.f32 %v2610_v55, %v2476_v32  ;;  %v7275_v60 = vpop.f32.mrf.mxu1  ;;  %4298 = vmatmul.msk.f32.gmra.mxu0 %vm389_vm2, %v6107_v0 }
 0x3a3   :  { %v2908_v33 = vpop.f32.mrf.mxu3 }
 0x3a4   :  { %v3572_v9 = vsel %vm3538_vm4, %v3491_v13, 0.0  ;;  %v3064_v21 = vadd.f32 %v2908_v33, %v2766_v42  ;;  %v8314_v13 = vld [vmem:[#allocation117_spill] sm:$0xff]  ;;  %v8315_v33 = vld [vmem:[#allocation50_spill] sm:$0xff] }
 0x3a5   :  { %v3573_v61 = vadd.f32 %v3572_v9, %v3571_v44  ;;  %4105 = vmatmul.msk.f32.gmra.mxu1 %vm389_vm2, %v6181_v15  ;;  %v2479_v42 = vadd.f32 %v7243_v16, %v8314_v13  ;;  %v8320_v13 = vld [vmem:[#allocation125_spill] sm:$0xff] }
 0x3a6   :  { %v3360_v39 = vadd.f32 %v3204_v2, %v3064_v21  ;;  %4167 = vmatmul.msk.f32.gmra.mxu2 %vm389_vm2, %v4424_v54 }
 0x3a7   :  { %v3207_v43 = vpop.f32.mrf.mxu0 }
 0x3a8   :  { %v3428_v0 = vadd.f32 %v6984_v40, %v3360_v39  ;;  %4233 = vmatmul.msk.f32.gmra.mxu3 %vm389_vm2, %v8311_v23 }
 0x3a9   :  { %v2613_v17 = vpop.f32.mrf.mxu2 }
 0x3aa   :  { %v3492_v18 = vmax.f32 %v3428_v0, 0.0  ;;  %v2767_v56 = vadd.f32 %v2613_v17, %v2477_v62  ;;  %v7291_v52 = vpop.f32.mrf.mxu1  ;;  %4299 = vmatmul.msk.f32.gmra.mxu0 %vm389_vm2, %v6132_v25  ;;  %v4427_v0 = vld [vmem:[%s7824_s0 + $0x228] sm:$0xff] }
 0x3ab   :  { %v2911_v1 = vpop.f32.mrf.mxu3  ;;  %v8316_v17 = vld [vmem:[#allocation118_spill] sm:$0xff] }
 0x3ac   :  { %v3574_v10 = vsel %vm3538_vm4, %v3492_v18, 0.0  ;;  %v3065_v59 = vadd.f32 %v2911_v1, %v2767_v56  ;;  %v2480_v18 = vadd.f32 %v7259_v19, %v8316_v17  ;;  %v8317_v56 = vld [vmem:[#allocation55_spill] sm:$0xff] }
 0x3ad   :  { %v3575_v38 = vadd.f32 %v3574_v10, %v3573_v61  ;;  %4106 = vmatmul.msk.f32.gmra.mxu1 %vm389_vm2, %v6205_v14 }
 0x3ae   :  { %v3361_v41 = vadd.f32 %v3207_v43, %v3065_v59  ;;  %4168 = vmatmul.msk.f32.gmra.mxu2 %vm389_vm2, %v4425_v27 }
 0x3af   :  { %v3210_v29 = vpop.f32.mrf.mxu0 }
 0x3b0   :  { %v3429_v25 = vadd.f32 %v6984_v40, %v3361_v41  ;;  %4234 = vmatmul.msk.f32.gmra.mxu3 %vm389_vm2, %v8313_v6  ;;  %v8318_v6 = vld [vmem:[#allocation119_spill] sm:$0xff] }
 0x3b1   :  { %v2616_v22 = vpop.f32.mrf.mxu2 }
 0x3b2   :  { %v3493_v44 = vmax.f32 %v3429_v25, 0.0  ;;  %v2768_v31 = vadd.f32 %v2616_v22, %v2478_v28  ;;  %v7307_v30 = vpop.f32.mrf.mxu1  ;;  %4300 = vmatmul.msk.f32.gmra.mxu0 %vm389_vm2, %v6156_v20  ;;  %v4428_v28 = vld [vmem:[%s7824_s0 + $0x230] sm:$0xff]  ;;  %v2481_v22 = vadd.f32 %v7275_v60, %v8318_v6  ;;  %v3683_v60 = vld [vmem:[%s7827_s3 + $0x20] sm:$0xff] }
 0x3b3   :  { %v2914_v2 = vpop.f32.mrf.mxu3  ;;  %3708 = vmatpush.msrb.mxu1 %v3683_v60 }
 0x3b4   :  { %v3576_v24 = vsel %vm3538_vm4, %v3493_v44, 0.0  ;;  %v3066_v32 = vadd.f32 %v2914_v2, %v2768_v31  ;;  %v8319_v44 = vld [vmem:[#allocation58_spill] sm:$0xff] }
 0x3b5   :  { %v3577_v46 = vadd.f32 %v3576_v24, %v3575_v38  ;;  %4107 = vmatmul.msk.f32.gmra.mxu1 %vm389_vm2, %v6230_v45 }
 0x3b6   :  { %v3362_v37 = vadd.f32 %v3210_v29, %v3066_v32  ;;  %4169 = vmatmul.msk.f32.gmra.mxu2 %vm389_vm2, %v4426_v53 }
 0x3b7   :  { %v3213_v55 = vpop.f32.mrf.mxu0 }
 0x3b8   :  { %v3430_v20 = vadd.f32 %v6984_v40, %v3362_v37  ;;  %4235 = vmatmul.msk.f32.gmra.mxu3 %vm389_vm2, %v8315_v33  ;;  %v8321_v33 = vld [vmem:[#allocation120_spill] sm:$0xff] }
 0x3b9   :  { %v2619_v9 = vpop.f32.mrf.mxu2 }
 0x3ba   :  { %v3494_v21 = vmax.f32 %v3430_v20, 0.0  ;;  %v2769_v61 = vadd.f32 %v2619_v9, %v2479_v42  ;;  %v7323_v39 = vpop.f32.mrf.mxu1  ;;  %4301 = vmatmul.msk.f32.gmra.mxu0 %vm389_vm2, %v6181_v15  ;;  %v4429_v20 = vld [vmem:[%s7824_s0 + $0x240] sm:$0xff]  ;;  %v2482_v9 = vadd.f32 %v7291_v52, %v8321_v33 }
 0x3bb   :  { %v2917_v54 = vpop.f32.mrf.mxu3 }
 0x3bc   :  { %v3578_v43 = vsel %vm3538_vm4, %v3494_v21, 0.0  ;;  %v3067_v51 = vadd.f32 %v2917_v54, %v2769_v61  ;;  %v8322_v61 = vld [vmem:[#allocation61_spill] sm:$0xff] }
 0x3bd   :  { %v3579_v62 = vadd.f32 %v3578_v43, %v3577_v46  ;;  %4108 = vmatmul.msk.f32.gmra.mxu1 %vm389_vm2, %v6254_v49 }
 0x3be   :  { %v3363_v16 = vadd.f32 %v3213_v55, %v3067_v51  ;;  %4170 = vmatmul.msk.f32.gmra.mxu2 %vm389_vm2, %v4427_v0 }
 0x3bf   :  { %v3216_v23 = vpop.f32.mrf.mxu0 }
 0x3c0   :  { %v3431_v15 = vadd.f32 %v6984_v40, %v3363_v16  ;;  %4236 = vmatmul.msk.f32.gmra.mxu3 %vm389_vm2, %v8317_v56 }
 0x3c1   :  { %v2622_v1 = vpop.f32.mrf.mxu2 }
 0x3c2   :  { %v3495_v10 = vmax.f32 %v3431_v15, 0.0  ;;  %v2770_v59 = vadd.f32 %v2622_v1, %v2480_v18  ;;  %v7339_v38 = vpop.f32.mrf.mxu1  ;;  %4302 = vmatmul.msk.f32.gmra.mxu0 %vm389_vm2, %v6205_v14  ;;  %v8323_v18 = vld [vmem:[#allocation70_spill] sm:$0xff]  ;;  %v8324_v1 = vld [vmem:[#allocation121_spill] sm:$0xff] }
 0x3c3   :  { %v2920_v41 = vpop.f32.mrf.mxu3  ;;  %v4430_v15 = vld [vmem:[%s7824_s0 + $0x248] sm:$0xff] }
 0x3c4   :  { %v3580_v27 = vsel %vm3538_vm4, %v3495_v10, 0.0  ;;  %v3068_v29 = vadd.f32 %v2920_v41, %v2770_v59  ;;  %v2483_v10 = vadd.f32 %v7307_v30, %v8324_v1  ;;  %v8325_v59 = vld [vmem:[#allocation64_spill] sm:$0xff] }
 0x3c5   :  { %v3581_v26 = vadd.f32 %v3580_v27, %v3579_v62  ;;  %4109 = vmatmul.msk.f32.gmra.mxu1 %vm389_vm2, %v6279_v36  ;;  %v8330_v1 = vld [vmem:[#allocation124_spill] sm:$0xff] }
 0x3c6   :  { %v3364_v19 = vadd.f32 %v3216_v23, %v3068_v29  ;;  %4171 = vmatmul.msk.f32.gmra.mxu2 %vm389_vm2, %v4428_v28 }
 0x3c7   :  { %v3219_v25 = vpop.f32.mrf.mxu0 }
 0x3c8   :  { %v3432_v14 = vadd.f32 %v6984_v40, %v3364_v19  ;;  %4237 = vmatmul.msk.f32.gmra.mxu3 %vm389_vm2, %v8319_v44  ;;  %v8326_v44 = vld [vmem:[#allocation122_spill] sm:$0xff] }
 0x3c9   :  { %v2625_v31 = vpop.f32.mrf.mxu2 }
 0x3ca   :  { %v3496_v2 = vmax.f32 %v3432_v14, 0.0  ;;  %v2771_v24 = vadd.f32 %v2625_v31, %v2481_v22  ;;  %v7355_v32 = vpop.f32.mrf.mxu1  ;;  %4303 = vmatmul.msk.f32.gmra.mxu0 %vm389_vm2, %v6230_v45  ;;  %v4431_v22 = vld [vmem:[%s7824_s0 + $0x258] sm:$0xff]  ;;  %v2484_v31 = vadd.f32 %v7323_v39, %v8326_v44  ;;  %v8333_v44 = vld [vmem:[#allocation126_spill] sm:$0xff] }
 0x3cb   :  { %v2923_v46 = vpop.f32.mrf.mxu3 }
 0x3cc   :  { %v3582_v37 = vsel %vm3538_vm4, %v3496_v2, 0.0  ;;  %v3069_v53 = vadd.f32 %v2923_v46, %v2771_v24  ;;  %v8327_v2 = vld [vmem:[#allocation67_spill] sm:$0xff] }
 0x3cd   :  { %v3583_v55 = vadd.f32 %v3582_v37, %v3581_v26  ;;  %4110 = vmatmul.msk.f32.gmra.mxu1 %vm389_vm2, %v8320_v13 }
 0x3ce   :  { %v3365_v42 = vadd.f32 %v3219_v25, %v3069_v53  ;;  %4172 = vmatmul.msk.f32.gmra.mxu2 %vm389_vm2, %v4429_v20 }
 0x3cf   :  { %v3222_v45 = vpop.f32.mrf.mxu0 }
 0x3d0   :  { %v3433_v21 = vadd.f32 %v6984_v40, %v3365_v42  ;;  %4238 = vmatmul.msk.f32.gmra.mxu3 %vm389_vm2, %v8322_v61  ;;  %v8329_v61 = vld [vmem:[#allocation7_spill] sm:$0xff] }
 0x3d1   :  { %v2628_v54 = vpop.f32.mrf.mxu2 }
 0x3d2   :  { %v3497_v43 = vmax.f32 %v3433_v21, 0.0  ;;  %v2772_v51 = vadd.f32 %v2628_v54, %v2482_v9  ;;  %v7374_v62 = vpop.f32.mrf.mxu1  ;;  %4304 = vmatmul.msk.f32.gmra.mxu0 %vm389_vm2, %v6254_v49  ;;  %v8328_v9 = vld [vmem:[#allocation123_spill] sm:$0xff] }
 0x3d3   :  { %v2926_v16 = vpop.f32.mrf.mxu3  ;;  %v2485_v21 = vadd.f32 %v7339_v38, %v8328_v9 }
 0x3d4   :  { %v3584_v0 = vsel %vm3538_vm4, %v3497_v43, 0.0  ;;  %v3070_v23 = vadd.f32 %v2926_v16, %v2772_v51 }
 0x3d5   :  { %v3585_v17 = vadd.f32 %v3584_v0, %v3583_v55  ;;  %4111 = vmatmul.msk.f32.gmra.mxu1 %vm389_vm2, %v8323_v18 }
 0x3d6   :  { %v3366_v52 = vadd.f32 %v3222_v45, %v3070_v23  ;;  %4173 = vmatmul.msk.f32.gmra.mxu2 %vm389_vm2, %v4430_v15  ;;  %v4432_v45 = vld [vmem:[%s7824_s0 + $0x260] sm:$0xff]  ;;  %v4433_v15 = vld [vmem:[%s7824_s0 + $0x270] sm:$0xff] }
 0x3d7   :  { %v3225_v56 = vpop.f32.mrf.mxu0 }
 0x3d8   :  { %v3434_v49 = vadd.f32 %v6984_v40, %v3366_v52  ;;  %4239 = vmatmul.msk.f32.gmra.mxu3 %vm389_vm2, %v8325_v59 }
 0x3d9   :  { %v2631_v41 = vpop.f32.mrf.mxu2 }
 0x3da   :  { %v3498_v27 = vmax.f32 %v3434_v49, 0.0  ;;  %v2773_v29 = vadd.f32 %v2631_v41, %v2483_v10  ;;  %v7390_v26 = vpop.f32.mrf.mxu1  ;;  %4305 = vmatmul.msk.f32.gmra.mxu0 %vm389_vm2, %v6279_v36  ;;  %v2486_v10 = vadd.f32 %v7355_v32, %v8330_v1  ;;  %v8331_v49 = vld [vmem:[#allocation10_spill] sm:$0xff] }
 0x3db   :  { %v2929_v19 = vpop.f32.mrf.mxu3 }
 0x3dc   :  { %v3586_v28 = vsel %vm3538_vm4, %v3498_v27, 0.0  ;;  %v3071_v25 = vadd.f32 %v2929_v19, %v2773_v29 }
 0x3dd   :  { %v3587_v6 = vadd.f32 %v3586_v28, %v3585_v17  ;;  %4112 = vmatmul.msk.f32.gmra.mxu1 %vm389_vm2, %v6352_v8 }
 0x3de   :  { %v3367_v30 = vadd.f32 %v3225_v56, %v3071_v25  ;;  %4174 = vmatmul.msk.f32.gmra.mxu2 %vm389_vm2, %v4431_v22  ;;  %v4434_v22 = vld [vmem:[%s7824_s0 + $0x278] sm:$0xff] }
 0x3df   :  { %v3228_v14 = vpop.f32.mrf.mxu0 }
 0x3e0   :  { %v3435_v36 = vadd.f32 %v6984_v40, %v3367_v30  ;;  %4240 = vmatmul.msk.f32.gmra.mxu3 %vm389_vm2, %v8327_v2  ;;  %v8332_v30 = vld [vmem:[#allocation130_spill] sm:$0xff] }
 0x3e1   :  { %v2634_v24 = vpop.f32.mrf.mxu2 }
 0x3e2   :  { %v3499_v46 = vmax.f32 %v3435_v36, 0.0  ;;  %v2774_v37 = vadd.f32 %v2634_v24, %v2484_v31  ;;  %v7406_v53 = vpop.f32.mrf.mxu1  ;;  %4306 = vmatmul.msk.f32.gmra.mxu0 %vm389_vm2, %v8320_v13  ;;  %v2487_v31 = vadd.f32 %v7374_v62, %v8333_v44  ;;  %v8334_v36 = vld [vmem:[#allocation11_spill] sm:$0xff] }
 0x3e3   :  { %v2932_v55 = vpop.f32.mrf.mxu3 }
 0x3e4   :  { %v3588_v60 = vsel %vm3538_vm4, %v3499_v46, 0.0  ;;  %v3072_v42 = vadd.f32 %v2932_v55, %v2774_v37 }
 0x3e5   :  { %v3589_v20 = vadd.f32 %v3588_v60, %v3587_v6  ;;  %4113 = vmatmul.msk.f32.gmra.mxu1 %vm389_vm2, %v6377_v48 }
 0x3e6   :  { %v3368_v39 = vadd.f32 %v3228_v14, %v3072_v42  ;;  %4175 = vmatmul.msk.f32.gmra.mxu2 %vm389_vm2, %v4432_v45 }
 0x3e7   :  { %v3231_v33 = vpop.f32.mrf.mxu0 }
 0x3e8   :  { %v3436_v13 = vadd.f32 %v6984_v40, %v3368_v39  ;;  %4241 = vmatmul.msk.f32.gmra.mxu3 %vm389_vm2, %v8329_v61  ;;  %v4435_v39 = vld [vmem:[%s7824_s0 + $0x288] sm:$0xff] }
 0x3e9   :  { %v2637_v54 = vpop.f32.mrf.mxu2 }
 0x3ea   :  { %v3500_v43 = vmax.f32 %v3436_v13, 0.0  ;;  %v2775_v51 = vadd.f32 %v2637_v54, %v2485_v21  ;;  %v7422_v16 = vpop.f32.mrf.mxu1  ;;  %4307 = vmatmul.msk.f32.gmra.mxu0 %vm389_vm2, %v8323_v18  ;;  %v8336_v21 = vld [vmem:[#allocation13_spill] sm:$0xff] }
 0x3eb   :  { %v2935_v0 = vpop.f32.mrf.mxu3 }
 0x3ec   :  { %v3590_v23 = vsel %vm3538_vm4, %v3500_v43, 0.0  ;;  %v3073_v17 = vadd.f32 %v2935_v0, %v2775_v51 }
 0x3ed   :  { %v3591_v52 = vadd.f32 %v3590_v23, %v3589_v20  ;;  %4114 = vmatmul.msk.f32.gmra.mxu1 %vm389_vm2, %v6401_v57 }
 0x3ee   :  { %v3369_v38 = vadd.f32 %v3231_v33, %v3073_v17  ;;  %4176 = vmatmul.msk.f32.gmra.mxu2 %vm389_vm2, %v4433_v15  ;;  %v8335_v33 = vld [vmem:[#allocation127_spill] sm:$0xff] }
 0x3ef   :  { %v3234_v56 = vpop.f32.mrf.mxu0  ;;  %v2488_v9 = vadd.f32 %v7390_v26, %v8335_v33  ;;  %v8344_v33 = vld [vmem:[#allocation25_spill] sm:$0xff] }
 0x3f0   :  { %v3437_v18 = vadd.f32 %v6984_v40, %v3369_v38  ;;  %4242 = vmatmul.msk.f32.gmra.mxu3 %vm389_vm2, %v8331_v49  ;;  %v4436_v38 = vld [vmem:[%s7824_s0 + $0x290] sm:$0xff] }
 0x3f1   :  { %v2640_v59 = vpop.f32.mrf.mxu2 }
 0x3f2   :  { %v3501_v41 = vmax.f32 %v3437_v18, 0.0  ;;  %v2776_v27 = vadd.f32 %v2640_v59, %v2486_v10  ;;  %v7438_v29 = vpop.f32.mrf.mxu1  ;;  %4308 = vmatmul.msk.f32.gmra.mxu0 %vm389_vm2, %v6352_v8  ;;  %v8339_v10 = vld [vmem:[#allocation15_spill] sm:$0xff] }
 0x3f3   :  { %v2938_v19 = vpop.f32.mrf.mxu3 }
 0x3f4   :  { %v3592_v28 = vsel %vm3538_vm4, %v3501_v41, 0.0  ;;  %v3074_v25 = vadd.f32 %v2938_v19, %v2776_v27 }
 0x3f5   :  { %v3593_v6 = vadd.f32 %v3592_v28, %v3591_v52  ;;  %4115 = vmatmul.msk.f32.gmra.mxu1 %vm389_vm2, %v8332_v30  ;;  %v8337_v52 = vld [vmem:[#allocation132_spill] sm:$0xff] }
 0x3f6   :  { %v3370_v32 = vadd.f32 %v3234_v56, %v3074_v25  ;;  %4177 = vmatmul.msk.f32.gmra.mxu2 %vm389_vm2, %v4434_v22  ;;  %v8338_v56 = vld [vmem:[#allocation72_spill] sm:$0xff] }
 0x3f7   :  { %v3237_v14 = vpop.f32.mrf.mxu0  ;;  %v2489_v1 = vadd.f32 %v7406_v53, %v8338_v56 }
 0x3f8   :  { %v3438_v8 = vadd.f32 %v6984_v40, %v3370_v32  ;;  %4243 = vmatmul.msk.f32.gmra.mxu3 %vm389_vm2, %v8334_v36  ;;  %v8340_v32 = vld [vmem:[#allocation128_spill] sm:$0xff] }
 0x3f9   :  { %v2643_v2 = vpop.f32.mrf.mxu2  ;;  %v2490_v22 = vadd.f32 %v7422_v16, %v8340_v32 }
 0x3fa   :  { %v3502_v24 = vmax.f32 %v3438_v8, 0.0  ;;  %v2777_v46 = vadd.f32 %v2643_v2, %v2487_v31  ;;  %v7454_v37 = vpop.f32.mrf.mxu1  ;;  %4309 = vmatmul.msk.f32.gmra.mxu0 %vm389_vm2, %v6377_v48  ;;  %v8341_v31 = vld [vmem:[#allocation20_spill] sm:$0xff] }
 0x3fb   :  { %v2941_v55 = vpop.f32.mrf.mxu3 }
 0x3fc   :  { %v3594_v60 = vsel %vm3538_vm4, %v3502_v24, 0.0  ;;  %v3075_v42 = vadd.f32 %v2941_v55, %v2777_v46 }
 0x3fd   :  { %v3595_v20 = vadd.f32 %v3594_v60, %v3593_v6  ;;  %4116 = vmatmul.msk.f32.gmra.mxu1 %vm389_vm2, %v6450_v50  ;;  %v4437_v6 = vld [vmem:[%s7824_s0 + $0x2a0] sm:$0xff] }
 0x3fe   :  { %v3371_v62 = vadd.f32 %v3237_v14, %v3075_v42  ;;  %4178 = vmatmul.msk.f32.gmra.mxu2 %vm389_vm2, %v4435_v39  ;;  %v7505_v14 = vld [vmem:[%s7826_s2] ss:$0 sm:$0xff]  ;;  %v8342_v42 = vld [vmem:[#allocation134_spill] sm:$0xff] }
 0x3ff   :  { %v3240_v45 = vpop.f32.mrf.mxu0 }
 0x400   :  { %v3439_v48 = vadd.f32 %v6984_v40, %v3371_v62  ;;  %4244 = vmatmul.msk.f32.gmra.mxu3 %vm389_vm2, %v8336_v21  ;;  %v4439_v62 = vld [vmem:[%s7824_s0 + $0x2a8] sm:$0xff] }
 0x401   :  { %v2646_v13 = vpop.f32.mrf.mxu2 }
 0x402   :  { %v3503_v61 = vmax.f32 %v3439_v48, 0.0  ;;  %v2778_v54 = vadd.f32 %v2646_v13, %v2488_v9  ;;  %v7470_v43 = vpop.f32.mrf.mxu1  ;;  %4310 = vmatmul.msk.f32.gmra.mxu0 %vm389_vm2, %v6401_v57 }
 0x403   :  { %v2944_v51 = vpop.f32.mrf.mxu3 }
 0x404   :  { %v3596_v0 = vsel %vm3538_vm4, %v3503_v61, 0.0  ;;  %v3076_v23 = vadd.f32 %v2944_v51, %v2778_v54  ;;  %v8345_v51 = vld [vmem:[#allocation90_spill] sm:$0xff] }
 0x405   :  { %v3597_v17 = vadd.f32 %v3596_v0, %v3595_v20  ;;  %4117 = vmatmul.msk.f32.gmra.mxu1 %vm389_vm2, %v8337_v52 }
 0x406   :  { %v3372_v26 = vadd.f32 %v3240_v45, %v3076_v23  ;;  %4179 = vmatmul.msk.f32.gmra.mxu2 %vm389_vm2, %v4436_v38  ;;  %v8343_v45 = vld [vmem:[#allocation129_spill] sm:$0xff] }
 0x407   :  { %v3243_v15 = vpop.f32.mrf.mxu0 }
 0x408   :  { %v3440_v57 = vadd.f32 %v6984_v40, %v3372_v26  ;;  %4245 = vmatmul.msk.f32.gmra.mxu3 %vm389_vm2, %v8339_v10  ;;  %v3682_v40 = vld [vmem:[%s7827_s3 + $0x18] sm:$0xff] }
 0x409   :  { %v2649_v18 = vpop.f32.mrf.mxu2  ;;  %3709 = vmatpush.msrb.mxu1 %v3682_v40 }
 0x40a   :  { %v3504_v49 = vmax.f32 %v3440_v57, 0.0  ;;  %v2779_v59 = vadd.f32 %v2649_v18, %v2489_v1  ;;  %v7486_v41 = vpop.f32.mrf.mxu1  ;;  %4311 = vmatmul.msk.f32.gmra.mxu0 %vm389_vm2, %v8332_v30 }
 0x40b   :  { %v2947_v27 = vpop.f32.mrf.mxu3 }
 0x40c   :  { %v3598_v19 = vsel %vm3538_vm4, %v3504_v49, 0.0  ;;  %v3077_v28 = vadd.f32 %v2947_v27, %v2779_v59 }
 0x40d   :  { %v3599_v25 = vadd.f32 %v3598_v19, %v3597_v17  ;;  %4118 = vmatmul.msk.f32.gmra.mxu1 %vm389_vm2, %v6499_v63  ;;  %v8346_v17 = vld [vmem:[#allocation131_spill] sm:$0xff]  ;;  %v8348_v19 = vld [vmem:[#allocation137_spill] sm:$0xff] }
 0x40e   :  { %v3373_v53 = vadd.f32 %v3243_v15, %v3077_v28  ;;  %4180 = vmatmul.msk.f32.gmra.mxu2 %vm389_vm2, %v4437_v6  ;;  %v2492_v26 = vadd.f32 %v7454_v37, %v8346_v17  ;;  %v8347_v15 = vld [vmem:[#allocation30_spill] sm:$0xff] }
 0x40f   :  { %v3246_v30 = vpop.f32.mrf.mxu0 }
 0x410   :  { %v3441_v44 = vadd.f32 %v7505_v14, %v3373_v53  ;;  %4246 = vmatmul.msk.f32.gmra.mxu3 %vm389_vm2, %v8341_v31  ;;  %v8349_v53 = vld [vmem:[#allocation80_spill] sm:$0xff] }
 0x411   :  { %v2652_v8 = vpop.f32.mrf.mxu2 }
 0x412   :  { %v3505_v36 = vmax.f32 %v3441_v44, 0.0  ;;  %v2780_v2 = vadd.f32 %v2652_v8, %v2490_v22  ;;  %v7510_v24 = vpop.f32.mrf.mxu1  ;;  %4312 = vmatmul.msk.f32.gmra.mxu0 %vm389_vm2, %v6450_v50  ;;  %v2491_v50 = vadd.f32 %v7438_v29, %v8343_v45  ;;  %v4440_v29 = vld [vmem:[%s7824_s0 + $0x2b8] sm:$0xff]  ;;  %v8353_v45 = vld [vmem:[#allocation41_spill] sm:$0xff] }
 0x413   :  { %v2950_v46 = vpop.f32.mrf.mxu3 }
 0x414   :  { %v3600_v16 = vsel %vm3538_vm4, %v3505_v36, 0.0  ;;  %v3078_v55 = vadd.f32 %v2950_v46, %v2780_v2 }
 0x415   :  { %v7515_v60 = vadd.f32 %v3600_v16, %v3599_v25  ;;  %4119 = vmatmul.msk.f32.gmra.mxu1 %vm389_vm2, %v8342_v42  ;;  %v4441_v25 = vld [vmem:[%s7824_s0 + $0x2c0] sm:$0xff]  ;;  %v8351_v16 = vld [vmem:[#allocation95_spill] sm:$0xff] }
 0x416   :  { %v3374_v20 = vadd.f32 %v3246_v30, %v3078_v55  ;;  %4181 = vmatmul.msk.f32.gmra.mxu2 %vm389_vm2, %v4439_v62  ;;  %v8350_v30 = vld [vmem:[#allocation36_spill] sm:$0xff]  ;;  %v4442_v55 = vld [vmem:[%s7824_s0 + $0x2d0] sm:$0xff]  ;;  %v8352_v62 = vld [vmem:[#allocation133_spill] sm:$0xff] }
 0x417   :  { %v3249_v39 = vpop.f32.mrf.mxu0 }
 0x418   :  { %4247 = vmatmul.msk.f32.gmra.mxu3 %vm389_vm2, %v8344_v33  ;;  %v3442_v61 = vadd.f32 %v7505_v14, %v3374_v20 }
 0x419   :  { %v2655_v9 = vpop.f32.mrf.mxu2 }
 0x41a   :  { %v2781_v48 = vadd.f32 %v2655_v9, %v2491_v50  ;;  %v7527_v21 = vpop.f32.mrf.mxu1  ;;  %4313 = vmatmul.msk.f32.gmra.mxu0 %vm389_vm2, %v8337_v52  ;;  %v3506_v38 = vmax.f32 %v3442_v61, 0.0 }
 0x41b   :  { %v2953_v13 = vpop.f32.mrf.mxu3 }
 0x41c   :  { %v3079_v54 = vadd.f32 %v2953_v13, %v2781_v48  ;;  %v3608_v49 = vsel %vm3538_vm4, %v3506_v38, 0.0  ;;  %v8354_v13 = vld [vmem:[#allocation139_spill] sm:$0xff] }
 0x41d   :  { %4120 = vmatmul.msk.f32.gmra.mxu1 %vm389_vm2, %v8345_v51 }
 0x41e   :  { %v3375_v0 = vadd.f32 %v3249_v39, %v3079_v54  ;;  %4182 = vmatmul.msk.f32.gmra.mxu2 %vm389_vm2, %v4440_v29  ;;  %v2494_v39 = vadd.f32 %v7486_v41, %v8352_v62 }
 0x41f   :  { %v3252_v23 = vpop.f32.mrf.mxu0 }
 0x420   :  { %v3443_v52 = vadd.f32 %v7505_v14, %v3375_v0  ;;  %4248 = vmatmul.msk.f32.gmra.mxu3 %vm389_vm2, %v8347_v15 }
 0x421   :  { %v2658_v56 = vpop.f32.mrf.mxu2 }
 0x422   :  { %v3507_v1 = vmax.f32 %v3443_v52, 0.0  ;;  %v2782_v57 = vadd.f32 %v2658_v56, %v2492_v26  ;;  %v7543_v10 = vpop.f32.mrf.mxu1  ;;  %4314 = vmatmul.msk.f32.gmra.mxu0 %vm389_vm2, %v6499_v63  ;;  %v2493_v63 = vadd.f32 %v7470_v43, %v8349_v53  ;;  %v4443_v26 = vld [vmem:[%s7824_s0 + $0x2d8] sm:$0xff] }
 0x423   :  { %v2956_v18 = vpop.f32.mrf.mxu3  ;;  %v8357_v56 = vld [vmem:[#allocation47_spill] sm:$0xff] }
 0x424   :  { %v3609_v59 = vsel %vm3538_vm4, %v3507_v1, 0.0  ;;  %v3080_v37 = vadd.f32 %v2956_v18, %v2782_v57 }
 0x425   :  { %v3610_v27 = vadd.f32 %v3609_v59, %v3608_v49  ;;  %4121 = vmatmul.msk.f32.gmra.mxu1 %vm389_vm2, %v8348_v19  ;;  %v8358_v59 = vld [vmem:[#allocation141_spill] sm:$0xff] }
 0x426   :  { %v3376_v28 = vadd.f32 %v3252_v23, %v3080_v37  ;;  %4183 = vmatmul.msk.f32.gmra.mxu2 %vm389_vm2, %v4441_v25  ;;  %v8355_v23 = vld [vmem:[#allocation140_spill] sm:$0xff] }
 0x427   :  { %v3255_v40 = vpop.f32.mrf.mxu0 }
 0x428   :  { %v3444_v6 = vadd.f32 %v7505_v14, %v3376_v28  ;;  %4249 = vmatmul.msk.f32.gmra.mxu3 %vm389_vm2, %v8350_v30 }
 0x429   :  { %v2661_v32 = vpop.f32.mrf.mxu2 }
 0x42a   :  { %v3508_v22 = vmax.f32 %v3444_v6, 0.0  ;;  %v2783_v44 = vadd.f32 %v2661_v32, %v2493_v63  ;;  %v7560_v31 = vpop.f32.mrf.mxu1  ;;  %4315 = vmatmul.msk.f32.gmra.mxu0 %vm389_vm2, %v8342_v42  ;;  %v4444_v63 = vld [vmem:[%s7824_s0 + $0x2e8] sm:$0xff] }
 0x42b   :  { %v2959_v8 = vpop.f32.mrf.mxu3 }
 0x42c   :  { %v3611_v36 = vsel %vm3538_vm4, %v3508_v22, 0.0  ;;  %v3081_v2 = vadd.f32 %v2959_v8, %v2783_v44  ;;  %v8361_v22 = vld [vmem:[#allocation52_spill] sm:$0xff] }
 0x42d   :  { %v3612_v46 = vadd.f32 %v3611_v36, %v3610_v27  ;;  %4122 = vmatmul.msk.f32.gmra.mxu1 %vm389_vm2, %v8351_v16 }
 0x42e   :  { %v3377_v43 = vadd.f32 %v3255_v40, %v3081_v2  ;;  %4184 = vmatmul.msk.f32.gmra.mxu2 %vm389_vm2, %v4442_v55  ;;  %v8359_v40 = vld [vmem:[#allocation100_spill] sm:$0xff] }
 0x42f   :  { %v3258_v20 = vpop.f32.mrf.mxu0 }
 0x430   :  { %v3445_v42 = vadd.f32 %v7505_v14, %v3377_v43  ;;  %4250 = vmatmul.msk.f32.gmra.mxu3 %vm389_vm2, %v8353_v45  ;;  %v4445_v45 = vld [vmem:[%s7824_s0 + $0x2f0] sm:$0xff] }
 0x431   :  { %v2664_v50 = vpop.f32.mrf.mxu2 }
 0x432   :  { %v3509_v33 = vmax.f32 %v3445_v42, 0.0  ;;  %v2784_v9 = vadd.f32 %v2664_v50, %v2494_v39  ;;  %v2389_v48 = vpop.f32.mrf.mxu1  ;;  %4316 = vmatmul.msk.f32.gmra.mxu0 %vm389_vm2, %v8345_v51  ;;  %v8356_v51 = vld [vmem:[#allocation85_spill] sm:$0xff]  ;;  %v8363_v39 = vld [vmem:[#allocation103_spill] sm:$0xff] }
 0x433   :  { %v7579_v61 = vadd.f32 %v2389_v48, %v8354_v13  ;;  %v2962_v54 = vpop.f32.mrf.mxu3  ;;  %v2495_v52 = vadd.f32 %v7510_v24, %v8356_v51  ;;  %v8365_v48 = vld [vmem:[#allocation56_spill] sm:$0xff] }
 0x434   :  { %v3613_v0 = vsel %vm3538_vm4, %v3509_v33, 0.0  ;;  %v3082_v29 = vadd.f32 %v2962_v54, %v2784_v9 }
 0x435   :  { %v3614_v41 = vadd.f32 %v3613_v0, %v3612_v46  ;;  %4123 = vmatmul.msk.f32.gmra.mxu1 %vm389_vm2, %v8355_v23  ;;  %v8362_v46 = vld [vmem:[#allocation75_spill] sm:$0xff] }
 0x436   :  { %v3378_v17 = vadd.f32 %v3258_v20, %v3082_v29  ;;  %4185 = vmatmul.msk.f32.gmra.mxu2 %vm389_vm2, %v4443_v26 }
 0x437   :  { %v3261_v38 = vpop.f32.mrf.mxu0 }
 0x438   :  { %v3446_v15 = vadd.f32 %v7505_v14, %v3378_v17  ;;  %4251 = vmatmul.msk.f32.gmra.mxu3 %vm389_vm2, %v8357_v56 }
 0x439   :  { %v2667_v1 = vpop.f32.mrf.mxu2 }
 0x43a   :  { %v3510_v57 = vmax.f32 %v3446_v15, 0.0  ;;  %v2785_v18 = vadd.f32 %v2667_v1, %v2495_v52  ;;  %v2392_v49 = vpop.f32.mrf.mxu1  ;;  %4317 = vmatmul.msk.f32.gmra.mxu0 %vm389_vm2, %v8348_v19  ;;  %v8360_v19 = vld [vmem:[#allocation135_spill] sm:$0xff]  ;;  %v8367_v52 = vld [vmem:[#allocation106_spill] sm:$0xff] }
 0x43b   :  { %v7596_v37 = vadd.f32 %v2392_v49, %v8358_v59  ;;  %v2965_v27 = vpop.f32.mrf.mxu3  ;;  %v2496_v30 = vadd.f32 %v7527_v21, %v8360_v19  ;;  %v3681_v15 = vld [vmem:[%s7827_s3 + $0x10] sm:$0xff] }
 0x43c   :  { %v3615_v28 = vsel %vm3538_vm4, %v3510_v57, 0.0  ;;  %v3083_v25 = vadd.f32 %v2965_v27, %v2785_v18  ;;  %3710 = vmatpush.msrb.mxu1 %v3681_v15  ;;  %v8368_v57 = vld [vmem:[#allocation138_spill] sm:$0xff]  ;;  %v8369_v59 = vld [vmem:[#allocation59_spill] sm:$0xff] }
 0x43d   :  { %v3616_v24 = vadd.f32 %v3615_v28, %v3614_v41  ;;  %4124 = vmatmul.msk.f32.gmra.mxu1 %vm389_vm2, %v8359_v40  ;;  %v8366_v41 = vld [vmem:[#allocation77_spill] sm:$0xff]  ;;  %v2498_v18 = vadd.f32 %v7560_v31, %v8368_v57 }
 0x43e   :  { %v3379_v53 = vadd.f32 %v3261_v38, %v3083_v25  ;;  %4186 = vmatmul.msk.f32.gmra.mxu2 %vm389_vm2, %v4444_v63 }
 0x43f   :  { %v3264_v6 = vpop.f32.mrf.mxu0 }
 0x440   :  { %v3447_v32 = vadd.f32 %v7505_v14, %v3379_v53  ;;  %4252 = vmatmul.msk.f32.gmra.mxu3 %vm389_vm2, %v8361_v22  ;;  %v8370_v53 = vld [vmem:[#allocation79_spill] sm:$0xff] }
 0x441   :  { %v2670_v44 = vpop.f32.mrf.mxu2 }
 0x442   :  { %v3511_v8 = vmax.f32 %v3447_v32, 0.0  ;;  %v2786_v36 = vadd.f32 %v2670_v44, %v2496_v30  ;;  %v2395_v2 = vpop.f32.mrf.mxu1  ;;  %4318 = vmatmul.msk.f32.gmra.mxu0 %vm389_vm2, %v8351_v16  ;;  %v8364_v16 = vld [vmem:[#allocation136_spill] sm:$0xff]  ;;  %v4447_v32 = vld [vmem:[%s7824_s0 + $0x330] sm:$0xff] }
 0x443   :  { %v7613_v43 = vadd.f32 %v2395_v2, %v8362_v46  ;;  %v2968_v55 = vpop.f32.mrf.mxu3  ;;  %v2497_v33 = vadd.f32 %v7543_v10, %v8364_v16  ;;  %v2231_v22 = vrot.slane %v4447_v32, 2 }
 0x444   :  { %v3617_v20 = vsel %vm3538_vm4, %v3511_v8, 0.0  ;;  %v3084_v62 = vadd.f32 %v2968_v55, %v2786_v36  ;;  %v4449_v36 = vld [vmem:[%s7824_s0 + $0x308] sm:$0xff] }
 0x445   :  { %v3618_v21 = vadd.f32 %v3617_v20, %v3616_v24  ;;  %4125 = vmatmul.msk.f32.gmra.mxu1 %vm389_vm2, %v8363_v39  ;;  %v8371_v55 = vld [vmem:[#allocation62_spill] sm:$0xff] }
 0x446   :  { %v3380_v42 = vadd.f32 %v3264_v6, %v3084_v62  ;;  %4187 = vmatmul.msk.f32.gmra.mxu2 %vm389_vm2, %v4445_v45 }
 0x447   :  { %v3267_v50 = vpop.f32.mrf.mxu0 }
 0x448   :  { %v3448_v9 = vadd.f32 %v7505_v14, %v3380_v42  ;;  %4253 = vmatmul.msk.f32.gmra.mxu3 %vm389_vm2, %v8365_v48 }
 0x449   :  { %v2673_v13 = vpop.f32.mrf.mxu2 }
 0x44a   :  { %v3512_v54 = vmax.f32 %v3448_v9, 0.0  ;;  %v2787_v0 = vadd.f32 %v2673_v13, %v2497_v33  ;;  %v2398_v29 = vpop.f32.mrf.mxu1  ;;  %4319 = vmatmul.msk.f32.gmra.mxu0 %vm389_vm2, %v8355_v23  ;;  %v4446_v23 = vld [vmem:[%s7824_s0 + $0x300] sm:$0xff] }
 0x44b   :  { %v7630_v17 = vadd.f32 %v2398_v29, %v8366_v41  ;;  %v2971_v26 = vpop.f32.mrf.mxu3  ;;  %v8372_v29 = vld [vmem:[#allocation65_spill] sm:$0xff] }
 0x44c   :  { %v3619_v38 = vsel %vm3538_vm4, %v3512_v54, 0.0  ;;  %v3085_v51 = vadd.f32 %v2971_v26, %v2787_v0 }
 0x44d   :  { %v3620_v10 = vadd.f32 %v3619_v38, %v3618_v21  ;;  %4126 = vmatmul.msk.f32.gmra.mxu1 %vm389_vm2, %v8367_v52 }
 0x44e   :  { %v3381_v56 = vadd.f32 %v3267_v50, %v3085_v51  ;;  %4188 = vmatmul.msk.f32.gmra.mxu2 %vm389_vm2, %v4446_v23 }
 0x44f   :  { %v3270_v1 = vpop.f32.mrf.mxu0 }
 0x450   :  { %v3449_v49 = vadd.f32 %v7505_v14, %v3381_v56  ;;  %4254 = vmatmul.msk.f32.gmra.mxu3 %vm389_vm2, %v8369_v59  ;;  %v8373_v59 = vld [vmem:[#allocation68_spill] sm:$0xff] }
 0x451   :  { %v2676_v27 = vpop.f32.mrf.mxu2 }
 0x452   :  { %v3513_v28 = vmax.f32 %v3449_v49, 0.0  ;;  %v2788_v25 = vadd.f32 %v2676_v27, %v2498_v18  ;;  %v2401_v24 = vpop.f32.mrf.mxu1  ;;  %4320 = vmatmul.msk.f32.gmra.mxu0 %vm389_vm2, %v8359_v40  ;;  %v7661_v40 = vld [vmem:[%s7824_s0 + $0x338] sm:$0xff] }
 0x453   :  { %v7650_v63 = vadd.f32 %v2401_v24, %v8370_v53  ;;  %v2974_v6 = vpop.f32.mrf.mxu3  ;;  %v2232_v44 = vrot.slane %v7661_v40, 2  ;;  %v8374_v24 = vld [vmem:[#allocation82_spill] sm:$0xff] }
 0x454   :  { %v3621_v19 = vsel %vm3538_vm4, %v3513_v28, 0.0  ;;  %v3086_v30 = vadd.f32 %v2974_v6, %v2788_v25 }
 0x455   :  { %v3622_v31 = vadd.f32 %v3621_v19, %v3620_v10  ;;  %4127 = vmatmul.msk.f32.gmra.mxu1 %vm389_vm2, %v6716_v34  ;;  %v2233_v45 = vsel %vm1071_vm3, %v2231_v22, %v2232_v44 }
 0x456   :  { %v3382_v8 = vadd.f32 %v3270_v1, %v3086_v30  ;;  %4189 = vmatmul.msk.f32.gmra.mxu2 %vm389_vm2, %v4449_v36  ;;  %v8375_v36 = vld [vmem:[#allocation142_spill] sm:$0xff] }
 0x457   :  { %v3273_v2 = vpop.f32.mrf.mxu0 }
 0x458   :  { %v3450_v46 = vadd.f32 %v7505_v14, %v3382_v8  ;;  %4255 = vmatmul.msk.f32.gmra.mxu3 %vm389_vm2, %v8371_v55  ;;  %v8376_v55 = vld [vmem:[#allocation71_spill] sm:$0xff] }
 0x459   :  { %v2679_v20 = vpop.f32.mrf.mxu2 }
 0x45a   :  { %v3514_v62 = vmax.f32 %v3450_v46, 0.0  ;;  %v2789_v21 = vadd.f32 %v2679_v20, %v7579_v61  ;;  %v2404_v42 = vpop.f32.mrf.mxu1  ;;  %4321 = vmatmul.msk.f32.gmra.mxu0 %vm389_vm2, %v8363_v39  ;;  %v4450_v61 = vld [vmem:[%s7824_s0 + $0x318] sm:$0xff]  ;;  %v4451_v39 = vld [vmem:[%s7824_s0 + $0x340] sm:$0x3] }
 0x45b   :  { %v7676_v50 = vadd.f32 %v2404_v42, %v6720_v58  ;;  %v2977_v16 = vpop.f32.mrf.mxu3  ;;  %v2234_v58 = vrot.slane %v4451_v39, 2 }
 0x45c   :  { %v3623_v33 = vsel %vm3538_vm4, %v3514_v62, 0.0  ;;  %v3087_v9 = vadd.f32 %v2977_v16, %v2789_v21 }
 0x45d   :  { %v3624_v48 = vadd.f32 %v3623_v33, %v3622_v31  ;;  %4128 = vmatmul.msk.f32.gmra.mxu1 %vm389_vm2, %v2233_v45  ;;  %v2235_v10 = vsel %vm1071_vm3, %v2232_v44, %v2234_v58  ;;  %v126_v33 = vld [vmem:[%s7824_s0 + $0x348] sm:$0xff] }
 0x45e   :  { %v3383_v13 = vadd.f32 %v3273_v2, %v3087_v9  ;;  %4190 = vmatmul.msk.f32.gmra.mxu2 %vm389_vm2, %v4450_v61  ;;  %v2819_v61 = vrot.slane %v126_v33, 1 }
 0x45f   :  { %v3276_v54 = vpop.f32.mrf.mxu0 }
 0x460   :  { %v3451_v0 = vadd.f32 %v7505_v14, %v3383_v13  ;;  %4256 = vmatmul.msk.f32.gmra.mxu3 %vm389_vm2, %v8372_v29 }
 0x461   :  { %v2682_v41 = vpop.f32.mrf.mxu2 }
 0x462   :  { %v3515_v26 = vmax.f32 %v3451_v0, 0.0  ;;  %v2790_v38 = vadd.f32 %v2682_v41, %v7596_v37  ;;  %v2407_v51 = vpop.f32.mrf.mxu1  ;;  %4322 = vmatmul.msk.f32.gmra.mxu0 %vm389_vm2, %v8367_v52  ;;  %v4452_v37 = vld [vmem:[%s7824_s0 + $0x320] sm:$0xff] }
 0x463   :  { %v7695_v15 = vadd.f32 %v2407_v51, %v6734_v4  ;;  %v2980_v56 = vpop.f32.mrf.mxu3  ;;  %v8378_v0 = vld [vmem:[#allocation84_spill] sm:$0xff] }
 0x464   :  { %v3625_v23 = vsel %vm3538_vm4, %v3515_v26, 0.0  ;;  %v3088_v1 = vadd.f32 %v2980_v56, %v2790_v38  ;;  %v3115_v26 = vrot.slane %v126_v33, 2 }
 0x465   :  { %v3626_v57 = vadd.f32 %v3625_v23, %v3624_v48  ;;  %4129 = vmatmul.msk.f32.gmra.mxu1 %vm389_vm2, %v2235_v10  ;;  %v8377_v48 = vld [vmem:[#allocation109_spill] sm:$0xff] }
 0x466   :  { %v3384_v18 = vadd.f32 %v3276_v54, %v3088_v1  ;;  %4191 = vmatmul.msk.f32.gmra.mxu2 %vm389_vm2, %v4452_v37 }
 0x467   :  { %v3279_v49 = vpop.f32.mrf.mxu0 }
 0x468   :  { %v3452_v52 = vadd.f32 %v7505_v14, %v3384_v18  ;;  %4257 = vmatmul.msk.f32.gmra.mxu3 %vm389_vm2, %v8373_v59 }
 0x469   :  { %v2685_v4 = vpop.f32.mrf.mxu2 }
 0x46a   :  { %v3516_v27 = vmax.f32 %v3452_v52, 0.0  ;;  %v2791_v28 = vadd.f32 %v2685_v4, %v7613_v43  ;;  %v2410_v25 = vpop.f32.mrf.mxu1  ;;  %4323 = vmatmul.msk.f32.gmra.mxu0 %vm389_vm2, %v6716_v34 }
 0x46b   :  { %v7710_v53 = vadd.f32 %v2410_v25, %v8374_v24  ;;  %v2983_v6 = vpop.f32.mrf.mxu3 }
 0x46c   :  { %v3627_v19 = vsel %vm3538_vm4, %v3516_v27, 0.0  ;;  %v3089_v30 = vadd.f32 %v2983_v6, %v2791_v28  ;;  %v8379_v28 = vld [vmem:[#allocation73_spill] sm:$0xff] }
 0x46d   :  { %v3628_v31 = vadd.f32 %v3627_v19, %v3626_v57 }
 0x46e   :  { %v3385_v22 = vadd.f32 %v3279_v49, %v3089_v30  ;;  %4192 = vmatmul.msk.f32.gmra.mxu2 %vm389_vm2, %v4447_v32 }
 0x46f   :  { %v3282_v44 = vpop.f32.mrf.mxu0 }
 0x470   :  { %v3453_v8 = vadd.f32 %v7505_v14, %v3385_v22  ;;  %4258 = vmatmul.msk.f32.gmra.mxu3 %vm389_vm2, %v8375_v36 }
 0x471   :  { %v2688_v43 = vpop.f32.mrf.mxu2 }
 0x472   :  { %v3517_v2 = vmax.f32 %v3453_v8, 0.0  ;;  %v2792_v34 = vadd.f32 %v2688_v43, %v7630_v17  ;;  %v2413_v46 = vpop.f32.mrf.mxu1  ;;  %4324 = vmatmul.msk.f32.gmra.mxu0 %vm389_vm2, %v2233_v45  ;;  %v127_v17 = vld [vmem:[%s7824_s0 + $0x350] sm:$0xff] }
 0x473   :  { %v7720_v20 = vadd.f32 %v2413_v46, %v8376_v55  ;;  %v2986_v62 = vpop.f32.mrf.mxu3  ;;  %v2820_v39 = vrot.slane %v127_v17, 1  ;;  %v3116_v38 = vrot.slane %v127_v17, 2  ;;  %v8380_v55 = vld [vmem:[#allocation16_spill] sm:$0xff] }
 0x474   :  { %v3629_v21 = vsel %vm3538_vm4, %v3517_v2, 0.0  ;;  %v3090_v32 = vadd.f32 %v2986_v62, %v2792_v34 }
 0x475   :  { %v3630_v42 = vadd.f32 %v3629_v21, %v3628_v31  ;;  %v2821_v1 = vsel %vm226_vm1, %v2819_v61, %v2820_v39  ;;  %v3117_v18 = vsel %vm1071_vm3, %v3115_v26, %v3116_v38 }
 0x476   :  { %v3386_v16 = vadd.f32 %v3282_v44, %v3090_v32  ;;  %4193 = vmatmul.msk.f32.gmra.mxu2 %vm389_vm2, %v7661_v40 }
 0x477   :  { %v3285_v45 = vpop.f32.mrf.mxu0 }
 0x478   :  { %v3454_v9 = vadd.f32 %v7505_v14, %v3386_v16  ;;  %4259 = vmatmul.msk.f32.gmra.mxu3 %vm389_vm2, %v8377_v48 }
 0x479   :  { %v2691_v13 = vpop.f32.mrf.mxu2 }
 0x47a   :  { %v3518_v58 = vmax.f32 %v3454_v9, 0.0  ;;  %v2793_v40 = vadd.f32 %v2691_v13, %v7650_v63  ;;  %v2416_v54 = vpop.f32.mrf.mxu1  ;;  %4325 = vmatmul.msk.f32.gmra.mxu0 %vm389_vm2, %v2235_v10  ;;  %v128_v63 = vld [vmem:[%s7824_s0 + $0x358] sm:$0x3] }
 0x47b   :  { %v7737_v29 = vadd.f32 %v2416_v54, %v8378_v0  ;;  %v2989_v41 = vpop.f32.mrf.mxu3  ;;  %v2822_v52 = vrot.slane %v128_v63, 1  ;;  %v3118_v6 = vrot.slane %v128_v63, 2 }
 0x47c   :  { %v3631_v51 = vsel %vm3538_vm4, %v3518_v58, 0.0  ;;  %v3091_v56 = vadd.f32 %v2989_v41, %v2793_v40 }
 0x47d   :  { %v3632_v23 = vadd.f32 %v3631_v51, %v3630_v42  ;;  %v2823_v22 = vsel %vm226_vm1, %v2820_v39, %v2822_v52  ;;  %v3119_v36 = vsel %vm1071_vm3, %v3116_v38, %v3118_v6 }
 0x47e   :  { %v3387_v57 = vadd.f32 %v3285_v45, %v3091_v56  ;;  %4194 = vmatmul.msk.f32.gmra.mxu2 %vm389_vm2, %v126_v33  ;;  %v3680_v33 = vld [vmem:[%s7827_s3 + $0x8] sm:$0xff] }
 0x47f   :  { %v3288_v10 = vpop.f32.mrf.mxu0  ;;  %3711 = vmatpush.msrb.mxu1 %v3680_v33 }
 0x480   :  { %v3455_v37 = vadd.f32 %v7505_v14, %v3387_v57  ;;  %4260 = vmatmul.msk.f32.gmra.mxu3 %vm389_vm2, %v2821_v1 }
 0x481   :  { %v2694_v49 = vpop.f32.mrf.mxu2 }
 0x482   :  { %v3519_v59 = vmax.f32 %v3455_v37, 0.0  ;;  %v2794_v4 = vadd.f32 %v2694_v49, %v7676_v50  ;;  %v2419_v27 = vpop.f32.mrf.mxu1  ;;  %4326 = vmatmul.msk.f32.gmra.mxu0 %vm389_vm2, %v3117_v18 }
 0x483   :  { %v2509_v25 = vadd.f32 %v2419_v27, %v8379_v28  ;;  %v2992_v24 = vpop.f32.mrf.mxu3 }
 0x484   :  { %v3633_v19 = vsel %vm3538_vm4, %v3519_v59, 0.0  ;;  %v3092_v30 = vadd.f32 %v2992_v24, %v2794_v4 }
 0x485   :  { %v3634_v31 = vadd.f32 %v3633_v19, %v3632_v23 }
 0x486   :  { %v3388_v44 = vadd.f32 %v3288_v10, %v3092_v30  ;;  %4195 = vmatmul.msk.f32.gmra.mxu2 %vm389_vm2, %v127_v17 }
 0x487   :  { %v3291_v8 = vpop.f32.mrf.mxu0 }
 0x488   :  { %v3456_v50 = vadd.f32 %v7505_v14, %v3388_v44  ;;  %4261 = vmatmul.msk.f32.gmra.mxu3 %vm389_vm2, %v2823_v22 }
 0x489   :  { %v2697_v43 = vpop.f32.mrf.mxu2 }
 0x48a   :  { %v3520_v2 = vmax.f32 %v3456_v50, 0.0  ;;  %v2795_v34 = vadd.f32 %v2697_v43, %v7695_v15  ;;  %v2422_v46 = vpop.f32.mrf.mxu1  ;;  %4327 = vmatmul.msk.f32.gmra.mxu0 %vm389_vm2, %v3119_v36 }
 0x48b   :  { %v2510_v62 = vadd.f32 %v2422_v46, %v8380_v55  ;;  %v2995_v21 = vpop.f32.mrf.mxu3 }
 0x48c   :  { %v3635_v32 = vsel %vm3538_vm4, %v3520_v2, 0.0  ;;  %v3093_v42 = vadd.f32 %v2995_v21, %v2795_v34 }
 0x48d   :  { %v3636_v16 = vadd.f32 %v3635_v32, %v3634_v31 }
 0x48e   :  { %v3389_v17 = vadd.f32 %v3291_v8, %v3093_v42 }
 0x48f   :  { %v3294_v45 = vpop.f32.mrf.mxu0 }
 0x490   :  { %v3457_v9 = vadd.f32 %v7505_v14, %v3389_v17 }
 0x491   :  { %v2700_v15 = vpop.f32.mrf.mxu2 }
 0x492   :  { %v3521_v48 = vmax.f32 %v3457_v9, 0.0  ;;  %v2796_v13 = vadd.f32 %v2700_v15, %v7710_v53  ;;  %v2425_v18 = vpop.f32.mrf.mxu1 }
 0x493   :  { %v2998_v61 = vpop.f32.mrf.mxu3 }
 0x494   :  { %v3637_v39 = vsel %vm3538_vm4, %v3521_v48, 0.0  ;;  %v3094_v58 = vadd.f32 %v2998_v61, %v2796_v13 }
 0x495   :  { %v3638_v40 = vadd.f32 %v3637_v39, %v3636_v16 }
 0x496   :  { %v3390_v54 = vadd.f32 %v3294_v45, %v3094_v58  ;;  %v8381_v45 = vld [vmem:[#allocation87_spill] sm:$0xff] }
 0x497   :  { %v3297_v0 = vpop.f32.mrf.mxu0  ;;  %v2511_v9 = vadd.f32 %v2425_v18, %v8381_v45 }
 0x498   :  { %v3458_v41 = vadd.f32 %v7505_v14, %v3390_v54 }
 0x499   :  { %v2703_v26 = vpop.f32.mrf.mxu2 }
 0x49a   :  { %v3522_v38 = vmax.f32 %v3458_v41, 0.0  ;;  %v2797_v51 = vadd.f32 %v2703_v26, %v7720_v20  ;;  %v2428_v22 = vpop.f32.mrf.mxu1  ;;  %v8382_v26 = vld [vmem:[#allocation74_spill] sm:$0xff] }
 0x49b   :  { %v3001_v56 = vpop.f32.mrf.mxu3 }
 0x49c   :  { %v3639_v23 = vsel %vm3538_vm4, %v3522_v38, 0.0  ;;  %v3095_v1 = vadd.f32 %v3001_v56, %v2797_v51  ;;  %v2512_v38 = vadd.f32 %v2428_v22, %v8382_v26 }
 0x49d   :  { %v3640_v57 = vadd.f32 %v3639_v23, %v3638_v40 }
 0x49e   :  { %v3391_v63 = vadd.f32 %v3297_v0, %v3095_v1 }
 0x49f   :  { %v3300_v53 = vpop.f32.mrf.mxu0 }
 0x4a0   :  { %v3459_v10 = vadd.f32 %v7505_v14, %v3391_v63 }
 0x4a1   :  { %v2706_v37 = vpop.f32.mrf.mxu2 }
 0x4a2   :  { %v3523_v49 = vmax.f32 %v3459_v10, 0.0  ;;  %v2798_v52 = vadd.f32 %v2706_v37, %v7737_v29  ;;  %v2431_v16 = vpop.f32.mrf.mxu1 }
 0x4a3   :  { %v3004_v59 = vpop.f32.mrf.mxu3 }
 0x4a4   :  { %v3641_v4 = vsel %vm3538_vm4, %v3523_v49, 0.0  ;;  %v3096_v27 = vadd.f32 %v3004_v59, %v2798_v52  ;;  %v8383_v49 = vld [vmem:[#allocation21_spill] sm:$0xff] }
 0x4a5   :  { %v3642_v28 = vadd.f32 %v3641_v4, %v3640_v57  ;;  %v2513_v52 = vadd.f32 %v2431_v16, %v8383_v49 }
 0x4a6   :  { %v3392_v20 = vadd.f32 %v3300_v53, %v3096_v27 }
 0x4a7   :  { %v3303_v24 = vpop.f32.mrf.mxu0 }
 0x4a8   :  { %v3460_v6 = vadd.f32 %v7505_v14, %v3392_v20 }
 0x4a9   :  { %v2709_v19 = vpop.f32.mrf.mxu2 }
 0x4aa   :  { %v3524_v30 = vmax.f32 %v3460_v6, 0.0  ;;  %v2799_v31 = vadd.f32 %v2709_v19, %v2509_v25  ;;  %v2434_v0 = vpop.f32.mrf.mxu1 }
 0x4ab   :  { %v3007_v44 = vpop.f32.mrf.mxu3 }
 0x4ac   :  { %v3643_v8 = vsel %vm3538_vm4, %v3524_v30, 0.0  ;;  %v3097_v36 = vadd.f32 %v3007_v44, %v2799_v31  ;;  %v3679_v31 = vld [vmem:[%s7827_s3] sm:$0xff] }
 0x4ad   :  { %v3644_v50 = vadd.f32 %v3643_v8, %v3642_v28  ;;  %3712 = vmatpush.msrb.mxu1 %v3679_v31  ;;  %v8384_v8 = vld [vmem:[#allocation89_spill] sm:$0xff] }
 0x4ae   :  { %v3393_v43 = vadd.f32 %v3303_v24, %v3097_v36  ;;  %v2514_v36 = vadd.f32 %v2434_v0, %v8384_v8 }
 0x4af   :  { %v3306_v29 = vpop.f32.mrf.mxu0 }
 0x4b0   :  { %v3461_v2 = vadd.f32 %v7505_v14, %v3393_v43 }
 0x4b1   :  { %v2712_v34 = vpop.f32.mrf.mxu2 }
 0x4b2   :  { %v3525_v46 = vmax.f32 %v3461_v2, 0.0  ;;  %v2800_v55 = vadd.f32 %v2712_v34, %v2510_v62  ;;  %v2437_v4 = vpop.f32.mrf.mxu1 }
 0x4b3   :  { %v3010_v21 = vpop.f32.mrf.mxu3 }
 0x4b4   :  { %v3645_v32 = vsel %vm3538_vm4, %v3525_v46, 0.0  ;;  %v3098_v42 = vadd.f32 %v3010_v21, %v2800_v55 }
 0x4b5   :  { %v3646_v33 = vadd.f32 %v3645_v32, %v3644_v50 }
 0x4b6   :  { %v3394_v25 = vadd.f32 %v3306_v29, %v3098_v42 }
 0x4b7   :  { %v3309_v17 = vpop.f32.mrf.mxu0 }
 0x4b8   :  { %v3462_v15 = vadd.f32 %v7505_v14, %v3394_v25 }
 0x4b9   :  { %v2715_v48 = vpop.f32.mrf.mxu2 }
 0x4ba   :  { %v3526_v13 = vmax.f32 %v3462_v15, 0.0  ;;  %v2801_v61 = vadd.f32 %v2715_v48, %v2511_v9  ;;  %v2440_v34 = vpop.f32.mrf.mxu1 }
 0x4bb   :  { %v3013_v39 = vpop.f32.mrf.mxu3 }
 0x4bc   :  { %v3647_v58 = vsel %vm3538_vm4, %v3526_v13, 0.0  ;;  %v3099_v40 = vadd.f32 %v3013_v39, %v2801_v61 }
 0x4bd   :  { %v3648_v62 = vadd.f32 %v3647_v58, %v3646_v33  ;;  %v2515_v33 = vadd.f32 %v2437_v4, %v6868_v11 }
 0x4be   :  { %v3395_v54 = vadd.f32 %v3309_v17, %v3099_v40 }
 0x4bf   :  { %v3312_v41 = vpop.f32.mrf.mxu0 }
 0x4c0   :  { %v3463_v51 = vadd.f32 %v7505_v14, %v3395_v54 }
 0x4c1   :  { %v2718_v56 = vpop.f32.mrf.mxu2 }
 0x4c2   :  { %v3527_v23 = vmax.f32 %v3463_v51, 0.0  ;;  %v2802_v1 = vadd.f32 %v2718_v56, %v2512_v38  ;;  %v2443_v61 = vpop.f32.mrf.mxu1 }
 0x4c3   :  { %v3016_v57 = vpop.f32.mrf.mxu3 }
 0x4c4   :  { %v3649_v63 = vsel %vm3538_vm4, %v3527_v23, 0.0  ;;  %v3100_v53 = vadd.f32 %v3016_v57, %v2802_v1 }
 0x4c5   :  { %v3650_v10 = vadd.f32 %v3649_v63, %v3648_v62  ;;  %v2516_v62 = vadd.f32 %v2440_v34, %v6881_v3  ;;  %v2517_v63 = vadd.f32 %v2443_v61, %v6896_v5 }
 0x4c6   :  { %v3396_v18 = vadd.f32 %v3312_v41, %v3100_v53 }
 0x4c7   :  { %v3315_v37 = vpop.f32.mrf.mxu0 }
 0x4c8   :  { %v3464_v59 = vadd.f32 %v7505_v14, %v3396_v18 }
 0x4c9   :  { %v2721_v27 = vpop.f32.mrf.mxu2 }
 0x4ca   :  { %v3528_v28 = vmax.f32 %v3464_v59, 0.0  ;;  %v2803_v20 = vadd.f32 %v2721_v27, %v2513_v52  ;;  %v2446_v1 = vpop.f32.mrf.mxu1 }
 0x4cb   :  { %v3019_v24 = vpop.f32.mrf.mxu3 }
 0x4cc   :  { %v3651_v6 = vsel %vm3538_vm4, %v3528_v28, 0.0  ;;  %v3101_v19 = vadd.f32 %v3019_v24, %v2803_v20  ;;  %v2518_v28 = vadd.f32 %v2446_v1, %v6911_v35 }
 0x4cd   :  { %v3652_v30 = vadd.f32 %v3651_v6, %v3650_v10 }
 0x4ce   :  { %v3397_v22 = vadd.f32 %v3315_v37, %v3101_v19 }
 0x4cf   :  { %v3318_v44 = vpop.f32.mrf.mxu0 }
 0x4d0   :  { %v3465_v50 = vadd.f32 %v7505_v14, %v3397_v22 }
 0x4d1   :  { %v2724_v43 = vpop.f32.mrf.mxu2 }
 0x4d2   :  { %v3529_v29 = vmax.f32 %v3465_v50, 0.0  ;;  %v2804_v2 = vadd.f32 %v2724_v43, %v2514_v36  ;;  %v2449_v24 = vpop.f32.mrf.mxu1 }
 0x4d3   :  { %v3022_v46 = vpop.f32.mrf.mxu3  ;;  %v2519_v50 = vadd.f32 %v2449_v24, %v6926_v7 }
 0x4d4   :  { %v3653_v55 = vsel %vm3538_vm4, %v3529_v29, 0.0  ;;  %v3102_v21 = vadd.f32 %v3022_v46, %v2804_v2 }
 0x4d5   :  { %v3654_v32 = vadd.f32 %v3653_v55, %v3652_v30 }
 0x4d6   :  { %v3398_v42 = vadd.f32 %v3318_v44, %v3102_v21 }
 0x4d7   :  { %v3321_v16 = vpop.f32.mrf.mxu0 }
 0x4d8   :  { %v3466_v25 = vadd.f32 %v7505_v14, %v3398_v42 }
 0x4d9   :  { %v2727_v17 = vpop.f32.mrf.mxu2 }
 0x4da   :  { %v3530_v45 = vmax.f32 %v3466_v25, 0.0  ;;  %v2805_v9 = vadd.f32 %v2727_v17, %v2515_v33  ;;  %v2452_v34 = vpop.f32.mrf.mxu1 }
 0x4db   :  { %v3025_v15 = vpop.f32.mrf.mxu3 }
 0x4dc   :  { %v3655_v48 = vsel %vm3538_vm4, %v3530_v45, 0.0  ;;  %v3103_v13 = vadd.f32 %v3025_v15, %v2805_v9 }
 0x4dd   :  { %v3656_v39 = vadd.f32 %v3655_v48, %v3654_v32 }
 0x4de   :  { %v3399_v58 = vadd.f32 %v3321_v16, %v3103_v13  ;;  %v2520_v16 = vadd.f32 %v2452_v34, %v6941_v12 }
 0x4df   :  { %v3324_v40 = vpop.f32.mrf.mxu0 }
 0x4e0   :  { %v3467_v54 = vadd.f32 %v7505_v14, %v3399_v58 }
 0x4e1   :  { %v2730_v0 = vpop.f32.mrf.mxu2 }
 0x4e2   :  { %v3531_v41 = vmax.f32 %v3467_v54, 0.0  ;;  %v2806_v11 = vadd.f32 %v2730_v0, %v2516_v62  ;;  %v2455_v13 = vpop.f32.mrf.mxu1  ;;  %v3602_v0 = vrot.slane %v7515_v60, 4 }
 0x4e3   :  { %v3028_v26 = vpop.f32.mrf.mxu3  ;;  %v2521_v58 = vadd.f32 %v2455_v13, %v6959_v47 }
 0x4e4   :  { %v3657_v38 = vsel %vm3538_vm4, %v3531_v41, 0.0  ;;  %v3104_v51 = vadd.f32 %v3028_v26, %v2806_v11 }
 0x4e5   :  { %v3658_v56 = vadd.f32 %v3657_v38, %v3656_v39 }
 0x4e6   :  { %v3400_v23 = vadd.f32 %v3324_v40, %v3104_v51 }
 0x4e7   :  { %v3327_v57 = vpop.f32.mrf.mxu0 }
 0x4e8   :  { %v3468_v53 = vadd.f32 %v7505_v14, %v3400_v23  ;;  %v3603_v23 = vadd.f32 %v3602_v0, %v7515_v60 }
 0x4e9   :  { %v2733_v10 = vpop.f32.mrf.mxu2 }
 0x4ea   :  { %v3532_v18 = vmax.f32 %v3468_v53, 0.0  ;;  %v2807_v3 = vadd.f32 %v2733_v10, %v2517_v63  ;;  %v3604_v47 = vrot.slane %v3603_v23, 2 }
 0x4eb   :  { %v3031_v37 = vpop.f32.mrf.mxu3 }
 0x4ec   :  { %v3659_v49 = vsel %vm3538_vm4, %v3532_v18, 0.0  ;;  %v3105_v52 = vadd.f32 %v3031_v37, %v2807_v3  ;;  %v3605_v10 = vadd.f32 %v3604_v47, %v3603_v23 }
 0x4ed   :  { %v3660_v59 = vadd.f32 %v3659_v49, %v3658_v56 }
 0x4ee   :  { %v3401_v4 = vadd.f32 %v3327_v57, %v3105_v52  ;;  %v3606_v37 = vrot.slane %v3605_v10, 1 }
 0x4ef   :  { %v3330_v27 = vpop.f32.mrf.mxu0 }
 0x4f0   :  { %v3469_v20 = vadd.f32 %v7505_v14, %v3401_v4 }
 0x4f1   :  { %v2736_v6 = vpop.f32.mrf.mxu2 }
 0x4f2   :  { %v3533_v19 = vmax.f32 %v3469_v20, 0.0  ;;  %v2808_v5 = vadd.f32 %v2736_v6, %v2518_v28 }
 0x4f3   :  { %v3034_v30 = vpop.f32.mrf.mxu3 }
 0x4f4   :  { %v3661_v31 = vsel %vm3538_vm4, %v3533_v19, 0.0  ;;  %v3106_v22 = vadd.f32 %v3034_v30, %v2808_v5 }
 0x4f5   :  { %v3662_v44 = vadd.f32 %v3661_v31, %v3660_v59  ;;  %v3607_v59 = vadd.f32 %v3606_v37, %v3605_v10 }
 0x4f6   :  { %v3402_v8 = vadd.f32 %v3330_v27, %v3106_v22 }
 0x4f7   :  { %v3333_v36 = vpop.f32.mrf.mxu0  ;;  %v3677_v20 = vmul.f32 0.00390625, %v3607_v59 }
 0x4f8   :  { %v3470_v43 = vadd.f32 %v7505_v14, %v3402_v8 }
 0x4f9   :  { %v2739_v29 = vpop.f32.mrf.mxu2 }
 0x4fa   :  { %v3534_v2 = vmax.f32 %v3470_v43, 0.0  ;;  %v2809_v35 = vadd.f32 %v2739_v29, %v2519_v50 }
 0x4fb   :  { %v3037_v46 = vpop.f32.mrf.mxu3 }
 0x4fc   :  { %v3663_v55 = vsel %vm3538_vm4, %v3534_v2, 0.0  ;;  %v3107_v21 = vadd.f32 %v3037_v46, %v2809_v35 }
 0x4fd   :  { %v3664_v32 = vadd.f32 %v3663_v55, %v3662_v44 }
 0x4fe   :  { %v3403_v42 = vadd.f32 %v3333_v36, %v3107_v21 }
 0x4ff   :  { %v3336_v17 = vpop.f32.mrf.mxu0 }
 0x500   :  { %v3471_v33 = vadd.f32 %v7505_v14, %v3403_v42 }
 0x501   :  { %v2742_v25 = vpop.f32.mrf.mxu2 }
 0x502   :  { %v3535_v45 = vmax.f32 %v3471_v33, 0.0  ;;  %v2810_v7 = vadd.f32 %v2742_v25, %v2520_v16 }
 0x503   :  { %v3040_v9 = vpop.f32.mrf.mxu3 }
 0x504   :  { %v3665_v15 = vsel %vm3538_vm4, %v3535_v45, 0.0  ;;  %v3108_v48 = vadd.f32 %v3040_v9, %v2810_v7 }
 0x505   :  { %v3666_v61 = vadd.f32 %v3665_v15, %v3664_v32 }
 0x506   :  { %v3404_v39 = vadd.f32 %v3336_v17, %v3108_v48 }
 0x507   :  { %v3339_v11 = vpop.f32.mrf.mxu0 }
 0x508   :  { %v3472_v40 = vadd.f32 %v7505_v14, %v3404_v39 }
 0x509   :  { %v2745_v62 = vpop.f32.mrf.mxu2 }
 0x50a   :  { %v3536_v54 = vmax.f32 %v3472_v40, 0.0  ;;  %v2811_v12 = vadd.f32 %v2745_v62, %v2521_v58 }
 0x50b   :  { %v3043_v41 = vpop.f32.mrf.mxu3 }
 0x50c   :  { %v3667_v26 = vsel %vm3538_vm4, %v3536_v54, 0.0  ;;  %v3109_v38 = vadd.f32 %v3043_v41, %v2811_v12 }
 0x50d   :  { %v3668_v51 = vadd.f32 %v3667_v26, %v3666_v61 }
 0x50e   :  { %v3405_v56 = vadd.f32 %v3339_v11, %v3109_v38 }
 0x510   :  { %v3473_v1 = vadd.f32 %v7505_v14, %v3405_v56  ;;  %v4334_v14 = vld [vmem:[%s7828_s4] ss:$0 sm:$0xff] }
 0x512   :  { %v3537_v57 = vmax.f32 %v3473_v1, 0.0 }
 0x514   :  { %v3669_v63 = vsel %vm3538_vm4, %v3537_v57, 0.0 }
 0x515   :  { %v3670_v53 = vadd.f32 %v3669_v63, %v3668_v51 }
 0x517   :  { %v3671_v18 = vrot.slane %v3670_v53, 4 }
 0x519   :  { %v3672_v3 = vadd.f32 %v3671_v18, %v3670_v53 }
 0x51b   :  { %v3673_v49 = vrot.slane %v3672_v3, 2 }
 0x51d   :  { %v3674_v52 = vadd.f32 %v3673_v49, %v3672_v3 }
 0x51f   :  { %v3675_v4 = vrot.slane %v3674_v52, 1 }
 0x521   :  { %v3676_v27 = vadd.f32 %v3675_v4, %v3674_v52 }
 0x523   :  { %v3678_v28 = vmul.f32 0.00390625, %v3676_v27 }
 0x525   :  { %v3694_v60 = vsel %vm3693_vm5, %v3678_v28, %v3677_v20 }
 0x526   :  { %4328 = vmatmul.msk.f32.vlgmr.msrb.gmra.mxu1 %vm3538_vm4, %v3694_v60 }
 0x5a3   :  { %v3714_v24 = vpop.f32.mrf.mxu1 }
 0x5a4   :  { %v3715_v6 = vadd.f32 %v4334_v14, %v3714_v24 }
 0x5a6   :  { %3718 = vst.msk [vmem:[#allocation2] sm:$0x3] %vm3717_vm6, %v3715_v6 }
 0x5a7   :  { %3729 = dma.vmem_to_hbm [thread:$0]  %s3725_s19, 32, %s3727_s22, [#allocation3]  }
 0x5a8   :  { %4477 = dma.done.wait [#allocation3], 32  }
 0x5a9   :  { %4478 = vsyncadd [#allocation3], 4294967264 }
 0x5aa   :  { %3734 = vsyncpa [#allocation3], 1 }

</bundles_post_ra>
